<compile_context>
chip_gen: v7x
topology: tpu7x:2x2x1
jax: 0.10.0
libtpu: 0.0.40
codegen_flags: <defaults>
</compile_context>

<pallas_src>
import functools
import math

import jax
import jax.numpy as jnp
from jax import lax
from jax.experimental import pallas as pl
from jax.experimental.pallas import tpu as pltpu


# ----------------------------------------------------------------------------
# Pallas kernel: one full BertLayer for one (batch, seq-tile) grid point.
# ----------------------------------------------------------------------------
def bert_layer_kernel(
    xq_ref, xkv_ref, mask_ref,
    wq_ref, bq_ref, wkv_ref, bkv_ref,
    wo_ref, bo_ref, ln1g_ref, ln1b_ref,
    wi_ref, bi_ref, wd_ref, bd_ref, ln2g_ref, ln2b_ref,
    out_ref,
    kv_ref,     # VMEM scratch (S, 2H) bf16 — cached K|V for the current batch row
    ctx_ref,    # VMEM scratch (TS, H) bf16 — per-head context slab
    *, num_heads, head_dim, hidden, eps,
):
  TS = xq_ref.shape[0]
  S = xkv_ref.shape[0]
  s_idx = pl.program_id(1)

  # ---- K/V projection: once per batch row (first sequence tile only) -------
  # Grid axis 1 is "arbitrary", so the tiles of one batch row run in order on
  # a single core and the cached K/V scratch is valid for s_idx > 0.
  @pl.when(s_idx == 0)
  def _():
    kv = jnp.dot(xkv_ref[...], wkv_ref[...],
                 preferred_element_type=jnp.float32) + bkv_ref[...]
    kv_ref[...] = kv.astype(jnp.bfloat16)

  xq = xq_ref[...]                        # (TS, H) f32 residual stream
  xq_bf = xq.astype(jnp.bfloat16)

  def layer_norm(h, g_ref, b_ref):
    mu = jnp.mean(h, axis=-1, keepdims=True)
    var = jnp.mean(jnp.square(h - mu), axis=-1, keepdims=True)
    return (h - mu) * lax.rsqrt(var + eps) * g_ref[...] + b_ref[...]

  # ---- Q projection (1/sqrt(head_dim) folded into wq/bq by the wrapper) ----
  q_bf = (jnp.dot(xq_bf, wq_ref[...], preferred_element_type=jnp.float32)
          + bq_ref[...]).astype(jnp.bfloat16)

  # Hoisted mask penalty: broadcast to (TS, S) once, reused by every head.
  penalty = jnp.broadcast_to((2.0 - mask_ref[...]) * 1e6, (TS, S))

  # TODO(synk): for head_dim % 128 == 0 configs with many heads, switch to
  # lax.fori_loop with pl.ds(pl.multiple_of(h*head_dim, 128), head_dim) slices
  # to bound live ranges; at small static head counts the unroll is fine.
  for h in range(num_heads):
    lo = h * head_dim
    sl = slice(lo, lo + head_dim)
    qh = q_bf[:, sl]
    kh = kv_ref[:, sl]
    vh = kv_ref[:, hidden + lo:hidden + lo + head_dim]
    # scores = qh @ kh^T without an explicit transpose (contract last dims).
    scores = lax.dot_general(qh, kh, (((1,), (1,)), ((), ())),
                             preferred_element_type=jnp.float32)  # (TS, S) f32
    scores = scores - penalty
    # numerically stable softmax along keys, in f32
    scores = scores - jnp.max(scores, axis=-1, keepdims=True)
    e = jnp.exp(scores)
    inv_denom = pl.reciprocal(jnp.sum(e, axis=-1, keepdims=True), approx=True)
    probs = (e * inv_denom).astype(jnp.bfloat16)
    # TODO(synk): attention dropout is identity in eval mode.
    ctx_ref[:, sl] = jnp.dot(
        probs, vh, preferred_element_type=jnp.float32).astype(jnp.bfloat16)

  # ---- attention output + residual + LayerNorm ------------------------------
  attn_out = jnp.dot(ctx_ref[...], wo_ref[...],
                     preferred_element_type=jnp.float32) + bo_ref[...]
  h1 = layer_norm(attn_out + xq, ln1g_ref, ln1b_ref)

  # ---- feed-forward (exact erf GELU) + residual + LayerNorm -----------------
  # TODO(synk): tanh-approx GELU would move this work onto the EUP on v6e/v7x.
  inter = jnp.dot(h1.astype(jnp.bfloat16), wi_ref[...],
                  preferred_element_type=jnp.float32) + bi_ref[...]
  inter = inter * 0.5 * (1.0 + lax.erf(inter * (1.0 / math.sqrt(2.0))))
  ffn = jnp.dot(inter.astype(jnp.bfloat16), wd_ref[...],
                preferred_element_type=jnp.float32) + bd_ref[...]
  out_ref[...] = layer_norm(ffn + h1, ln2g_ref, ln2b_ref).astype(out_ref.dtype)


# ----------------------------------------------------------------------------
# Helpers: tile / VMEM-limit selection, weight BlockSpecs.
# ----------------------------------------------------------------------------
def _choose_seq_tile(S, target=512):
  """Largest tile <= target dividing S; prefer multiples of 256, then 128."""
  if S <= target:
    return S
  for step in (256, 128, 8):
    cands = [ts for ts in range(step, target + 1, step) if S % ts == 0]
    if cands:
      return max(cands)
  return S


@functools.lru_cache(maxsize=None)
def _vmem_limit_bytes():
  try:
    cap = pltpu.get_tpu_info().vmem_capacity_bytes
  except Exception:
    cap = 128 * 1024 * 1024
  # ~25% headroom for compiler scratch: ~48 MiB on v7x, ~96 MiB on v5e/v6e.
  return int(min(cap * 3 // 4, 100 * 1024 * 1024))


def _weight_spec(shape, single_buffer):
  # Constant block index -> weight stays resident across the grid; with
  # Buffered(1) it is also single-buffered (no DMA cost since it never moves).
  kwargs = {}
  if single_buffer and hasattr(pl, "Buffered"):
    kwargs["pipeline_mode"] = pl.Buffered(1)
  return pl.BlockSpec(shape, lambda b, s: (0,) * len(shape), **kwargs)


_WEIGHT_SINGLE_BUFFER = None   # resolved lazily on the first pallas_call


# ----------------------------------------------------------------------------
# Wrapper: one pallas_call per BertLayer, grid over (batch, sequence tiles).
# ----------------------------------------------------------------------------
def bert_layer_pallas(x, x_bf, mask, p, *, num_heads, eps, seq_tile=None):
  global _WEIGHT_SINGLE_BUFFER
  B, S, H = x.shape
  I = p["wi"].shape[1]
  head_dim = H // num_heads
  assert head_dim * num_heads == H
  TS = seq_tile if seq_tile is not None else _choose_seq_tile(S)
  assert S % TS == 0

  kernel = functools.partial(bert_layer_kernel, num_heads=num_heads,
                             head_dim=head_dim, hidden=H, eps=eps)

  def call(single_buffer):
    w = lambda shape: _weight_spec(shape, single_buffer)
    return pl.pallas_call(
        kernel,
        out_shape=jax.ShapeDtypeStruct((B, S, H), jnp.float32),
        grid=(B, S // TS),
        in_specs=[
            # query-row tile (also the residual stream); batch dim squeezed
            pl.BlockSpec((None, TS, H), lambda b, s: (b, s, 0)),
            # full-sequence bf16 block, consumed only at s == 0 for K/V
            pl.BlockSpec((None, S, H), lambda b, s: (b, 0, 0)),
            # attention mask (1, S)
            pl.BlockSpec((None, 1, S), lambda b, s: (b, 0, 0)),
            w((H, H)), w((1, H)),           # query (scale folded in)
            w((H, 2 * H)), w((1, 2 * H)),   # fused key|value
            w((H, H)), w((1, H)),           # attention output dense
            w((1, H)), w((1, H)),           # LayerNorm 1 (g, b)
            w((H, I)), w((1, I)),           # intermediate dense
            w((I, H)), w((1, H)),           # output dense
            w((1, H)), w((1, H)),           # LayerNorm 2 (g, b)
        ],
        out_specs=pl.BlockSpec((None, TS, H), lambda b, s: (b, s, 0)),
        scratch_shapes=[pltpu.VMEM((S, 2 * H), jnp.bfloat16),   # K|V cache
                        pltpu.VMEM((TS, H), jnp.bfloat16)],     # context slab
        compiler_params=pltpu.CompilerParams(
            dimension_semantics=("parallel", "arbitrary"),
            vmem_limit_bytes=_vmem_limit_bytes()),
    )(x, x_bf, mask,
      p["wq"], p["bq"], p["wkv"], p["bkv"], p["wo"], p["bo"],
      p["ln1g"], p["ln1b"], p["wi"], p["bi"], p["wd"], p["bd"],
      p["ln2g"], p["ln2b"])

  if _WEIGHT_SINGLE_BUFFER is None:
    try:
      out = jax.block_until_ready(call(True))
      _WEIGHT_SINGLE_BUFFER = True
      return out
    except Exception:
      # pipeline_mode=pl.Buffered(1) unsupported on this jax version/backend;
      # fall back to default double-buffered resident weights.
      _WEIGHT_SINGLE_BUFFER = False
  return call(_WEIGHT_SINGLE_BUFFER)


# ----------------------------------------------------------------------------
# One-time parameter preparation (hoisted out of the per-forward path).
# ----------------------------------------------------------------------------
def prepare_layer_params(p, num_heads):
  """Transpose nn.Linear weights to (in, out), cast to bf16, fuse K|V into one
  (H, 2H) weight, and fold 1/sqrt(head_dim) into the query projection."""
  bf16 = jnp.bfloat16
  H = p["wq"].shape[0]
  head_dim = H // num_heads
  scale = 1.0 / math.sqrt(head_dim)
  wkv = jnp.concatenate([p["wk"].T, p["wv"].T], axis=1)         # (H, 2H)
  bkv = jnp.concatenate([p["bk"], p["bv"]], axis=0)[None, :]    # (1, 2H) f32
  return {
      "wq": (p["wq"].T * scale).astype(bf16),
      "bq": (p["bq"] * scale)[None, :],
      "wkv": wkv.astype(bf16), "bkv": bkv,
      "wo": p["wo"].T.astype(bf16), "bo": p["bo"][None, :],
      "ln1g": p["ln1g"][None, :], "ln1b": p["ln1b"][None, :],
      "wi": p["wi"].T.astype(bf16), "bi": p["bi"][None, :],
      "wd": p["wd"].T.astype(bf16), "bd": p["bd"][None, :],
      "ln2g": p["ln2g"][None, :], "ln2b": p["ln2b"][None, :],
  }


def prepare_encoder_params(layer_params, num_heads):
  return [prepare_layer_params(p, num_heads) for p in layer_params]


def bert_encoder_pallas(hidden_states, attention_mask, prepared_params,
                        *, num_heads, eps):
  x = hidden_states
  for p in prepared_params:
    x_bf = x.astype(jnp.bfloat16)   # pre-cast K/V input once per layer
    x = bert_layer_pallas(x, x_bf, attention_mask, p,
                          num_heads=num_heads, eps=eps)
  return x


# ----------------------------------------------------------------------------
# Pure-JAX reference (mirrors the PyTorch module semantics, eval mode, f32).
# ----------------------------------------------------------------------------
def bert_encoder_ref(x, mask, layer_params, *, num_heads, eps):
  def ln(h, g, b):
    mu = jnp.mean(h, axis=-1, keepdims=True)
    var = jnp.mean(jnp.square(h - mu), axis=-1, keepdims=True)
    return (h - mu) / jnp.sqrt(var + eps) * g + b

  B, S, H = x.shape
  hd = H // num_heads
  for p in layer_params:
    q = x @ p["wq"].T + p["bq"]
    k = x @ p["wk"].T + p["bk"]
    v = x @ p["wv"].T + p["bv"]
    q = q.reshape(B, S, num_heads, hd).transpose(0, 2, 1, 3)
    k = k.reshape(B, S, num_heads, hd).transpose(0, 2, 1, 3)
    v = v.reshape(B, S, num_heads, hd).transpose(0, 2, 1, 3)
    scores = jnp.einsum("bhqd,bhkd->bhqk", q, k) / math.sqrt(hd)
    scores = scores - (2.0 - mask[:, None, :, :]) * 1e6
    probs = jax.nn.softmax(scores, axis=-1)
    ctx = jnp.einsum("bhqk,bhkd->bhqd", probs, v)
    ctx = ctx.transpose(0, 2, 1, 3).reshape(B, S, H)
    attn_out = ctx @ p["wo"].T + p["bo"]
    h1 = ln(attn_out + x, p["ln1g"], p["ln1b"])
    inter = h1 @ p["wi"].T + p["bi"]
    inter = inter * 0.5 * (1.0 + jax.lax.erf(inter / math.sqrt(2.0)))
    ffn = inter @ p["wd"].T + p["bd"]
    x = ln(ffn + h1, p["ln2g"], p["ln2b"])
  return x


# ----------------------------------------------------------------------------
# Deterministic parameter initialization.
# ----------------------------------------------------------------------------
def init_layer_params(key, hidden, intermediate):
  ks = jax.random.split(key, 6)
  s = 0.02
  return {
      "wq": s * jax.random.normal(ks[0], (hidden, hidden), jnp.float32),
      "bq": jnp.zeros((hidden,), jnp.float32),
      "wk": s * jax.random.normal(ks[1], (hidden, hidden), jnp.float32),
      "bk": jnp.zeros((hidden,), jnp.float32),
      "wv": s * jax.random.normal(ks[2], (hidden, hidden), jnp.float32),
      "bv": jnp.zeros((hidden,), jnp.float32),
      "wo": s * jax.random.normal(ks[3], (hidden, hidden), jnp.float32),
      "bo": jnp.zeros((hidden,), jnp.float32),
      "ln1g": jnp.ones((hidden,), jnp.float32),
      "ln1b": jnp.zeros((hidden,), jnp.float32),
      "wi": s * jax.random.normal(ks[4], (intermediate, hidden), jnp.float32),
      "bi": jnp.zeros((intermediate,), jnp.float32),
      "wd": s * jax.random.normal(ks[5], (hidden, intermediate), jnp.float32),
      "bd": jnp.zeros((hidden,), jnp.float32),
      "ln2g": jnp.ones((hidden,), jnp.float32),
      "ln2b": jnp.zeros((hidden,), jnp.float32),
  }


if __name__ == "__main__":
  # Small BertEncoder config
  B, S, H = 2, 8, 32
  NUM_HEADS = 4
  INTERMEDIATE = 64
  NUM_LAYERS = 2
  EPS = 1e-12

  root = jax.random.PRNGKey(0)
  k_x, k_layers = jax.random.split(root)
  hidden_states = jax.random.normal(k_x, (B, S, H), jnp.float32)

  # attention_mask per the module's convention: value 2 = attend, 1 = masked.
  attention_mask = jnp.full((B, 1, S), 2.0, dtype=jnp.float32)
  attention_mask = attention_mask.at[1, 0, 6:].set(1.0)

  layer_params = [
      init_layer_params(k, H, INTERMEDIATE)
      for k in jax.random.split(k_layers, NUM_LAYERS)
  ]

  # One-time weight preparation (transpose / bf16 / K|V fusion / scale fold).
  prepared = prepare_encoder_params(layer_params, NUM_HEADS)

  out = bert_encoder_pallas(
      hidden_states, attention_mask, prepared, num_heads=NUM_HEADS, eps=EPS)
  out = jax.block_until_ready(out)

  ref = bert_encoder_ref(
      hidden_states, attention_mask, layer_params, num_heads=NUM_HEADS, eps=EPS)

  assert out.shape == (B, S, H)
  assert jnp.allclose(out, ref, rtol=3e-2, atol=3e-2), "mismatch vs reference"

  print("KERNEL_OK")
</pallas_src>

<mosaic_0001>
module attributes {stable_mosaic.version = 11 : i64} {
  func.func @bert_layer_kernel(%arg0: i32, %arg1: i32, %arg2: memref<1x8x32xf32, #tpu.memory_space<vmem>>, %arg3: memref<1x8x32xbf16, #tpu.memory_space<vmem>>, %arg4: memref<1x1x8xf32, #tpu.memory_space<vmem>>, %arg5: memref<32x32xbf16, #tpu.memory_space<vmem>>, %arg6: memref<1x32xf32, #tpu.memory_space<vmem>>, %arg7: memref<32x64xbf16, #tpu.memory_space<vmem>>, %arg8: memref<1x64xf32, #tpu.memory_space<vmem>>, %arg9: memref<32x32xbf16, #tpu.memory_space<vmem>>, %arg10: memref<1x32xf32, #tpu.memory_space<vmem>>, %arg11: memref<1x32xf32, #tpu.memory_space<vmem>>, %arg12: memref<1x32xf32, #tpu.memory_space<vmem>>, %arg13: memref<32x64xbf16, #tpu.memory_space<vmem>>, %arg14: memref<1x64xf32, #tpu.memory_space<vmem>>, %arg15: memref<64x32xbf16, #tpu.memory_space<vmem>>, %arg16: memref<1x32xf32, #tpu.memory_space<vmem>>, %arg17: memref<1x32xf32, #tpu.memory_space<vmem>>, %arg18: memref<1x32xf32, #tpu.memory_space<vmem>>, %arg19: memref<1x8x32xf32, #tpu.memory_space<vmem>>, %arg20: memref<8x64xbf16, #tpu.memory_space<vmem>>, %arg21: memref<8x32xbf16, #tpu.memory_space<vmem>>) attributes {dimension_semantics = [#tpu.dimension_semantics<parallel>, #tpu.dimension_semantics<arbitrary>], iteration_bounds = array<i64: 2, 1>, scalar_prefetch = 0 : i64, scratch_operands = 2 : i64, tpu.core_type = #tpu.core_type<tc>, window_params = [{transform_indices = @transform_0, window_bounds = array<i64: 1, 8, 32>}, {transform_indices = @transform_1, window_bounds = array<i64: 1, 8, 32>}, {transform_indices = @transform_2, window_bounds = array<i64: 1, 1, 8>}, {pipeline_mode = #tpu.pipeline_mode<synchronous>, transform_indices = @transform_3, window_bounds = array<i64: 32, 32>}, {pipeline_mode = #tpu.pipeline_mode<synchronous>, transform_indices = @transform_4, window_bounds = array<i64: 1, 32>}, {pipeline_mode = #tpu.pipeline_mode<synchronous>, transform_indices = @transform_5, window_bounds = array<i64: 32, 64>}, {pipeline_mode = #tpu.pipeline_mode<synchronous>, transform_indices = @transform_6, window_bounds = array<i64: 1, 64>}, {pipeline_mode = #tpu.pipeline_mode<synchronous>, transform_indices = @transform_7, window_bounds = array<i64: 32, 32>}, {pipeline_mode = #tpu.pipeline_mode<synchronous>, transform_indices = @transform_8, window_bounds = array<i64: 1, 32>}, {pipeline_mode = #tpu.pipeline_mode<synchronous>, transform_indices = @transform_9, window_bounds = array<i64: 1, 32>}, {pipeline_mode = #tpu.pipeline_mode<synchronous>, transform_indices = @transform_10, window_bounds = array<i64: 1, 32>}, {pipeline_mode = #tpu.pipeline_mode<synchronous>, transform_indices = @transform_11, window_bounds = array<i64: 32, 64>}, {pipeline_mode = #tpu.pipeline_mode<synchronous>, transform_indices = @transform_12, window_bounds = array<i64: 1, 64>}, {pipeline_mode = #tpu.pipeline_mode<synchronous>, transform_indices = @transform_13, window_bounds = array<i64: 64, 32>}, {pipeline_mode = #tpu.pipeline_mode<synchronous>, transform_indices = @transform_14, window_bounds = array<i64: 1, 32>}, {pipeline_mode = #tpu.pipeline_mode<synchronous>, transform_indices = @transform_15, window_bounds = array<i64: 1, 32>}, {pipeline_mode = #tpu.pipeline_mode<synchronous>, transform_indices = @transform_16, window_bounds = array<i64: 1, 32>}, {transform_indices = @transform_17, window_bounds = array<i64: 1, 8, 32>}]} {
    %c0_i32 = arith.constant 0 : i32
    %0 = arith.cmpi eq, %arg1, %c0_i32 : i32
    %1 = arith.extui %0 : i1 to i32
    %c0_i32_0 = arith.constant 0 : i32
    %2 = arith.cmpi ne, %1, %c0_i32_0 : i32
    scf.if %2 {
      %c0_86 = arith.constant 0 : index
      %c0_87 = arith.constant 0 : index
      %c0_88 = arith.constant 0 : index
      %175 = vector.load %arg3[%c0_86, %c0_87, %c0_88] : memref<1x8x32xbf16, #tpu.memory_space<vmem>>, vector<1x8x32xbf16>
      %176 = vector.shape_cast %175 : vector<1x8x32xbf16> to vector<8x32xbf16>
      %c0_89 = arith.constant 0 : index
      %c0_90 = arith.constant 0 : index
      %177 = vector.load %arg7[%c0_89, %c0_90] : memref<32x64xbf16, #tpu.memory_space<vmem>>, vector<32x64xbf16>
      %cst_91 = arith.constant dense<0.000000e+00> : vector<8x64xf32>
      %178 = tpu.matmul %176, %177, %cst_91 {dimension_numbers = #tpu.dot_dimension_numbers<[1], [0], [0], [1], [0, 0, 1, 1], [], []>} : vector<8x32xbf16>, vector<32x64xbf16>, vector<8x64xf32> -> vector<8x64xf32>
      %c0_92 = arith.constant 0 : index
      %c0_93 = arith.constant 0 : index
      %179 = vector.load %arg8[%c0_92, %c0_93] : memref<1x64xf32, #tpu.memory_space<vmem>>, vector<1x64xf32>
      %180 = vector.broadcast %179 : vector<1x64xf32> to vector<8x64xf32>
      %181 = arith.addf %178, %180 : vector<8x64xf32>
      %182 = arith.truncf %181 : vector<8x64xf32> to vector<8x64xbf16>
      %c0_94 = arith.constant 0 : index
      %c0_95 = arith.constant 0 : index
      %183 = vector.load %arg20[%c0_94, %c0_95] : memref<8x64xbf16, #tpu.memory_space<vmem>>, vector<8x64xbf16>
      tpu.vector_store %arg20[%c0_94, %c0_95], %182 {strides = array<i32>} : memref<8x64xbf16, #tpu.memory_space<vmem>>, vector<8x64xbf16>,
    } else {
    }
    %c0 = arith.constant 0 : index
    %c0_1 = arith.constant 0 : index
    %c0_2 = arith.constant 0 : index
    %3 = vector.load %arg2[%c0, %c0_1, %c0_2] : memref<1x8x32xf32, #tpu.memory_space<vmem>>, vector<1x8x32xf32>
    %4 = vector.shape_cast %3 : vector<1x8x32xf32> to vector<8x32xf32>
    %5 = arith.truncf %4 : vector<8x32xf32> to vector<8x32xbf16>
    %c0_3 = arith.constant 0 : index
    %c0_4 = arith.constant 0 : index
    %6 = vector.load %arg5[%c0_3, %c0_4] : memref<32x32xbf16, #tpu.memory_space<vmem>>, vector<32x32xbf16>
    %cst = arith.constant dense<0.000000e+00> : vector<8x32xf32>
    %7 = tpu.matmul %5, %6, %cst {dimension_numbers = #tpu.dot_dimension_numbers<[1], [0], [0], [1], [0, 0, 1, 1], [], []>} : vector<8x32xbf16>, vector<32x32xbf16>, vector<8x32xf32> -> vector<8x32xf32>
    %c0_5 = arith.constant 0 : index
    %c0_6 = arith.constant 0 : index
    %8 = vector.load %arg6[%c0_5, %c0_6] : memref<1x32xf32, #tpu.memory_space<vmem>>, vector<1x32xf32>
    %9 = vector.broadcast %8 : vector<1x32xf32> to vector<8x32xf32>
    %10 = arith.addf %7, %9 : vector<8x32xf32>
    %11 = arith.truncf %10 : vector<8x32xf32> to vector<8x32xbf16>
    %c0_7 = arith.constant 0 : index
    %c0_8 = arith.constant 0 : index
    %c0_9 = arith.constant 0 : index
    %12 = vector.load %arg4[%c0_7, %c0_8, %c0_9] : memref<1x1x8xf32, #tpu.memory_space<vmem>>, vector<1x1x8xf32>
    %13 = vector.shape_cast %12 : vector<1x1x8xf32> to vector<1x8xf32>
    %cst_10 = arith.constant 2.000000e+00 : f32
    %14 = vector.broadcast %cst_10 : f32 to vector<1x8xf32>
    %15 = arith.subf %14, %13 : vector<1x8xf32>
    %cst_11 = arith.constant 1.000000e+06 : f32
    %16 = vector.broadcast %cst_11 : f32 to vector<1x8xf32>
    %17 = arith.mulf %15, %16 : vector<1x8xf32>
    %18 = vector.shape_cast %17 : vector<1x8xf32> to vector<1x8xf32>
    %19 = vector.broadcast %18 : vector<1x8xf32> to vector<8x8xf32>
    %20 = vector.extract_strided_slice %11 {offsets = [0, 0], sizes = [8, 8], strides = [1, 1]} : vector<8x32xbf16> to vector<8x8xbf16>
    %c0_12 = arith.constant 0 : index
    %c0_13 = arith.constant 0 : index
    %21 = vector.load %arg20[%c0_12, %c0_13] : memref<8x64xbf16, #tpu.memory_space<vmem>>, vector<8x8xbf16>
    %c0_14 = arith.constant 0 : index
    %c32 = arith.constant 32 : index
    %22 = vector.load %arg20[%c0_14, %c32] : memref<8x64xbf16, #tpu.memory_space<vmem>>, vector<8x8xbf16>
    %cst_15 = arith.constant dense<0.000000e+00> : vector<8x8xf32>
    %23 = tpu.matmul %20, %21, %cst_15 {dimension_numbers = #tpu.dot_dimension_numbers<[1], [1], [0], [0], [0, 0, 1, 0], [], []>} : vector<8x8xbf16>, vector<8x8xbf16>, vector<8x8xf32> -> vector<8x8xf32>
    %24 = arith.subf %23, %19 : vector<8x8xf32>
    %cst_16 = arith.constant dense<0xFF800000> : vector<8xf32>
    %25 = vector.multi_reduction <maximumf>, %24, %cst_16 [1] : vector<8x8xf32> to vector<8xf32>
    %26 = vector.shape_cast %25 : vector<8xf32> to vector<8x1xf32>
    %27 = vector.broadcast %26 : vector<8x1xf32> to vector<8x8xf32>
    %28 = arith.subf %24, %27 : vector<8x8xf32>
    %29 = math.exp %28 : vector<8x8xf32>
    %cst_17 = arith.constant dense<0.000000e+00> : vector<8xf32>
    %30 = vector.multi_reduction <add>, %29, %cst_17 [1] : vector<8x8xf32> to vector<8xf32>
    %31 = vector.shape_cast %30 : vector<8xf32> to vector<8x1xf32>
    %32 = tpu.reciprocal %31 {approx = true} : vector<8x1xf32> -> vector<8x1xf32>
    %33 = vector.broadcast %32 : vector<8x1xf32> to vector<8x8xf32>
    %34 = arith.mulf %29, %33 : vector<8x8xf32>
    %35 = arith.truncf %34 : vector<8x8xf32> to vector<8x8xbf16>
    %cst_18 = arith.constant dense<0.000000e+00> : vector<8x8xf32>
    %36 = tpu.matmul %35, %22, %cst_18 {dimension_numbers = #tpu.dot_dimension_numbers<[1], [0], [0], [1], [0, 0, 1, 1], [], []>} : vector<8x8xbf16>, vector<8x8xbf16>, vector<8x8xf32> -> vector<8x8xf32>
    %37 = arith.truncf %36 : vector<8x8xf32> to vector<8x8xbf16>
    %c0_19 = arith.constant 0 : index
    %c0_20 = arith.constant 0 : index
    %38 = vector.load %arg21[%c0_19, %c0_20] : memref<8x32xbf16, #tpu.memory_space<vmem>>, vector<8x8xbf16>
    tpu.vector_store %arg21[%c0_19, %c0_20], %37 {strides = array<i32>} : memref<8x32xbf16, #tpu.memory_space<vmem>>, vector<8x8xbf16>,
    %39 = vector.extract_strided_slice %11 {offsets = [0, 8], sizes = [8, 8], strides = [1, 1]} : vector<8x32xbf16> to vector<8x8xbf16>
    %c0_21 = arith.constant 0 : index
    %c8 = arith.constant 8 : index
    %40 = vector.load %arg20[%c0_21, %c8] : memref<8x64xbf16, #tpu.memory_space<vmem>>, vector<8x8xbf16>
    %c0_22 = arith.constant 0 : index
    %c40 = arith.constant 40 : index
    %41 = vector.load %arg20[%c0_22, %c40] : memref<8x64xbf16, #tpu.memory_space<vmem>>, vector<8x8xbf16>
    %cst_23 = arith.constant dense<0.000000e+00> : vector<8x8xf32>
    %42 = tpu.matmul %39, %40, %cst_23 {dimension_numbers = #tpu.dot_dimension_numbers<[1], [1], [0], [0], [0, 0, 1, 0], [], []>} : vector<8x8xbf16>, vector<8x8xbf16>, vector<8x8xf32> -> vector<8x8xf32>
    %43 = arith.subf %42, %19 : vector<8x8xf32>
    %cst_24 = arith.constant dense<0xFF800000> : vector<8xf32>
    %44 = vector.multi_reduction <maximumf>, %43, %cst_24 [1] : vector<8x8xf32> to vector<8xf32>
    %45 = vector.shape_cast %44 : vector<8xf32> to vector<8x1xf32>
    %46 = vector.broadcast %45 : vector<8x1xf32> to vector<8x8xf32>
    %47 = arith.subf %43, %46 : vector<8x8xf32>
    %48 = math.exp %47 : vector<8x8xf32>
    %cst_25 = arith.constant dense<0.000000e+00> : vector<8xf32>
    %49 = vector.multi_reduction <add>, %48, %cst_25 [1] : vector<8x8xf32> to vector<8xf32>
    %50 = vector.shape_cast %49 : vector<8xf32> to vector<8x1xf32>
    %51 = tpu.reciprocal %50 {approx = true} : vector<8x1xf32> -> vector<8x1xf32>
    %52 = vector.broadcast %51 : vector<8x1xf32> to vector<8x8xf32>
    %53 = arith.mulf %48, %52 : vector<8x8xf32>
    %54 = arith.truncf %53 : vector<8x8xf32> to vector<8x8xbf16>
    %cst_26 = arith.constant dense<0.000000e+00> : vector<8x8xf32>
    %55 = tpu.matmul %54, %41, %cst_26 {dimension_numbers = #tpu.dot_dimension_numbers<[1], [0], [0], [1], [0, 0, 1, 1], [], []>} : vector<8x8xbf16>, vector<8x8xbf16>, vector<8x8xf32> -> vector<8x8xf32>
    %56 = arith.truncf %55 : vector<8x8xf32> to vector<8x8xbf16>
    %c0_27 = arith.constant 0 : index
    %c8_28 = arith.constant 8 : index
    %57 = vector.load %arg21[%c0_27, %c8_28] : memref<8x32xbf16, #tpu.memory_space<vmem>>, vector<8x8xbf16>
    tpu.vector_store %arg21[%c0_27, %c8_28], %56 {strides = array<i32>} : memref<8x32xbf16, #tpu.memory_space<vmem>>, vector<8x8xbf16>,
    %58 = vector.extract_strided_slice %11 {offsets = [0, 16], sizes = [8, 8], strides = [1, 1]} : vector<8x32xbf16> to vector<8x8xbf16>
    %c0_29 = arith.constant 0 : index
    %c16 = arith.constant 16 : index
    %59 = vector.load %arg20[%c0_29, %c16] : memref<8x64xbf16, #tpu.memory_space<vmem>>, vector<8x8xbf16>
    %c0_30 = arith.constant 0 : index
    %c48 = arith.constant 48 : index
    %60 = vector.load %arg20[%c0_30, %c48] : memref<8x64xbf16, #tpu.memory_space<vmem>>, vector<8x8xbf16>
    %cst_31 = arith.constant dense<0.000000e+00> : vector<8x8xf32>
    %61 = tpu.matmul %58, %59, %cst_31 {dimension_numbers = #tpu.dot_dimension_numbers<[1], [1], [0], [0], [0, 0, 1, 0], [], []>} : vector<8x8xbf16>, vector<8x8xbf16>, vector<8x8xf32> -> vector<8x8xf32>
    %62 = arith.subf %61, %19 : vector<8x8xf32>
    %cst_32 = arith.constant dense<0xFF800000> : vector<8xf32>
    %63 = vector.multi_reduction <maximumf>, %62, %cst_32 [1] : vector<8x8xf32> to vector<8xf32>
    %64 = vector.shape_cast %63 : vector<8xf32> to vector<8x1xf32>
    %65 = vector.broadcast %64 : vector<8x1xf32> to vector<8x8xf32>
    %66 = arith.subf %62, %65 : vector<8x8xf32>
    %67 = math.exp %66 : vector<8x8xf32>
    %cst_33 = arith.constant dense<0.000000e+00> : vector<8xf32>
    %68 = vector.multi_reduction <add>, %67, %cst_33 [1] : vector<8x8xf32> to vector<8xf32>
    %69 = vector.shape_cast %68 : vector<8xf32> to vector<8x1xf32>
    %70 = tpu.reciprocal %69 {approx = true} : vector<8x1xf32> -> vector<8x1xf32>
    %71 = vector.broadcast %70 : vector<8x1xf32> to vector<8x8xf32>
    %72 = arith.mulf %67, %71 : vector<8x8xf32>
    %73 = arith.truncf %72 : vector<8x8xf32> to vector<8x8xbf16>
    %cst_34 = arith.constant dense<0.000000e+00> : vector<8x8xf32>
    %74 = tpu.matmul %73, %60, %cst_34 {dimension_numbers = #tpu.dot_dimension_numbers<[1], [0], [0], [1], [0, 0, 1, 1], [], []>} : vector<8x8xbf16>, vector<8x8xbf16>, vector<8x8xf32> -> vector<8x8xf32>
    %75 = arith.truncf %74 : vector<8x8xf32> to vector<8x8xbf16>
    %c0_35 = arith.constant 0 : index
    %c16_36 = arith.constant 16 : index
    %76 = vector.load %arg21[%c0_35, %c16_36] : memref<8x32xbf16, #tpu.memory_space<vmem>>, vector<8x8xbf16>
    tpu.vector_store %arg21[%c0_35, %c16_36], %75 {strides = array<i32>} : memref<8x32xbf16, #tpu.memory_space<vmem>>, vector<8x8xbf16>,
    %77 = vector.extract_strided_slice %11 {offsets = [0, 24], sizes = [8, 8], strides = [1, 1]} : vector<8x32xbf16> to vector<8x8xbf16>
    %c0_37 = arith.constant 0 : index
    %c24 = arith.constant 24 : index
    %78 = vector.load %arg20[%c0_37, %c24] : memref<8x64xbf16, #tpu.memory_space<vmem>>, vector<8x8xbf16>
    %c0_38 = arith.constant 0 : index
    %c56 = arith.constant 56 : index
    %79 = vector.load %arg20[%c0_38, %c56] : memref<8x64xbf16, #tpu.memory_space<vmem>>, vector<8x8xbf16>
    %cst_39 = arith.constant dense<0.000000e+00> : vector<8x8xf32>
    %80 = tpu.matmul %77, %78, %cst_39 {dimension_numbers = #tpu.dot_dimension_numbers<[1], [1], [0], [0], [0, 0, 1, 0], [], []>} : vector<8x8xbf16>, vector<8x8xbf16>, vector<8x8xf32> -> vector<8x8xf32>
    %81 = arith.subf %80, %19 : vector<8x8xf32>
    %cst_40 = arith.constant dense<0xFF800000> : vector<8xf32>
    %82 = vector.multi_reduction <maximumf>, %81, %cst_40 [1] : vector<8x8xf32> to vector<8xf32>
    %83 = vector.shape_cast %82 : vector<8xf32> to vector<8x1xf32>
    %84 = vector.broadcast %83 : vector<8x1xf32> to vector<8x8xf32>
    %85 = arith.subf %81, %84 : vector<8x8xf32>
    %86 = math.exp %85 : vector<8x8xf32>
    %cst_41 = arith.constant dense<0.000000e+00> : vector<8xf32>
    %87 = vector.multi_reduction <add>, %86, %cst_41 [1] : vector<8x8xf32> to vector<8xf32>
    %88 = vector.shape_cast %87 : vector<8xf32> to vector<8x1xf32>
    %89 = tpu.reciprocal %88 {approx = true} : vector<8x1xf32> -> vector<8x1xf32>
    %90 = vector.broadcast %89 : vector<8x1xf32> to vector<8x8xf32>
    %91 = arith.mulf %86, %90 : vector<8x8xf32>
    %92 = arith.truncf %91 : vector<8x8xf32> to vector<8x8xbf16>
    %cst_42 = arith.constant dense<0.000000e+00> : vector<8x8xf32>
    %93 = tpu.matmul %92, %79, %cst_42 {dimension_numbers = #tpu.dot_dimension_numbers<[1], [0], [0], [1], [0, 0, 1, 1], [], []>} : vector<8x8xbf16>, vector<8x8xbf16>, vector<8x8xf32> -> vector<8x8xf32>
    %94 = arith.truncf %93 : vector<8x8xf32> to vector<8x8xbf16>
    %c0_43 = arith.constant 0 : index
    %c24_44 = arith.constant 24 : index
    %95 = vector.load %arg21[%c0_43, %c24_44] : memref<8x32xbf16, #tpu.memory_space<vmem>>, vector<8x8xbf16>
    tpu.vector_store %arg21[%c0_43, %c24_44], %94 {strides = array<i32>} : memref<8x32xbf16, #tpu.memory_space<vmem>>, vector<8x8xbf16>,
    %c0_45 = arith.constant 0 : index
    %c0_46 = arith.constant 0 : index
    %96 = vector.load %arg21[%c0_45, %c0_46] : memref<8x32xbf16, #tpu.memory_space<vmem>>, vector<8x32xbf16>
    %c0_47 = arith.constant 0 : index
    %c0_48 = arith.constant 0 : index
    %97 = vector.load %arg9[%c0_47, %c0_48] : memref<32x32xbf16, #tpu.memory_space<vmem>>, vector<32x32xbf16>
    %cst_49 = arith.constant dense<0.000000e+00> : vector<8x32xf32>
    %98 = tpu.matmul %96, %97, %cst_49 {dimension_numbers = #tpu.dot_dimension_numbers<[1], [0], [0], [1], [0, 0, 1, 1], [], []>} : vector<8x32xbf16>, vector<32x32xbf16>, vector<8x32xf32> -> vector<8x32xf32>
    %c0_50 = arith.constant 0 : index
    %c0_51 = arith.constant 0 : index
    %99 = vector.load %arg10[%c0_50, %c0_51] : memref<1x32xf32, #tpu.memory_space<vmem>>, vector<1x32xf32>
    %100 = vector.broadcast %99 : vector<1x32xf32> to vector<8x32xf32>
    %101 = arith.addf %98, %100 : vector<8x32xf32>
    %102 = arith.addf %101, %4 : vector<8x32xf32>
    %cst_52 = arith.constant dense<0.000000e+00> : vector<8xf32>
    %103 = vector.multi_reduction <add>, %102, %cst_52 [1] : vector<8x32xf32> to vector<8xf32>
    %104 = vector.shape_cast %103 : vector<8xf32> to vector<8x1xf32>
    %cst_53 = arith.constant 3.200000e+01 : f32
    %105 = vector.broadcast %cst_53 : f32 to vector<8x1xf32>
    %106 = arith.divf %104, %105 : vector<8x1xf32>
    %107 = vector.broadcast %106 : vector<8x1xf32> to vector<8x32xf32>
    %108 = arith.subf %102, %107 : vector<8x32xf32>
    %109 = arith.mulf %108, %108 : vector<8x32xf32>
    %cst_54 = arith.constant dense<0.000000e+00> : vector<8xf32>
    %110 = vector.multi_reduction <add>, %109, %cst_54 [1] : vector<8x32xf32> to vector<8xf32>
    %111 = vector.shape_cast %110 : vector<8xf32> to vector<8x1xf32>
    %cst_55 = arith.constant 3.200000e+01 : f32
    %112 = vector.broadcast %cst_55 : f32 to vector<8x1xf32>
    %113 = arith.divf %111, %112 : vector<8x1xf32>
    %114 = vector.broadcast %106 : vector<8x1xf32> to vector<8x32xf32>
    %115 = arith.subf %102, %114 : vector<8x32xf32>
    %cst_56 = arith.constant 9.99999996E-13 : f32
    %116 = vector.broadcast %cst_56 : f32 to vector<8x1xf32>
    %117 = arith.addf %113, %116 : vector<8x1xf32>
    %118 = math.rsqrt %117 : vector<8x1xf32>
    %119 = vector.broadcast %118 : vector<8x1xf32> to vector<8x32xf32>
    %120 = arith.mulf %115, %119 : vector<8x32xf32>
    %c0_57 = arith.constant 0 : index
    %c0_58 = arith.constant 0 : index
    %121 = vector.load %arg11[%c0_57, %c0_58] : memref<1x32xf32, #tpu.memory_space<vmem>>, vector<1x32xf32>
    %122 = vector.broadcast %121 : vector<1x32xf32> to vector<8x32xf32>
    %123 = arith.mulf %120, %122 : vector<8x32xf32>
    %c0_59 = arith.constant 0 : index
    %c0_60 = arith.constant 0 : index
    %124 = vector.load %arg12[%c0_59, %c0_60] : memref<1x32xf32, #tpu.memory_space<vmem>>, vector<1x32xf32>
    %125 = vector.broadcast %124 : vector<1x32xf32> to vector<8x32xf32>
    %126 = arith.addf %123, %125 : vector<8x32xf32>
    %127 = arith.truncf %126 : vector<8x32xf32> to vector<8x32xbf16>
    %c0_61 = arith.constant 0 : index
    %c0_62 = arith.constant 0 : index
    %128 = vector.load %arg13[%c0_61, %c0_62] : memref<32x64xbf16, #tpu.memory_space<vmem>>, vector<32x64xbf16>
    %cst_63 = arith.constant dense<0.000000e+00> : vector<8x64xf32>
    %129 = tpu.matmul %127, %128, %cst_63 {dimension_numbers = #tpu.dot_dimension_numbers<[1], [0], [0], [1], [0, 0, 1, 1], [], []>} : vector<8x32xbf16>, vector<32x64xbf16>, vector<8x64xf32> -> vector<8x64xf32>
    %c0_64 = arith.constant 0 : index
    %c0_65 = arith.constant 0 : index
    %130 = vector.load %arg14[%c0_64, %c0_65] : memref<1x64xf32, #tpu.memory_space<vmem>>, vector<1x64xf32>
    %131 = vector.broadcast %130 : vector<1x64xf32> to vector<8x64xf32>
    %132 = arith.addf %129, %131 : vector<8x64xf32>
    %cst_66 = arith.constant 5.000000e-01 : f32
    %133 = vector.broadcast %cst_66 : f32 to vector<8x64xf32>
    %134 = arith.mulf %132, %133 : vector<8x64xf32>
    %cst_67 = arith.constant 0.707106769 : f32
    %135 = vector.broadcast %cst_67 : f32 to vector<8x64xf32>
    %136 = arith.mulf %132, %135 : vector<8x64xf32>
    %137 = math.erf %136 : vector<8x64xf32>
    %cst_68 = arith.constant 1.000000e+00 : f32
    %138 = vector.broadcast %cst_68 : f32 to vector<8x64xf32>
    %139 = arith.addf %138, %137 : vector<8x64xf32>
    %140 = arith.mulf %134, %139 : vector<8x64xf32>
    %141 = arith.truncf %140 : vector<8x64xf32> to vector<8x64xbf16>
    %c0_69 = arith.constant 0 : index
    %c0_70 = arith.constant 0 : index
    %142 = vector.load %arg15[%c0_69, %c0_70] : memref<64x32xbf16, #tpu.memory_space<vmem>>, vector<64x32xbf16>
    %cst_71 = arith.constant dense<0.000000e+00> : vector<8x32xf32>
    %143 = tpu.matmul %141, %142, %cst_71 {dimension_numbers = #tpu.dot_dimension_numbers<[1], [0], [0], [1], [0, 0, 1, 1], [], []>} : vector<8x64xbf16>, vector<64x32xbf16>, vector<8x32xf32> -> vector<8x32xf32>
    %c0_72 = arith.constant 0 : index
    %c0_73 = arith.constant 0 : index
    %144 = vector.load %arg16[%c0_72, %c0_73] : memref<1x32xf32, #tpu.memory_space<vmem>>, vector<1x32xf32>
    %145 = vector.broadcast %144 : vector<1x32xf32> to vector<8x32xf32>
    %146 = arith.addf %143, %145 : vector<8x32xf32>
    %147 = arith.addf %146, %126 : vector<8x32xf32>
    %cst_74 = arith.constant dense<0.000000e+00> : vector<8xf32>
    %148 = vector.multi_reduction <add>, %147, %cst_74 [1] : vector<8x32xf32> to vector<8xf32>
    %149 = vector.shape_cast %148 : vector<8xf32> to vector<8x1xf32>
    %cst_75 = arith.constant 3.200000e+01 : f32
    %150 = vector.broadcast %cst_75 : f32 to vector<8x1xf32>
    %151 = arith.divf %149, %150 : vector<8x1xf32>
    %152 = vector.broadcast %151 : vector<8x1xf32> to vector<8x32xf32>
    %153 = arith.subf %147, %152 : vector<8x32xf32>
    %154 = arith.mulf %153, %153 : vector<8x32xf32>
    %cst_76 = arith.constant dense<0.000000e+00> : vector<8xf32>
    %155 = vector.multi_reduction <add>, %154, %cst_76 [1] : vector<8x32xf32> to vector<8xf32>
    %156 = vector.shape_cast %155 : vector<8xf32> to vector<8x1xf32>
    %cst_77 = arith.constant 3.200000e+01 : f32
    %157 = vector.broadcast %cst_77 : f32 to vector<8x1xf32>
    %158 = arith.divf %156, %157 : vector<8x1xf32>
    %159 = vector.broadcast %151 : vector<8x1xf32> to vector<8x32xf32>
    %160 = arith.subf %147, %159 : vector<8x32xf32>
    %cst_78 = arith.constant 9.99999996E-13 : f32
    %161 = vector.broadcast %cst_78 : f32 to vector<8x1xf32>
    %162 = arith.addf %158, %161 : vector<8x1xf32>
    %163 = math.rsqrt %162 : vector<8x1xf32>
    %164 = vector.broadcast %163 : vector<8x1xf32> to vector<8x32xf32>
    %165 = arith.mulf %160, %164 : vector<8x32xf32>
    %c0_79 = arith.constant 0 : index
    %c0_80 = arith.constant 0 : index
    %166 = vector.load %arg17[%c0_79, %c0_80] : memref<1x32xf32, #tpu.memory_space<vmem>>, vector<1x32xf32>
    %167 = vector.broadcast %166 : vector<1x32xf32> to vector<8x32xf32>
    %168 = arith.mulf %165, %167 : vector<8x32xf32>
    %c0_81 = arith.constant 0 : index
    %c0_82 = arith.constant 0 : index
    %169 = vector.load %arg18[%c0_81, %c0_82] : memref<1x32xf32, #tpu.memory_space<vmem>>, vector<1x32xf32>
    %170 = vector.broadcast %169 : vector<1x32xf32> to vector<8x32xf32>
    %171 = arith.addf %168, %170 : vector<8x32xf32>
    %c0_83 = arith.constant 0 : index
    %c0_84 = arith.constant 0 : index
    %c0_85 = arith.constant 0 : index
    %172 = vector.load %arg19[%c0_83, %c0_84, %c0_85] : memref<1x8x32xf32, #tpu.memory_space<vmem>>, vector<1x8x32xf32>
    %173 = vector.shape_cast %172 : vector<1x8x32xf32> to vector<8x32xf32>
    %174 = vector.shape_cast %171 : vector<8x32xf32> to vector<1x8x32xf32>
    tpu.vector_store %arg19[%c0_83, %c0_84, %c0_85], %174 {strides = array<i32>} : memref<1x8x32xf32, #tpu.memory_space<vmem>>, vector<1x8x32xf32>,
    return
  }
  func.func @transform_0(%arg0: i32, %arg1: i32) -> (i32, i32, i32) {
    %c0_i32 = arith.constant 0 : i32
    %c0_i32_0 = arith.constant 0 : i32
    return %arg0, %arg1, %c0_i32 : i32, i32, i32
  }
  func.func @transform_1(%arg0: i32, %arg1: i32) -> (i32, i32, i32) {
    %c0_i32 = arith.constant 0 : i32
    %c0_i32_0 = arith.constant 0 : i32
    %c0_i32_1 = arith.constant 0 : i32
    return %arg0, %c0_i32, %c0_i32_0 : i32, i32, i32
  }
  func.func @transform_2(%arg0: i32, %arg1: i32) -> (i32, i32, i32) {
    %c0_i32 = arith.constant 0 : i32
    %c0_i32_0 = arith.constant 0 : i32
    %c0_i32_1 = arith.constant 0 : i32
    return %arg0, %c0_i32, %c0_i32_0 : i32, i32, i32
  }
  func.func @transform_3(%arg0: i32, %arg1: i32) -> (i32, i32) {
    %c0_i32 = arith.constant 0 : i32
    %c0_i32_0 = arith.constant 0 : i32
    %c0_i32_1 = arith.constant 0 : i32
    return %c0_i32, %c0_i32_0 : i32, i32
  }
  func.func @transform_4(%arg0: i32, %arg1: i32) -> (i32, i32) {
    %c0_i32 = arith.constant 0 : i32
    %c0_i32_0 = arith.constant 0 : i32
    %c0_i32_1 = arith.constant 0 : i32
    return %c0_i32, %c0_i32_0 : i32, i32
  }
  func.func @transform_5(%arg0: i32, %arg1: i32) -> (i32, i32) {
    %c0_i32 = arith.constant 0 : i32
    %c0_i32_0 = arith.constant 0 : i32
    %c0_i32_1 = arith.constant 0 : i32
    return %c0_i32, %c0_i32_0 : i32, i32
  }
  func.func @transform_6(%arg0: i32, %arg1: i32) -> (i32, i32) {
    %c0_i32 = arith.constant 0 : i32
    %c0_i32_0 = arith.constant 0 : i32
    %c0_i32_1 = arith.constant 0 : i32
    return %c0_i32, %c0_i32_0 : i32, i32
  }
  func.func @transform_7(%arg0: i32, %arg1: i32) -> (i32, i32) {
    %c0_i32 = arith.constant 0 : i32
    %c0_i32_0 = arith.constant 0 : i32
    %c0_i32_1 = arith.constant 0 : i32
    return %c0_i32, %c0_i32_0 : i32, i32
  }
  func.func @transform_8(%arg0: i32, %arg1: i32) -> (i32, i32) {
    %c0_i32 = arith.constant 0 : i32
    %c0_i32_0 = arith.constant 0 : i32
    %c0_i32_1 = arith.constant 0 : i32
    return %c0_i32, %c0_i32_0 : i32, i32
  }
  func.func @transform_9(%arg0: i32, %arg1: i32) -> (i32, i32) {
    %c0_i32 = arith.constant 0 : i32
    %c0_i32_0 = arith.constant 0 : i32
    %c0_i32_1 = arith.constant 0 : i32
    return %c0_i32, %c0_i32_0 : i32, i32
  }
  func.func @transform_10(%arg0: i32, %arg1: i32) -> (i32, i32) {
    %c0_i32 = arith.constant 0 : i32
    %c0_i32_0 = arith.constant 0 : i32
    %c0_i32_1 = arith.constant 0 : i32
    return %c0_i32, %c0_i32_0 : i32, i32
  }
  func.func @transform_11(%arg0: i32, %arg1: i32) -> (i32, i32) {
    %c0_i32 = arith.constant 0 : i32
    %c0_i32_0 = arith.constant 0 : i32
    %c0_i32_1 = arith.constant 0 : i32
    return %c0_i32, %c0_i32_0 : i32, i32
  }
  func.func @transform_12(%arg0: i32, %arg1: i32) -> (i32, i32) {
    %c0_i32 = arith.constant 0 : i32
    %c0_i32_0 = arith.constant 0 : i32
    %c0_i32_1 = arith.constant 0 : i32
    return %c0_i32, %c0_i32_0 : i32, i32
  }
  func.func @transform_13(%arg0: i32, %arg1: i32) -> (i32, i32) {
    %c0_i32 = arith.constant 0 : i32
    %c0_i32_0 = arith.constant 0 : i32
    %c0_i32_1 = arith.constant 0 : i32
    return %c0_i32, %c0_i32_0 : i32, i32
  }
  func.func @transform_14(%arg0: i32, %arg1: i32) -> (i32, i32) {
    %c0_i32 = arith.constant 0 : i32
    %c0_i32_0 = arith.constant 0 : i32
    %c0_i32_1 = arith.constant 0 : i32
    return %c0_i32, %c0_i32_0 : i32, i32
  }
  func.func @transform_15(%arg0: i32, %arg1: i32) -> (i32, i32) {
    %c0_i32 = arith.constant 0 : i32
    %c0_i32_0 = arith.constant 0 : i32
    %c0_i32_1 = arith.constant 0 : i32
    return %c0_i32, %c0_i32_0 : i32, i32
  }
  func.func @transform_16(%arg0: i32, %arg1: i32) -> (i32, i32) {
    %c0_i32 = arith.constant 0 : i32
    %c0_i32_0 = arith.constant 0 : i32
    %c0_i32_1 = arith.constant 0 : i32
    return %c0_i32, %c0_i32_0 : i32, i32
  }
  func.func @transform_17(%arg0: i32, %arg1: i32) -> (i32, i32, i32) {
    %c0_i32 = arith.constant 0 : i32
    %c0_i32_0 = arith.constant 0 : i32
    return %arg0, %arg1, %c0_i32 : i32, i32, i32
  }
}

module attributes {stable_mosaic.version = 11 : i64} {
  func.func @bert_layer_kernel(%arg0: i32, %arg1: i32, %arg2: memref<1x8x32xf32, #tpu.memory_space<vmem>>, %arg3: memref<1x8x32xbf16, #tpu.memory_space<vmem>>, %arg4: memref<1x1x8xf32, #tpu.memory_space<vmem>>, %arg5: memref<32x32xbf16, #tpu.memory_space<vmem>>, %arg6: memref<1x32xf32, #tpu.memory_space<vmem>>, %arg7: memref<32x64xbf16, #tpu.memory_space<vmem>>, %arg8: memref<1x64xf32, #tpu.memory_space<vmem>>, %arg9: memref<32x32xbf16, #tpu.memory_space<vmem>>, %arg10: memref<1x32xf32, #tpu.memory_space<vmem>>, %arg11: memref<1x32xf32, #tpu.memory_space<vmem>>, %arg12: memref<1x32xf32, #tpu.memory_space<vmem>>, %arg13: memref<32x64xbf16, #tpu.memory_space<vmem>>, %arg14: memref<1x64xf32, #tpu.memory_space<vmem>>, %arg15: memref<64x32xbf16, #tpu.memory_space<vmem>>, %arg16: memref<1x32xf32, #tpu.memory_space<vmem>>, %arg17: memref<1x32xf32, #tpu.memory_space<vmem>>, %arg18: memref<1x32xf32, #tpu.memory_space<vmem>>, %arg19: memref<1x8x32xf32, #tpu.memory_space<vmem>>, %arg20: memref<8x64xbf16, #tpu.memory_space<vmem>>, %arg21: memref<8x32xbf16, #tpu.memory_space<vmem>>) attributes {dimension_semantics = [#tpu.dimension_semantics<parallel>, #tpu.dimension_semantics<arbitrary>], iteration_bounds = array<i64: 2, 1>, scalar_prefetch = 0 : i64, scratch_operands = 2 : i64, tpu.core_type = #tpu.core_type<tc>, window_params = [{transform_indices = @transform_0, window_bounds = array<i64: 1, 8, 32>}, {transform_indices = @transform_1, window_bounds = array<i64: 1, 8, 32>}, {transform_indices = @transform_2, window_bounds = array<i64: 1, 1, 8>}, {pipeline_mode = #tpu.pipeline_mode<synchronous>, transform_indices = @transform_3, window_bounds = array<i64: 32, 32>}, {pipeline_mode = #tpu.pipeline_mode<synchronous>, transform_indices = @transform_4, window_bounds = array<i64: 1, 32>}, {pipeline_mode = #tpu.pipeline_mode<synchronous>, transform_indices = @transform_5, window_bounds = array<i64: 32, 64>}, {pipeline_mode = #tpu.pipeline_mode<synchronous>, transform_indices = @transform_6, window_bounds = array<i64: 1, 64>}, {pipeline_mode = #tpu.pipeline_mode<synchronous>, transform_indices = @transform_7, window_bounds = array<i64: 32, 32>}, {pipeline_mode = #tpu.pipeline_mode<synchronous>, transform_indices = @transform_8, window_bounds = array<i64: 1, 32>}, {pipeline_mode = #tpu.pipeline_mode<synchronous>, transform_indices = @transform_9, window_bounds = array<i64: 1, 32>}, {pipeline_mode = #tpu.pipeline_mode<synchronous>, transform_indices = @transform_10, window_bounds = array<i64: 1, 32>}, {pipeline_mode = #tpu.pipeline_mode<synchronous>, transform_indices = @transform_11, window_bounds = array<i64: 32, 64>}, {pipeline_mode = #tpu.pipeline_mode<synchronous>, transform_indices = @transform_12, window_bounds = array<i64: 1, 64>}, {pipeline_mode = #tpu.pipeline_mode<synchronous>, transform_indices = @transform_13, window_bounds = array<i64: 64, 32>}, {pipeline_mode = #tpu.pipeline_mode<synchronous>, transform_indices = @transform_14, window_bounds = array<i64: 1, 32>}, {pipeline_mode = #tpu.pipeline_mode<synchronous>, transform_indices = @transform_15, window_bounds = array<i64: 1, 32>}, {pipeline_mode = #tpu.pipeline_mode<synchronous>, transform_indices = @transform_16, window_bounds = array<i64: 1, 32>}, {transform_indices = @transform_17, window_bounds = array<i64: 1, 8, 32>}]} {
    %c0_i32 = arith.constant 0 : i32
    %0 = arith.cmpi eq, %arg1, %c0_i32 : i32
    %1 = arith.extui %0 : i1 to i32
    %c0_i32_0 = arith.constant 0 : i32
    %2 = arith.cmpi ne, %1, %c0_i32_0 : i32
    scf.if %2 {
      %c0_86 = arith.constant 0 : index
      %c0_87 = arith.constant 0 : index
      %c0_88 = arith.constant 0 : index
      %175 = vector.load %arg3[%c0_86, %c0_87, %c0_88] : memref<1x8x32xbf16, #tpu.memory_space<vmem>>, vector<1x8x32xbf16>
      %176 = vector.shape_cast %175 : vector<1x8x32xbf16> to vector<8x32xbf16>
      %c0_89 = arith.constant 0 : index
      %c0_90 = arith.constant 0 : index
      %177 = vector.load %arg7[%c0_89, %c0_90] : memref<32x64xbf16, #tpu.memory_space<vmem>>, vector<32x64xbf16>
      %cst_91 = arith.constant dense<0.000000e+00> : vector<8x64xf32>
      %178 = tpu.matmul %176, %177, %cst_91 {dimension_numbers = #tpu.dot_dimension_numbers<[1], [0], [0], [1], [0, 0, 1, 1], [], []>} : vector<8x32xbf16>, vector<32x64xbf16>, vector<8x64xf32> -> vector<8x64xf32>
      %c0_92 = arith.constant 0 : index
      %c0_93 = arith.constant 0 : index
      %179 = vector.load %arg8[%c0_92, %c0_93] : memref<1x64xf32, #tpu.memory_space<vmem>>, vector<1x64xf32>
      %180 = vector.broadcast %179 : vector<1x64xf32> to vector<8x64xf32>
      %181 = arith.addf %178, %180 : vector<8x64xf32>
      %182 = arith.truncf %181 : vector<8x64xf32> to vector<8x64xbf16>
      %c0_94 = arith.constant 0 : index
      %c0_95 = arith.constant 0 : index
      %183 = vector.load %arg20[%c0_94, %c0_95] : memref<8x64xbf16, #tpu.memory_space<vmem>>, vector<8x64xbf16>
      tpu.vector_store %arg20[%c0_94, %c0_95], %182 {strides = array<i32>} : memref<8x64xbf16, #tpu.memory_space<vmem>>, vector<8x64xbf16>,
    } else {
    }
    %c0 = arith.constant 0 : index
    %c0_1 = arith.constant 0 : index
    %c0_2 = arith.constant 0 : index
    %3 = vector.load %arg2[%c0, %c0_1, %c0_2] : memref<1x8x32xf32, #tpu.memory_space<vmem>>, vector<1x8x32xf32>
    %4 = vector.shape_cast %3 : vector<1x8x32xf32> to vector<8x32xf32>
    %5 = arith.truncf %4 : vector<8x32xf32> to vector<8x32xbf16>
    %c0_3 = arith.constant 0 : index
    %c0_4 = arith.constant 0 : index
    %6 = vector.load %arg5[%c0_3, %c0_4] : memref<32x32xbf16, #tpu.memory_space<vmem>>, vector<32x32xbf16>
    %cst = arith.constant dense<0.000000e+00> : vector<8x32xf32>
    %7 = tpu.matmul %5, %6, %cst {dimension_numbers = #tpu.dot_dimension_numbers<[1], [0], [0], [1], [0, 0, 1, 1], [], []>} : vector<8x32xbf16>, vector<32x32xbf16>, vector<8x32xf32> -> vector<8x32xf32>
    %c0_5 = arith.constant 0 : index
    %c0_6 = arith.constant 0 : index
    %8 = vector.load %arg6[%c0_5, %c0_6] : memref<1x32xf32, #tpu.memory_space<vmem>>, vector<1x32xf32>
    %9 = vector.broadcast %8 : vector<1x32xf32> to vector<8x32xf32>
    %10 = arith.addf %7, %9 : vector<8x32xf32>
    %11 = arith.truncf %10 : vector<8x32xf32> to vector<8x32xbf16>
    %c0_7 = arith.constant 0 : index
    %c0_8 = arith.constant 0 : index
    %c0_9 = arith.constant 0 : index
    %12 = vector.load %arg4[%c0_7, %c0_8, %c0_9] : memref<1x1x8xf32, #tpu.memory_space<vmem>>, vector<1x1x8xf32>
    %13 = vector.shape_cast %12 : vector<1x1x8xf32> to vector<1x8xf32>
    %cst_10 = arith.constant 2.000000e+00 : f32
    %14 = vector.broadcast %cst_10 : f32 to vector<1x8xf32>
    %15 = arith.subf %14, %13 : vector<1x8xf32>
    %cst_11 = arith.constant 1.000000e+06 : f32
    %16 = vector.broadcast %cst_11 : f32 to vector<1x8xf32>
    %17 = arith.mulf %15, %16 : vector<1x8xf32>
    %18 = vector.shape_cast %17 : vector<1x8xf32> to vector<1x8xf32>
    %19 = vector.broadcast %18 : vector<1x8xf32> to vector<8x8xf32>
    %20 = vector.extract_strided_slice %11 {offsets = [0, 0], sizes = [8, 8], strides = [1, 1]} : vector<8x32xbf16> to vector<8x8xbf16>
    %c0_12 = arith.constant 0 : index
    %c0_13 = arith.constant 0 : index
    %21 = vector.load %arg20[%c0_12, %c0_13] : memref<8x64xbf16, #tpu.memory_space<vmem>>, vector<8x8xbf16>
    %c0_14 = arith.constant 0 : index
    %c32 = arith.constant 32 : index
    %22 = vector.load %arg20[%c0_14, %c32] : memref<8x64xbf16, #tpu.memory_space<vmem>>, vector<8x8xbf16>
    %cst_15 = arith.constant dense<0.000000e+00> : vector<8x8xf32>
    %23 = tpu.matmul %20, %21, %cst_15 {dimension_numbers = #tpu.dot_dimension_numbers<[1], [1], [0], [0], [0, 0, 1, 0], [], []>} : vector<8x8xbf16>, vector<8x8xbf16>, vector<8x8xf32> -> vector<8x8xf32>
    %24 = arith.subf %23, %19 : vector<8x8xf32>
    %cst_16 = arith.constant dense<0xFF800000> : vector<8xf32>
    %25 = vector.multi_reduction <maximumf>, %24, %cst_16 [1] : vector<8x8xf32> to vector<8xf32>
    %26 = vector.shape_cast %25 : vector<8xf32> to vector<8x1xf32>
    %27 = vector.broadcast %26 : vector<8x1xf32> to vector<8x8xf32>
    %28 = arith.subf %24, %27 : vector<8x8xf32>
    %29 = math.exp %28 : vector<8x8xf32>
    %cst_17 = arith.constant dense<0.000000e+00> : vector<8xf32>
    %30 = vector.multi_reduction <add>, %29, %cst_17 [1] : vector<8x8xf32> to vector<8xf32>
    %31 = vector.shape_cast %30 : vector<8xf32> to vector<8x1xf32>
    %32 = tpu.reciprocal %31 {approx = true} : vector<8x1xf32> -> vector<8x1xf32>
    %33 = vector.broadcast %32 : vector<8x1xf32> to vector<8x8xf32>
    %34 = arith.mulf %29, %33 : vector<8x8xf32>
    %35 = arith.truncf %34 : vector<8x8xf32> to vector<8x8xbf16>
    %cst_18 = arith.constant dense<0.000000e+00> : vector<8x8xf32>
    %36 = tpu.matmul %35, %22, %cst_18 {dimension_numbers = #tpu.dot_dimension_numbers<[1], [0], [0], [1], [0, 0, 1, 1], [], []>} : vector<8x8xbf16>, vector<8x8xbf16>, vector<8x8xf32> -> vector<8x8xf32>
    %37 = arith.truncf %36 : vector<8x8xf32> to vector<8x8xbf16>
    %c0_19 = arith.constant 0 : index
    %c0_20 = arith.constant 0 : index
    %38 = vector.load %arg21[%c0_19, %c0_20] : memref<8x32xbf16, #tpu.memory_space<vmem>>, vector<8x8xbf16>
    tpu.vector_store %arg21[%c0_19, %c0_20], %37 {strides = array<i32>} : memref<8x32xbf16, #tpu.memory_space<vmem>>, vector<8x8xbf16>,
    %39 = vector.extract_strided_slice %11 {offsets = [0, 8], sizes = [8, 8], strides = [1, 1]} : vector<8x32xbf16> to vector<8x8xbf16>
    %c0_21 = arith.constant 0 : index
    %c8 = arith.constant 8 : index
    %40 = vector.load %arg20[%c0_21, %c8] : memref<8x64xbf16, #tpu.memory_space<vmem>>, vector<8x8xbf16>
    %c0_22 = arith.constant 0 : index
    %c40 = arith.constant 40 : index
    %41 = vector.load %arg20[%c0_22, %c40] : memref<8x64xbf16, #tpu.memory_space<vmem>>, vector<8x8xbf16>
    %cst_23 = arith.constant dense<0.000000e+00> : vector<8x8xf32>
    %42 = tpu.matmul %39, %40, %cst_23 {dimension_numbers = #tpu.dot_dimension_numbers<[1], [1], [0], [0], [0, 0, 1, 0], [], []>} : vector<8x8xbf16>, vector<8x8xbf16>, vector<8x8xf32> -> vector<8x8xf32>
    %43 = arith.subf %42, %19 : vector<8x8xf32>
    %cst_24 = arith.constant dense<0xFF800000> : vector<8xf32>
    %44 = vector.multi_reduction <maximumf>, %43, %cst_24 [1] : vector<8x8xf32> to vector<8xf32>
    %45 = vector.shape_cast %44 : vector<8xf32> to vector<8x1xf32>
    %46 = vector.broadcast %45 : vector<8x1xf32> to vector<8x8xf32>
    %47 = arith.subf %43, %46 : vector<8x8xf32>
    %48 = math.exp %47 : vector<8x8xf32>
    %cst_25 = arith.constant dense<0.000000e+00> : vector<8xf32>
    %49 = vector.multi_reduction <add>, %48, %cst_25 [1] : vector<8x8xf32> to vector<8xf32>
    %50 = vector.shape_cast %49 : vector<8xf32> to vector<8x1xf32>
    %51 = tpu.reciprocal %50 {approx = true} : vector<8x1xf32> -> vector<8x1xf32>
    %52 = vector.broadcast %51 : vector<8x1xf32> to vector<8x8xf32>
    %53 = arith.mulf %48, %52 : vector<8x8xf32>
    %54 = arith.truncf %53 : vector<8x8xf32> to vector<8x8xbf16>
    %cst_26 = arith.constant dense<0.000000e+00> : vector<8x8xf32>
    %55 = tpu.matmul %54, %41, %cst_26 {dimension_numbers = #tpu.dot_dimension_numbers<[1], [0], [0], [1], [0, 0, 1, 1], [], []>} : vector<8x8xbf16>, vector<8x8xbf16>, vector<8x8xf32> -> vector<8x8xf32>
    %56 = arith.truncf %55 : vector<8x8xf32> to vector<8x8xbf16>
    %c0_27 = arith.constant 0 : index
    %c8_28 = arith.constant 8 : index
    %57 = vector.load %arg21[%c0_27, %c8_28] : memref<8x32xbf16, #tpu.memory_space<vmem>>, vector<8x8xbf16>
    tpu.vector_store %arg21[%c0_27, %c8_28], %56 {strides = array<i32>} : memref<8x32xbf16, #tpu.memory_space<vmem>>, vector<8x8xbf16>,
    %58 = vector.extract_strided_slice %11 {offsets = [0, 16], sizes = [8, 8], strides = [1, 1]} : vector<8x32xbf16> to vector<8x8xbf16>
    %c0_29 = arith.constant 0 : index
    %c16 = arith.constant 16 : index
    %59 = vector.load %arg20[%c0_29, %c16] : memref<8x64xbf16, #tpu.memory_space<vmem>>, vector<8x8xbf16>
    %c0_30 = arith.constant 0 : index
    %c48 = arith.constant 48 : index
    %60 = vector.load %arg20[%c0_30, %c48] : memref<8x64xbf16, #tpu.memory_space<vmem>>, vector<8x8xbf16>
    %cst_31 = arith.constant dense<0.000000e+00> : vector<8x8xf32>
    %61 = tpu.matmul %58, %59, %cst_31 {dimension_numbers = #tpu.dot_dimension_numbers<[1], [1], [0], [0], [0, 0, 1, 0], [], []>} : vector<8x8xbf16>, vector<8x8xbf16>, vector<8x8xf32> -> vector<8x8xf32>
    %62 = arith.subf %61, %19 : vector<8x8xf32>
    %cst_32 = arith.constant dense<0xFF800000> : vector<8xf32>
    %63 = vector.multi_reduction <maximumf>, %62, %cst_32 [1] : vector<8x8xf32> to vector<8xf32>
    %64 = vector.shape_cast %63 : vector<8xf32> to vector<8x1xf32>
    %65 = vector.broadcast %64 : vector<8x1xf32> to vector<8x8xf32>
    %66 = arith.subf %62, %65 : vector<8x8xf32>
    %67 = math.exp %66 : vector<8x8xf32>
    %cst_33 = arith.constant dense<0.000000e+00> : vector<8xf32>
    %68 = vector.multi_reduction <add>, %67, %cst_33 [1] : vector<8x8xf32> to vector<8xf32>
    %69 = vector.shape_cast %68 : vector<8xf32> to vector<8x1xf32>
    %70 = tpu.reciprocal %69 {approx = true} : vector<8x1xf32> -> vector<8x1xf32>
    %71 = vector.broadcast %70 : vector<8x1xf32> to vector<8x8xf32>
    %72 = arith.mulf %67, %71 : vector<8x8xf32>
    %73 = arith.truncf %72 : vector<8x8xf32> to vector<8x8xbf16>
    %cst_34 = arith.constant dense<0.000000e+00> : vector<8x8xf32>
    %74 = tpu.matmul %73, %60, %cst_34 {dimension_numbers = #tpu.dot_dimension_numbers<[1], [0], [0], [1], [0, 0, 1, 1], [], []>} : vector<8x8xbf16>, vector<8x8xbf16>, vector<8x8xf32> -> vector<8x8xf32>
    %75 = arith.truncf %74 : vector<8x8xf32> to vector<8x8xbf16>
    %c0_35 = arith.constant 0 : index
    %c16_36 = arith.constant 16 : index
    %76 = vector.load %arg21[%c0_35, %c16_36] : memref<8x32xbf16, #tpu.memory_space<vmem>>, vector<8x8xbf16>
    tpu.vector_store %arg21[%c0_35, %c16_36], %75 {strides = array<i32>} : memref<8x32xbf16, #tpu.memory_space<vmem>>, vector<8x8xbf16>,
    %77 = vector.extract_strided_slice %11 {offsets = [0, 24], sizes = [8, 8], strides = [1, 1]} : vector<8x32xbf16> to vector<8x8xbf16>
    %c0_37 = arith.constant 0 : index
    %c24 = arith.constant 24 : index
    %78 = vector.load %arg20[%c0_37, %c24] : memref<8x64xbf16, #tpu.memory_space<vmem>>, vector<8x8xbf16>
    %c0_38 = arith.constant 0 : index
    %c56 = arith.constant 56 : index
    %79 = vector.load %arg20[%c0_38, %c56] : memref<8x64xbf16, #tpu.memory_space<vmem>>, vector<8x8xbf16>
    %cst_39 = arith.constant dense<0.000000e+00> : vector<8x8xf32>
    %80 = tpu.matmul %77, %78, %cst_39 {dimension_numbers = #tpu.dot_dimension_numbers<[1], [1], [0], [0], [0, 0, 1, 0], [], []>} : vector<8x8xbf16>, vector<8x8xbf16>, vector<8x8xf32> -> vector<8x8xf32>
    %81 = arith.subf %80, %19 : vector<8x8xf32>
    %cst_40 = arith.constant dense<0xFF800000> : vector<8xf32>
    %82 = vector.multi_reduction <maximumf>, %81, %cst_40 [1] : vector<8x8xf32> to vector<8xf32>
    %83 = vector.shape_cast %82 : vector<8xf32> to vector<8x1xf32>
    %84 = vector.broadcast %83 : vector<8x1xf32> to vector<8x8xf32>
    %85 = arith.subf %81, %84 : vector<8x8xf32>
    %86 = math.exp %85 : vector<8x8xf32>
    %cst_41 = arith.constant dense<0.000000e+00> : vector<8xf32>
    %87 = vector.multi_reduction <add>, %86, %cst_41 [1] : vector<8x8xf32> to vector<8xf32>
    %88 = vector.shape_cast %87 : vector<8xf32> to vector<8x1xf32>
    %89 = tpu.reciprocal %88 {approx = true} : vector<8x1xf32> -> vector<8x1xf32>
    %90 = vector.broadcast %89 : vector<8x1xf32> to vector<8x8xf32>
    %91 = arith.mulf %86, %90 : vector<8x8xf32>
    %92 = arith.truncf %91 : vector<8x8xf32> to vector<8x8xbf16>
    %cst_42 = arith.constant dense<0.000000e+00> : vector<8x8xf32>
    %93 = tpu.matmul %92, %79, %cst_42 {dimension_numbers = #tpu.dot_dimension_numbers<[1], [0], [0], [1], [0, 0, 1, 1], [], []>} : vector<8x8xbf16>, vector<8x8xbf16>, vector<8x8xf32> -> vector<8x8xf32>
    %94 = arith.truncf %93 : vector<8x8xf32> to vector<8x8xbf16>
    %c0_43 = arith.constant 0 : index
    %c24_44 = arith.constant 24 : index
    %95 = vector.load %arg21[%c0_43, %c24_44] : memref<8x32xbf16, #tpu.memory_space<vmem>>, vector<8x8xbf16>
    tpu.vector_store %arg21[%c0_43, %c24_44], %94 {strides = array<i32>} : memref<8x32xbf16, #tpu.memory_space<vmem>>, vector<8x8xbf16>,
    %c0_45 = arith.constant 0 : index
    %c0_46 = arith.constant 0 : index
    %96 = vector.load %arg21[%c0_45, %c0_46] : memref<8x32xbf16, #tpu.memory_space<vmem>>, vector<8x32xbf16>
    %c0_47 = arith.constant 0 : index
    %c0_48 = arith.constant 0 : index
    %97 = vector.load %arg9[%c0_47, %c0_48] : memref<32x32xbf16, #tpu.memory_space<vmem>>, vector<32x32xbf16>
    %cst_49 = arith.constant dense<0.000000e+00> : vector<8x32xf32>
    %98 = tpu.matmul %96, %97, %cst_49 {dimension_numbers = #tpu.dot_dimension_numbers<[1], [0], [0], [1], [0, 0, 1, 1], [], []>} : vector<8x32xbf16>, vector<32x32xbf16>, vector<8x32xf32> -> vector<8x32xf32>
    %c0_50 = arith.constant 0 : index
    %c0_51 = arith.constant 0 : index
    %99 = vector.load %arg10[%c0_50, %c0_51] : memref<1x32xf32, #tpu.memory_space<vmem>>, vector<1x32xf32>
    %100 = vector.broadcast %99 : vector<1x32xf32> to vector<8x32xf32>
    %101 = arith.addf %98, %100 : vector<8x32xf32>
    %102 = arith.addf %101, %4 : vector<8x32xf32>
    %cst_52 = arith.constant dense<0.000000e+00> : vector<8xf32>
    %103 = vector.multi_reduction <add>, %102, %cst_52 [1] : vector<8x32xf32> to vector<8xf32>
    %104 = vector.shape_cast %103 : vector<8xf32> to vector<8x1xf32>
    %cst_53 = arith.constant 3.200000e+01 : f32
    %105 = vector.broadcast %cst_53 : f32 to vector<8x1xf32>
    %106 = arith.divf %104, %105 : vector<8x1xf32>
    %107 = vector.broadcast %106 : vector<8x1xf32> to vector<8x32xf32>
    %108 = arith.subf %102, %107 : vector<8x32xf32>
    %109 = arith.mulf %108, %108 : vector<8x32xf32>
    %cst_54 = arith.constant dense<0.000000e+00> : vector<8xf32>
    %110 = vector.multi_reduction <add>, %109, %cst_54 [1] : vector<8x32xf32> to vector<8xf32>
    %111 = vector.shape_cast %110 : vector<8xf32> to vector<8x1xf32>
    %cst_55 = arith.constant 3.200000e+01 : f32
    %112 = vector.broadcast %cst_55 : f32 to vector<8x1xf32>
    %113 = arith.divf %111, %112 : vector<8x1xf32>
    %114 = vector.broadcast %106 : vector<8x1xf32> to vector<8x32xf32>
    %115 = arith.subf %102, %114 : vector<8x32xf32>
    %cst_56 = arith.constant 9.99999996E-13 : f32
    %116 = vector.broadcast %cst_56 : f32 to vector<8x1xf32>
    %117 = arith.addf %113, %116 : vector<8x1xf32>
    %118 = math.rsqrt %117 : vector<8x1xf32>
    %119 = vector.broadcast %118 : vector<8x1xf32> to vector<8x32xf32>
    %120 = arith.mulf %115, %119 : vector<8x32xf32>
    %c0_57 = arith.constant 0 : index
    %c0_58 = arith.constant 0 : index
    %121 = vector.load %arg11[%c0_57, %c0_58] : memref<1x32xf32, #tpu.memory_space<vmem>>, vector<1x32xf32>
    %122 = vector.broadcast %121 : vector<1x32xf32> to vector<8x32xf32>
    %123 = arith.mulf %120, %122 : vector<8x32xf32>
    %c0_59 = arith.constant 0 : index
    %c0_60 = arith.constant 0 : index
    %124 = vector.load %arg12[%c0_59, %c0_60] : memref<1x32xf32, #tpu.memory_space<vmem>>, vector<1x32xf32>
    %125 = vector.broadcast %124 : vector<1x32xf32> to vector<8x32xf32>
    %126 = arith.addf %123, %125 : vector<8x32xf32>
    %127 = arith.truncf %126 : vector<8x32xf32> to vector<8x32xbf16>
    %c0_61 = arith.constant 0 : index
    %c0_62 = arith.constant 0 : index
    %128 = vector.load %arg13[%c0_61, %c0_62] : memref<32x64xbf16, #tpu.memory_space<vmem>>, vector<32x64xbf16>
    %cst_63 = arith.constant dense<0.000000e+00> : vector<8x64xf32>
    %129 = tpu.matmul %127, %128, %cst_63 {dimension_numbers = #tpu.dot_dimension_numbers<[1], [0], [0], [1], [0, 0, 1, 1], [], []>} : vector<8x32xbf16>, vector<32x64xbf16>, vector<8x64xf32> -> vector<8x64xf32>
    %c0_64 = arith.constant 0 : index
    %c0_65 = arith.constant 0 : index
    %130 = vector.load %arg14[%c0_64, %c0_65] : memref<1x64xf32, #tpu.memory_space<vmem>>, vector<1x64xf32>
    %131 = vector.broadcast %130 : vector<1x64xf32> to vector<8x64xf32>
    %132 = arith.addf %129, %131 : vector<8x64xf32>
    %cst_66 = arith.constant 5.000000e-01 : f32
    %133 = vector.broadcast %cst_66 : f32 to vector<8x64xf32>
    %134 = arith.mulf %132, %133 : vector<8x64xf32>
    %cst_67 = arith.constant 0.707106769 : f32
    %135 = vector.broadcast %cst_67 : f32 to vector<8x64xf32>
    %136 = arith.mulf %132, %135 : vector<8x64xf32>
    %137 = math.erf %136 : vector<8x64xf32>
    %cst_68 = arith.constant 1.000000e+00 : f32
    %138 = vector.broadcast %cst_68 : f32 to vector<8x64xf32>
    %139 = arith.addf %138, %137 : vector<8x64xf32>
    %140 = arith.mulf %134, %139 : vector<8x64xf32>
    %141 = arith.truncf %140 : vector<8x64xf32> to vector<8x64xbf16>
    %c0_69 = arith.constant 0 : index
    %c0_70 = arith.constant 0 : index
    %142 = vector.load %arg15[%c0_69, %c0_70] : memref<64x32xbf16, #tpu.memory_space<vmem>>, vector<64x32xbf16>
    %cst_71 = arith.constant dense<0.000000e+00> : vector<8x32xf32>
    %143 = tpu.matmul %141, %142, %cst_71 {dimension_numbers = #tpu.dot_dimension_numbers<[1], [0], [0], [1], [0, 0, 1, 1], [], []>} : vector<8x64xbf16>, vector<64x32xbf16>, vector<8x32xf32> -> vector<8x32xf32>
    %c0_72 = arith.constant 0 : index
    %c0_73 = arith.constant 0 : index
    %144 = vector.load %arg16[%c0_72, %c0_73] : memref<1x32xf32, #tpu.memory_space<vmem>>, vector<1x32xf32>
    %145 = vector.broadcast %144 : vector<1x32xf32> to vector<8x32xf32>
    %146 = arith.addf %143, %145 : vector<8x32xf32>
    %147 = arith.addf %146, %126 : vector<8x32xf32>
    %cst_74 = arith.constant dense<0.000000e+00> : vector<8xf32>
    %148 = vector.multi_reduction <add>, %147, %cst_74 [1] : vector<8x32xf32> to vector<8xf32>
    %149 = vector.shape_cast %148 : vector<8xf32> to vector<8x1xf32>
    %cst_75 = arith.constant 3.200000e+01 : f32
    %150 = vector.broadcast %cst_75 : f32 to vector<8x1xf32>
    %151 = arith.divf %149, %150 : vector<8x1xf32>
    %152 = vector.broadcast %151 : vector<8x1xf32> to vector<8x32xf32>
    %153 = arith.subf %147, %152 : vector<8x32xf32>
    %154 = arith.mulf %153, %153 : vector<8x32xf32>
    %cst_76 = arith.constant dense<0.000000e+00> : vector<8xf32>
    %155 = vector.multi_reduction <add>, %154, %cst_76 [1] : vector<8x32xf32> to vector<8xf32>
    %156 = vector.shape_cast %155 : vector<8xf32> to vector<8x1xf32>
    %cst_77 = arith.constant 3.200000e+01 : f32
    %157 = vector.broadcast %cst_77 : f32 to vector<8x1xf32>
    %158 = arith.divf %156, %157 : vector<8x1xf32>
    %159 = vector.broadcast %151 : vector<8x1xf32> to vector<8x32xf32>
    %160 = arith.subf %147, %159 : vector<8x32xf32>
    %cst_78 = arith.constant 9.99999996E-13 : f32
    %161 = vector.broadcast %cst_78 : f32 to vector<8x1xf32>
    %162 = arith.addf %158, %161 : vector<8x1xf32>
    %163 = math.rsqrt %162 : vector<8x1xf32>
    %164 = vector.broadcast %163 : vector<8x1xf32> to vector<8x32xf32>
    %165 = arith.mulf %160, %164 : vector<8x32xf32>
    %c0_79 = arith.constant 0 : index
    %c0_80 = arith.constant 0 : index
    %166 = vector.load %arg17[%c0_79, %c0_80] : memref<1x32xf32, #tpu.memory_space<vmem>>, vector<1x32xf32>
    %167 = vector.broadcast %166 : vector<1x32xf32> to vector<8x32xf32>
    %168 = arith.mulf %165, %167 : vector<8x32xf32>
    %c0_81 = arith.constant 0 : index
    %c0_82 = arith.constant 0 : index
    %169 = vector.load %arg18[%c0_81, %c0_82] : memref<1x32xf32, #tpu.memory_space<vmem>>, vector<1x32xf32>
    %170 = vector.broadcast %169 : vector<1x32xf32> to vector<8x32xf32>
    %171 = arith.addf %168, %170 : vector<8x32xf32>
    %c0_83 = arith.constant 0 : index
    %c0_84 = arith.constant 0 : index
    %c0_85 = arith.constant 0 : index
    %172 = vector.load %arg19[%c0_83, %c0_84, %c0_85] : memref<1x8x32xf32, #tpu.memory_space<vmem>>, vector<1x8x32xf32>
    %173 = vector.shape_cast %172 : vector<1x8x32xf32> to vector<8x32xf32>
    %174 = vector.shape_cast %171 : vector<8x32xf32> to vector<1x8x32xf32>
    tpu.vector_store %arg19[%c0_83, %c0_84, %c0_85], %174 {strides = array<i32>} : memref<1x8x32xf32, #tpu.memory_space<vmem>>, vector<1x8x32xf32>,
    return
  }
  func.func @transform_0(%arg0: i32, %arg1: i32) -> (i32, i32, i32) {
    %c0_i32 = arith.constant 0 : i32
    %c0_i32_0 = arith.constant 0 : i32
    return %arg0, %arg1, %c0_i32 : i32, i32, i32
  }
  func.func @transform_1(%arg0: i32, %arg1: i32) -> (i32, i32, i32) {
    %c0_i32 = arith.constant 0 : i32
    %c0_i32_0 = arith.constant 0 : i32
    %c0_i32_1 = arith.constant 0 : i32
    return %arg0, %c0_i32, %c0_i32_0 : i32, i32, i32
  }
  func.func @transform_2(%arg0: i32, %arg1: i32) -> (i32, i32, i32) {
    %c0_i32 = arith.constant 0 : i32
    %c0_i32_0 = arith.constant 0 : i32
    %c0_i32_1 = arith.constant 0 : i32
    return %arg0, %c0_i32, %c0_i32_0 : i32, i32, i32
  }
  func.func @transform_3(%arg0: i32, %arg1: i32) -> (i32, i32) {
    %c0_i32 = arith.constant 0 : i32
    %c0_i32_0 = arith.constant 0 : i32
    %c0_i32_1 = arith.constant 0 : i32
    return %c0_i32, %c0_i32_0 : i32, i32
  }
  func.func @transform_4(%arg0: i32, %arg1: i32) -> (i32, i32) {
    %c0_i32 = arith.constant 0 : i32
    %c0_i32_0 = arith.constant 0 : i32
    %c0_i32_1 = arith.constant 0 : i32
    return %c0_i32, %c0_i32_0 : i32, i32
  }
  func.func @transform_5(%arg0: i32, %arg1: i32) -> (i32, i32) {
    %c0_i32 = arith.constant 0 : i32
    %c0_i32_0 = arith.constant 0 : i32
    %c0_i32_1 = arith.constant 0 : i32
    return %c0_i32, %c0_i32_0 : i32, i32
  }
  func.func @transform_6(%arg0: i32, %arg1: i32) -> (i32, i32) {
    %c0_i32 = arith.constant 0 : i32
    %c0_i32_0 = arith.constant 0 : i32
    %c0_i32_1 = arith.constant 0 : i32
    return %c0_i32, %c0_i32_0 : i32, i32
  }
  func.func @transform_7(%arg0: i32, %arg1: i32) -> (i32, i32) {
    %c0_i32 = arith.constant 0 : i32
    %c0_i32_0 = arith.constant 0 : i32
    %c0_i32_1 = arith.constant 0 : i32
    return %c0_i32, %c0_i32_0 : i32, i32
  }
  func.func @transform_8(%arg0: i32, %arg1: i32) -> (i32, i32) {
    %c0_i32 = arith.constant 0 : i32
    %c0_i32_0 = arith.constant 0 : i32
    %c0_i32_1 = arith.constant 0 : i32
    return %c0_i32, %c0_i32_0 : i32, i32
  }
  func.func @transform_9(%arg0: i32, %arg1: i32) -> (i32, i32) {
    %c0_i32 = arith.constant 0 : i32
    %c0_i32_0 = arith.constant 0 : i32
    %c0_i32_1 = arith.constant 0 : i32
    return %c0_i32, %c0_i32_0 : i32, i32
  }
  func.func @transform_10(%arg0: i32, %arg1: i32) -> (i32, i32) {
    %c0_i32 = arith.constant 0 : i32
    %c0_i32_0 = arith.constant 0 : i32
    %c0_i32_1 = arith.constant 0 : i32
    return %c0_i32, %c0_i32_0 : i32, i32
  }
  func.func @transform_11(%arg0: i32, %arg1: i32) -> (i32, i32) {
    %c0_i32 = arith.constant 0 : i32
    %c0_i32_0 = arith.constant 0 : i32
    %c0_i32_1 = arith.constant 0 : i32
    return %c0_i32, %c0_i32_0 : i32, i32
  }
  func.func @transform_12(%arg0: i32, %arg1: i32) -> (i32, i32) {
    %c0_i32 = arith.constant 0 : i32
    %c0_i32_0 = arith.constant 0 : i32
    %c0_i32_1 = arith.constant 0 : i32
    return %c0_i32, %c0_i32_0 : i32, i32
  }
  func.func @transform_13(%arg0: i32, %arg1: i32) -> (i32, i32) {
    %c0_i32 = arith.constant 0 : i32
    %c0_i32_0 = arith.constant 0 : i32
    %c0_i32_1 = arith.constant 0 : i32
    return %c0_i32, %c0_i32_0 : i32, i32
  }
  func.func @transform_14(%arg0: i32, %arg1: i32) -> (i32, i32) {
    %c0_i32 = arith.constant 0 : i32
    %c0_i32_0 = arith.constant 0 : i32
    %c0_i32_1 = arith.constant 0 : i32
    return %c0_i32, %c0_i32_0 : i32, i32
  }
  func.func @transform_15(%arg0: i32, %arg1: i32) -> (i32, i32) {
    %c0_i32 = arith.constant 0 : i32
    %c0_i32_0 = arith.constant 0 : i32
    %c0_i32_1 = arith.constant 0 : i32
    return %c0_i32, %c0_i32_0 : i32, i32
  }
  func.func @transform_16(%arg0: i32, %arg1: i32) -> (i32, i32) {
    %c0_i32 = arith.constant 0 : i32
    %c0_i32_0 = arith.constant 0 : i32
    %c0_i32_1 = arith.constant 0 : i32
    return %c0_i32, %c0_i32_0 : i32, i32
  }
  func.func @transform_17(%arg0: i32, %arg1: i32) -> (i32, i32, i32) {
    %c0_i32 = arith.constant 0 : i32
    %c0_i32_0 = arith.constant 0 : i32
    return %arg0, %arg1, %c0_i32 : i32, i32, i32
  }
}

</mosaic_0001>

<bundles_post_ra>
// kernel: tpu_custom_call.1
= control target key start
LH: loop header
LB: loop body
LE: loop exit
PB: predicated region body
PF: predicated region fallthrough
CT: control target
= control target key end

     0   :  { %s3930_s0 = inlined_call_operand.hbm [shape: f32[2,8,32], index: 0, kind: input, shape index: {}]   ;;  %s3931_s1 = inlined_call_operand.hbm [shape: bf16[2,8,32], index: 1, kind: input, shape index: {}]   ;;  %s3932_s2 = inlined_call_operand.hbm [shape: f32[2,1,8], index: 2, kind: input, shape index: {}]   ;;  %s3933_s3 = inlined_call_operand.hbm [shape: bf16[32,32], index: 3, kind: input, shape index: {}]   ;;  %s3934_s4 = inlined_call_operand.hbm [shape: f32[1,32], index: 4, kind: input, shape index: {}]   ;;  %s3935_s5 = inlined_call_operand.hbm [shape: bf16[32,64], index: 5, kind: input, shape index: {}]   ;;  %s3936_s6 = inlined_call_operand.hbm [shape: f32[1,64], index: 6, kind: input, shape index: {}]   ;;  %s3937_s7 = inlined_call_operand.hbm [shape: bf16[32,32], index: 7, kind: input, shape index: {}]   ;;  %s3938_s8 = inlined_call_operand.hbm [shape: f32[1,32], index: 8, kind: input, shape index: {}]   ;;  %s3939_s9 = inlined_call_operand.hbm [shape: f32[1,32], index: 9, kind: input, shape index: {}]   ;;  %s3940_s10 = inlined_call_operand.hbm [shape: f32[1,32], index: 10, kind: input, shape index: {}]   ;;  %s3941_s11 = inlined_call_operand.hbm [shape: bf16[32,64], index: 11, kind: input, shape index: {}]   ;;  %s3942_s12 = inlined_call_operand.hbm [shape: f32[1,64], index: 12, kind: input, shape index: {}]   ;;  %s3943_s13 = inlined_call_operand.hbm [shape: bf16[64,32], index: 13, kind: input, shape index: {}]   ;;  %s3944_s14 = inlined_call_operand.hbm [shape: f32[1,32], index: 14, kind: input, shape index: {}]   ;;  %s3945_s15 = inlined_call_operand.hbm [shape: f32[1,32], index: 15, kind: input, shape index: {}]   ;;  %s3946_s16 = inlined_call_operand.hbm [shape: f32[1,32], index: 16, kind: input, shape index: {}]   ;;  %s3947_s17 = inlined_call_operand.hbm [shape: f32[2,8,32], index: 17, kind: output, shape index: {}]  }
   0x1   :  { %3974 = sst [smem:[#allocation44_spill]] %s3930_s0 }
   0x2   :  { %3975 = sst [smem:[#allocation45_spill]] %s3931_s1 }
   0x3   :  { %3976 = sst [smem:[#allocation46_spill]] %s3932_s2 }
   0x4   :  { %3977 = sst [smem:[#allocation47_spill]] %s3933_s3 }
   0x5   :  { %3978 = sst [smem:[#allocation48_spill]] %s3934_s4 }
   0x6   :  { %3979 = sst [smem:[#allocation49_spill]] %s3935_s5 }
   0x7   :  { %3980 = sst [smem:[#allocation50_spill]] %s3936_s6 }
   0x8   :  { %3981 = sst [smem:[#allocation51_spill]] %s3937_s7 }
   0x9   :  { %3982 = sst [smem:[#allocation52_spill]] %s3938_s8 }
   0xa   :  { %3983 = sst [smem:[#allocation53_spill]] %s3939_s9 }
   0xb   :  { %3984 = sst [smem:[#allocation54_spill]] %s3940_s10 }
   0xc   :  { %3985 = sst [smem:[#allocation55_spill]] %s3941_s11 }
   0xd   :  { %3986 = sst [smem:[#allocation56_spill]] %s3942_s12 }
   0xe   :  { %3987 = sst [smem:[#allocation57_spill]] %s3943_s13 }
   0xf   :  { %3988 = sst [smem:[#allocation58_spill]] %s3944_s14 }
  0x10   :  { %3989 = sst [smem:[#allocation59_spill]] %s3945_s15 }
  0x11   :  { %3990 = sst [smem:[#allocation60_spill]] %s3946_s16 }
  0x12   :  { %3991 = sst [smem:[#allocation61_spill]] %s3947_s17 }
  0x13   :  { %22 = vsyncpa [#allocation5], 0 }
  0x14   :  { %24 = vsyncpa [#allocation5 + $0x1], 0 }
  0x15   :  { %25 = vsyncpa [#allocation8], 0 }
  0x16   :  { %27 = vsyncpa [#allocation8 + $0x1], 0 }
  0x17   :  { %28 = vsyncpa [#allocation11], 0 }
  0x18   :  { %29 = vsyncpa [#allocation14], 0 }
  0x19   :  { %30 = vsyncpa [#allocation17], 0 }
  0x1a   :  { %31 = vsyncpa [#allocation20], 0 }
  0x1b   :  { %32 = vsyncpa [#allocation23], 0 }
  0x1c   :  { %33 = vsyncpa [#allocation26], 0 }
  0x1d   :  { %34 = vsyncpa [#allocation29], 0 }
  0x1e   :  { %35 = vsyncpa [#allocation6], 0 }
  0x1f   :  { %37 = vsyncpa [#allocation6 + $0x1], 0  ;;  %s3230_s24 = smov 0   ;;  %s3232_s25 = smov 0  }
  0x20   :  { %s3234_s26 = smov 0   ;;  %s3236_s27 = smov 0  }
  0x21   :  { %s3238_s28 = smov 0   ;;  %s3240_s29 = smov 0  }
  0x22 LB: > { %3992 = sst [smem:[#allocation42_spill]] %s3098_s27  ;;  %s3261_s0 = sadd.s32 4294967295, %s3106_s29   ;;  %s3106_s29 = sphi %s3240_s29, %s43_s29   ;;  %s3102_s28 = sphi %s3238_s28, %s4052_s28   ;;  %s3098_s27 = sphi %s3236_s27, %s4051_s27   ;;  %s3094_s26 = sphi %s3234_s26, %s4050_s26   ;;  %s3090_s25 = sphi %s3232_s25, %s4049_s25   ;;  %s3086_s24 = sphi %s3230_s24, %s4048_s24  }
  0x23   : > { %p2033_p0 = scmp.ge.s32.totalorder %s3106_s29, 1  ;;  %p3958_p1 = scmp.eq.s32.totalorder %s3261_s0, 0 }
  0x24   : > { %p462_p2 = scmp.lt.s32.totalorder %s3106_s29, 3  ;;  %s3108_s18 = smov [#allocation10]  }
  0x25   : > { %s474_s19 = sshll.u32 %s3108_s18, 4  ;;  %s3109_s20 = smov [#allocation13]   ;;  %s3270_s19 = int_to_ptr.vmem [resolvable:$true] %s474_s19 }
  0x26   : > { %p3266_p3 = pnand %p2033_p0, %p462_p2  ;;  %s498_s21 = sshll.u32 %s3109_s20, 4  ;;  %s3281_s21 = int_to_ptr.vmem [resolvable:$true] %s498_s21 }
  0x27   : > { %s3110_s22 = smov [#allocation16]   ;;  %s3996_s3 = sld [smem:[#allocation47_spill]] }
  0x28   : > { %s3993_s30 = scalar_select %p3266_p3, 1, 0 }
  0x29   : > { %p2309_p4 = pneg %p3266_p3  ;;  %s3283_s23 = sshll.u32 %s3110_s22, 4  ;;  %s523_s23 = int_to_ptr.vmem [resolvable:$true] %s3283_s23 }
  0x2a   : > { %3994 = sst [smem:[#allocation43_spill]] %s3993_s30 }
  0x2b   : > { %p3277_p6 = pnand %p2309_p4, %p3958_p1 }
  0x2d   : > { %s3995_s1 = scalar_select %p3277_p6, 1, 0 }
  0x2e   : > { %s2510_s27 = scalar_lea.hbm %s3996_s3, 256  ;;  %p3293_p8 = pneg %p3277_p6 }
  0x2f   : > { %p2511_p7 = scmp.ne.s32.totalorder %s3996_s3, %s2510_s27  ;;  %p2517_p11 = scmp.lt.u32.totalorder %s2510_s27, %s3996_s3 }
  0x30   : > { %s3997_s16 = scalar_select %p3293_p8, 1, 0 }
  0x31   : > { %p2513_p9 = pnand %p3293_p8, %p2511_p7 }
  0x33   : > { %p2514_p10 = pneg %p2513_p9 }
  0x35   : > { %p2519_p12 = pnand %p2517_p11, %p2514_p10 }
  0x37   : > { %2522 = shalt.err (!%p2519_p12)
}
  0x38   : > { %s2523_s2 = scalar_lea.vmem %s3270_s19, 256  ;;  %p2531_p4 = scmp.lt.s32.totalorder %s3270_s19, %s3270_s19 }
  0x39   : > { %p2524_p13 = scmp.ne.s32.totalorder %s3270_s19, %s2523_s2  ;;  %p2532_p5 = scmp.lt.s32.totalorder %s2523_s2, %s2523_s2 }
  0x3b   : > { %p2526_p0 = pnand %p2524_p13, %p3293_p8  ;;  %p2533_p7 = por %p2532_p5, %p2531_p4 }
  0x3d   : > { %p2527_p2 = pneg %p2526_p0 }
  0x3f   : > { %p2534_p9 = pnand %p2533_p7, %p2527_p2 }
  0x41   : > { %2537 = shalt.err (!%p2534_p9)
}
  0x42   : > { %s3111_s17 = smov 64   ;;  %s3112_s27 = smov 4  }
  0x43   : > { %2312 = dma.hbm_to_vmem [thread:$0]  (!%p3277_p6), %s3996_s3, 256, %s3270_s19, [#allocation11], %s3111_s17, %s3111_s17, %s3112_s27  }
  0x44   : > { %s3998_s5 = sld [smem:[#allocation49_spill]] }
  0x4a   : > { %s2538_s2 = scalar_lea.hbm %s3998_s5, 256 }
  0x4b   : > { %p2539_p5 = scmp.ne.s32.totalorder %s3998_s5, %s2538_s2  ;;  %p2545_p12 = scmp.lt.u32.totalorder %s2538_s2, %s3998_s5 }
  0x4d   : > { %p2541_p10 = pnand %p2539_p5, %p3293_p8 }
  0x4f   : > { %p2542_p11 = pneg %p2541_p10 }
  0x51   : > { %p2547_p13 = pnand %p2545_p12, %p2542_p11 }
  0x53   : > { %2550 = shalt.err (!%p2547_p13)
}
  0x54   : > { %s2551_s19 = scalar_lea.vmem %s3281_s21, 256  ;;  %p2559_p7 = scmp.lt.s32.totalorder %s3281_s21, %s3281_s21 }
  0x55   : > { %p2552_p0 = scmp.ne.s32.totalorder %s3281_s21, %s2551_s19  ;;  %p2560_p9 = scmp.lt.s32.totalorder %s2551_s19, %s2551_s19 }
  0x57   : > { %p2554_p2 = pnand %p2552_p0, %p3293_p8  ;;  %p2561_p5 = por %p2560_p9, %p2559_p7 }
  0x59   : > { %p2555_p4 = pneg %p2554_p2 }
  0x5b   : > { %p2562_p10 = pnand %p2561_p5, %p2555_p4 }
  0x5d   : > { %2565 = shalt.err (!%p2562_p10)
}
  0x5e   : > { %2318 = dma.hbm_to_vmem [thread:$0]  (!%p3277_p6), %s3998_s5, 256, %s3281_s21, [#allocation14], %s3111_s17, %s3111_s17, %s3112_s27  }
  0x5f   : > { %s3999_s7 = sld [smem:[#allocation51_spill]] }
  0x65   : > { %s2566_s30 = scalar_lea.hbm %s3999_s7, 256 }
  0x66   : > { %p2567_p11 = scmp.ne.s32.totalorder %s3999_s7, %s2566_s30  ;;  %p2573_p0 = scmp.lt.u32.totalorder %s2566_s30, %s3999_s7 }
  0x68   : > { %p2569_p12 = pnand %p2567_p11, %p3293_p8 }
  0x6a   : > { %p2570_p13 = pneg %p2569_p12 }
  0x6c   : > { %p2575_p2 = pnand %p2573_p0, %p2570_p13 }
  0x6e   : > { %2578 = shalt.err (!%p2575_p2)
}
  0x6f   : > { %s2579_s19 = scalar_lea.vmem %s523_s23, 256  ;;  %p2587_p5 = scmp.lt.s32.totalorder %s523_s23, %s523_s23 }
  0x70   : > { %p2580_p4 = scmp.ne.s32.totalorder %s523_s23, %s2579_s19  ;;  %p2588_p10 = scmp.lt.s32.totalorder %s2579_s19, %s2579_s19 }
  0x72   : > { %p2582_p7 = pnand %p2580_p4, %p3293_p8  ;;  %p2589_p1 = por %p2588_p10, %p2587_p5 }
  0x74   : > { %p2583_p9 = pneg %p2582_p7 }
  0x76   : > { %p2590_p3 = pnand %p2589_p1, %p2583_p9 }
  0x78   : > { %2593 = shalt.err (!%p2590_p3)
}
  0x79   : > { %2324 = dma.hbm_to_vmem [thread:$0]  (!%p3277_p6), %s3999_s7, 256, %s523_s23, [#allocation17], %s3111_s17, %s3111_s17, %s3112_s27  }
  0x7a   : > { %s3113_s10 = smov [#allocation19]   ;;  %s3114_s14 = smov [#allocation22]  }
  0x7b   : > { %s547_s12 = sshll.u32 %s3113_s10, 4  ;;  %s568_s30 = sshll.u32 %s3114_s14, 4  ;;  %s548_s12 = int_to_ptr.vmem [resolvable:$true] %s547_s12  ;;  %s569_s30 = int_to_ptr.vmem [resolvable:$true] %s568_s30 }
  0x7c   : > { %s4000_s9 = sld [smem:[#allocation53_spill]] }
  0x82   : > { %s2594_s22 = scalar_lea.hbm %s4000_s9, 16 }
  0x83   : > { %p2595_p1 = scmp.ne.s32.totalorder %s4000_s9, %s2594_s22  ;;  %p2601_p12 = scmp.lt.u32.totalorder %s2594_s22, %s4000_s9 }
  0x85   : > { %p2597_p3 = pnand %p2595_p1, %p3293_p8 }
  0x87   : > { %p2598_p11 = pneg %p2597_p3 }
  0x89   : > { %p2603_p13 = pnand %p2601_p12, %p2598_p11 }
  0x8b   : > { %2606 = shalt.err (!%p2603_p13)
}
  0x8c   : > { %s2607_s23 = scalar_lea.vmem %s548_s12, 16  ;;  %s2614_s8 = scalar_lea.vmem %s548_s12, 32 }
  0x8d   : > { %p2608_p0 = scmp.ne.s32.totalorder %s548_s12, %s2607_s23  ;;  %p2615_p7 = scmp.lt.s32.totalorder %s548_s12, %s548_s12 }
  0x8e   : > { %p2616_p9 = scmp.lt.s32.totalorder %s2614_s8, %s2607_s23 }
  0x8f   : > { %p2610_p2 = pnand %p2608_p0, %p3293_p8 }
  0x90   : > { %p2617_p5 = por %p2616_p9, %p2615_p7 }
  0x91   : > { %p2611_p4 = pneg %p2610_p2 }
  0x93   : > { %p2618_p10 = pnand %p2617_p5, %p2611_p4 }
  0x95   : > { %2621 = shalt.err (!%p2618_p10)
}
  0x96   : > { %2330 = dma.hbm_to_vmem [thread:$0]  (!%p3277_p6), %s4000_s9, 16, %s548_s12, [#allocation20]  }
  0x97   : > { %s4001_s11 = sld [smem:[#allocation55_spill]] }
  0x9d   : > { %s2622_s20 = scalar_lea.hbm %s4001_s11, 256 }
  0x9e   : > { %p2623_p1 = scmp.ne.s32.totalorder %s4001_s11, %s2622_s20  ;;  %p2629_p12 = scmp.lt.u32.totalorder %s2622_s20, %s4001_s11 }
  0xa0   : > { %p2625_p3 = pnand %p2623_p1, %p3293_p8 }
  0xa2   : > { %p2626_p11 = pneg %p2625_p3 }
  0xa4   : > { %p2631_p13 = pnand %p2629_p12, %p2626_p11 }
  0xa6   : > { %2634 = shalt.err (!%p2631_p13)
}
  0xa7   : > { %s2635_s23 = scalar_lea.vmem %s569_s30, 256  ;;  %p2643_p7 = scmp.lt.s32.totalorder %s569_s30, %s569_s30 }
  0xa8   : > { %p2636_p0 = scmp.ne.s32.totalorder %s569_s30, %s2635_s23  ;;  %p2644_p9 = scmp.lt.s32.totalorder %s2635_s23, %s2635_s23 }
  0xaa   : > { %p2638_p2 = pnand %p2636_p0, %p3293_p8  ;;  %p2645_p5 = por %p2644_p9, %p2643_p7 }
  0xac   : > { %p2639_p4 = pneg %p2638_p2 }
  0xae   : > { %p2646_p10 = pnand %p2645_p5, %p2639_p4 }
  0xb0   : > { %2649 = shalt.err (!%p2646_p10)
}
  0xb1   : > { %2336 = dma.hbm_to_vmem [thread:$0]  (!%p3277_p6), %s4001_s11, 256, %s569_s30, [#allocation23], %s3111_s17, %s3111_s17, %s3112_s27  }
  0xb2   : > { %s3115_s10 = smov [#allocation25]   ;;  %s3116_s3 = smov [#allocation28]  }
  0xb3   : > { %s592_s14 = sshll.u32 %s3115_s10, 4  ;;  %s617_s18 = sshll.u32 %s3116_s3, 4  ;;  %s593_s14 = int_to_ptr.vmem [resolvable:$true] %s592_s14  ;;  %s618_s18 = int_to_ptr.vmem [resolvable:$true] %s617_s18 }
  0xb4   : > { %s4002_s13 = sld [smem:[#allocation57_spill]] }
  0xba   : > { %s2650_s2 = scalar_lea.hbm %s4002_s13, 512 }
  0xbb   : > { %p2651_p1 = scmp.ne.s32.totalorder %s4002_s13, %s2650_s2  ;;  %p2657_p12 = scmp.lt.u32.totalorder %s2650_s2, %s4002_s13 }
  0xbd   : > { %p2653_p3 = pnand %p2651_p1, %p3293_p8 }
  0xbf   : > { %p2654_p11 = pneg %p2653_p3 }
  0xc1   : > { %p2659_p13 = pnand %p2657_p12, %p2654_p11 }
  0xc3   : > { %2662 = shalt.err (!%p2659_p13)
}
  0xc4   : > { %s2663_s30 = scalar_lea.vmem %s593_s14, 512  ;;  %p2671_p7 = scmp.lt.s32.totalorder %s593_s14, %s593_s14 }
  0xc5   : > { %p2664_p0 = scmp.ne.s32.totalorder %s593_s14, %s2663_s30  ;;  %p2672_p9 = scmp.lt.s32.totalorder %s2663_s30, %s2663_s30 }
  0xc7   : > { %p2666_p2 = pnand %p2664_p0, %p3293_p8  ;;  %p2673_p5 = por %p2672_p9, %p2671_p7 }
  0xc9   : > { %p2667_p4 = pneg %p2666_p2 }
  0xcb   : > { %p2674_p10 = pnand %p2673_p5, %p2667_p4 }
  0xcd   : > { %2677 = shalt.err (!%p2674_p10)
}
  0xce   : > { %2342 = dma.hbm_to_vmem [thread:$0]  (!%p3277_p6), %s4002_s13, 512, %s593_s14, [#allocation26], %s3111_s17, %s3111_s17, %s3112_s27  }
  0xcf   : > { %s4003_s15 = sld [smem:[#allocation59_spill]] }
  0xd5   : > { %s2678_s22 = scalar_lea.hbm %s4003_s15, 16 }
  0xd6   : > { %p2679_p1 = scmp.ne.s32.totalorder %s4003_s15, %s2678_s22  ;;  %p2685_p12 = scmp.lt.u32.totalorder %s2678_s22, %s4003_s15 }
  0xd8   : > { %p2681_p3 = pnand %p2679_p1, %p3293_p8 }
  0xda   : > { %p2682_p11 = pneg %p2681_p3 }
  0xdc   : > { %p2687_p13 = pnand %p2685_p12, %p2682_p11 }
  0xde   : > { %2690 = shalt.err (!%p2687_p13)
}
  0xdf   : > { %s2691_s12 = scalar_lea.vmem %s618_s18, 16  ;;  %s2698_s17 = scalar_lea.vmem %s618_s18, 32 }
  0xe0   : > { %p2692_p0 = scmp.ne.s32.totalorder %s618_s18, %s2691_s12  ;;  %p2699_p7 = scmp.lt.s32.totalorder %s618_s18, %s618_s18 }
  0xe1   : > { %p2700_p9 = scmp.lt.s32.totalorder %s2698_s17, %s2691_s12 }
  0xe2   : > { %p2694_p2 = pnand %p2692_p0, %p3293_p8 }
  0xe3   : > { %p2701_p5 = por %p2700_p9, %p2699_p7 }
  0xe4   : > { %p2695_p4 = pneg %p2694_p2 }
  0xe6   : > { %p2702_p10 = pnand %p2701_p5, %p2695_p4 }
  0xe8   : > { %2705 = shalt.err (!%p2702_p10)
}
  0xe9   : > { %2348 = dma.hbm_to_vmem [thread:$0]  (!%p3277_p6), %s4003_s15, 16, %s618_s18, [#allocation29]  }
  0xea   : > { %s2032_s30 = sadd.s32 4294967294, %s3106_s29   ;;  %s55_s8 = sadd.s32 1, %s3102_s28 }
  0xeb   : > { %s64_s10 = sadd.s32 1, %s3094_s26  ;;  %p57_p1 = scmp.ge.s32.totalorder %s55_s8, 2 }
  0xec   : > { %p71_p3 = scmp.ne.s32.totalorder %s3094_s26, %s3090_s25  ;;  %p72_p11 = scmp.eq.s32.totalorder %s3106_s29, 0 }
  0xed   : > { %p77_p12 = scmp.ne.s32.totalorder %s3090_s25, %s3086_s24  ;;  %s4054_s8 = smov (%p57_p1, %s55_s8), 0 }
  0xee   : > { %p73_p13 = por %p72_p11, %p71_p3  ;;  %p4004_p0 = scmp.eq.s32.totalorder %s3261_s0, 0 }
  0xef   : > { %s59_s18 = ssub.s32 %s3102_s28, %s4054_s8  ;;  %p449_p4 = scmp.eq.s32.totalorder %s3261_s0, 1 }
  0xf0   : > { %p3455_p2 = por %p4004_p0, %p77_p12  ;;  %p62_p7 = scmp.eq.s32.totalorder %s59_s18, 0 }
  0xf1   : > { %p455_p9 = scmp.eq.s32.totalorder %s2032_s30, 1  ;;  %p3462_p5 = por %p449_p4, %p71_p3 }
  0xf2   : > { %s4005_s3 = scalar_select %p3455_p2, 1, 0 }
  0xf3   : > { %s4006_s20 = scalar_select %p3462_p5, 1, 0 }
  0xf4   : > { %p2380_p10 = scmp.lt.s32.totalorder %s3106_s29, 2  ;;  %p3470_p1 = por %p455_p9, %p77_p12 }
  0xf5   : > { %s3468_s22 = scalar_select %p62_p7, %s3094_s26, %s64_s10  }
  0xf6   : > { %s4007_s2 = scalar_select %p3470_p1, 1, 0 }
  0xf7   : > { %s3475_s19 = sand.u32 1, %s3094_s26   ;;  %p3477_p11 = pnand %p2380_p10, %p73_p13 }
  0xf8   : > { %s658_s23 = sand.u32 1, %s3106_s29   ;;  %s2051_s12 = sshll.u32 %s3475_s19, 2 }
  0xf9   : > { %s4008_s21 = scalar_select %p3477_p11, 1, 0 }
  0xfa   : > { %s2052_s17 = sshll.u32 %s3102_s28, 6  ;;  %s662_s27 = scalar_lea.vmem [#allocation7], %s2051_s12 }
  0xfb   : > { %s669_s14 = sshll.u32 %s662_s27, 4  ;;  %s4009_s18 = sld [smem:[#allocation45_spill]]  ;;  %s3489_s14 = int_to_ptr.vmem [resolvable:$true] %s669_s14 }
  0xfc   : > { %s3491_s7 = scalar_lea.sflag [#allocation8], %s658_s23  ;;  %p3497_p12 = pneg %p3477_p11 }
  0xfe   : > { %s4010_s11 = scalar_select %p3497_p12, 1, 0 }
 0x101   : > { %s3487_s5 = scalar_lea.hbm %s4009_s18, %s2052_s17  ;;  %s2711_s27 = scalar_lea.hbm %s4009_s18, 128 }
 0x102   : > { %s2706_s9 = scalar_lea.hbm %s3487_s5, 64  ;;  %p2712_p4 = scmp.lt.u32.totalorder %s3487_s5, %s4009_s18 }
 0x103   : > { %p2707_p3 = scmp.ne.s32.totalorder %s3487_s5, %s2706_s9  ;;  %p2713_p7 = scmp.lt.u32.totalorder %s2711_s27, %s2706_s9 }
 0x104   : > { %p2715_p10 = scmp.lt.u32.totalorder %s2706_s9, %s3487_s5 }
 0x105   : > { %p2709_p13 = pnand %p3497_p12, %p2707_p3  ;;  %p2714_p9 = por %p2713_p7, %p2712_p4 }
 0x107   : > { %p2710_p0 = pneg %p2709_p13  ;;  %p2716_p1 = por %p2715_p10, %p2714_p9 }
 0x109   : > { %p2717_p5 = pnand %p2716_p1, %p2710_p0 }
 0x10b   : > { %2720 = shalt.err (!%p2717_p5)
}
 0x10c   : > { %s2721_s23 = scalar_lea.vmem %s3489_s14, 64  ;;  %s3117_s12 = smov [#allocation7]  }
 0x10d   : > { %p2722_p3 = scmp.ne.s32.totalorder %s3489_s14, %s2721_s23  ;;  %s2726_s17 = sshll.u32 %s3117_s12, 4  ;;  %s2727_s17 = int_to_ptr.vmem [resolvable:$false] %s2726_s17 }
 0x10e   : > { %s2728_s30 = scalar_lea.vmem %s2727_s17, 128  ;;  %p2729_p6 = scmp.lt.s32.totalorder %s3489_s14, %s2727_s17 }
 0x10f   : > { %p2724_p13 = pnand %p2722_p3, %p3497_p12  ;;  %p2730_p8 = scmp.lt.s32.totalorder %s2728_s30, %s2721_s23 }
 0x111   : > { %p2725_p2 = pneg %p2724_p13  ;;  %p2731_p4 = por %p2730_p8, %p2729_p6 }
 0x113   : > { %p2732_p7 = pnand %p2731_p4, %p2725_p2 }
 0x115   : > { %2735 = shalt.err (!%p2732_p7)
}
 0x116   : > { %2358 = dma.hbm_to_vmem [thread:$0]  (!%p3477_p11), %s3487_s5, 64, %s3489_s14, %s3491_s7  }
 0x117   : > { %s3118_s9 = smov [#allocation12]   ;;  %s3119_s10 = smov [#allocation15]  }
 0x118   : > { %s488_s27 = sshll.u32 %s3118_s9, 4  ;;  %s512_s13 = sshll.u32 %s3119_s10, 4  ;;  %s489_s27 = int_to_ptr.vmem [resolvable:$true] %s488_s27  ;;  %s3521_s13 = int_to_ptr.vmem [resolvable:$true] %s512_s13 }
 0x119   : > { %s4011_s4 = sld [smem:[#allocation48_spill]]  ;;  %p4012_p8 = scmp.ne.s32.totalorder %s3997_s16, 0 }
 0x11f   : > { %s2736_s23 = scalar_lea.hbm %s4011_s4, 16 }
 0x120   : > { %p2737_p6 = scmp.ne.s32.totalorder %s4011_s4, %s2736_s23  ;;  %p2743_p1 = scmp.lt.u32.totalorder %s2736_s23, %s4011_s4 }
 0x122   : > { %p2739_p2 = pnand %p2737_p6, %p4012_p8 }
 0x124   : > { %p2740_p5 = pneg %p2739_p2 }
 0x126   : > { %p2745_p0 = pnand %p2743_p1, %p2740_p5 }
 0x128   : > { %2748 = shalt.err (!%p2745_p0)
}
 0x129   : > { %s2749_s14 = scalar_lea.vmem %s489_s27, 16  ;;  %s2756_s9 = scalar_lea.vmem %s489_s27, 32 }
 0x12a   : > { %p2750_p9 = scmp.ne.s32.totalorder %s489_s27, %s2749_s14  ;;  %p2757_p13 = scmp.lt.s32.totalorder %s489_s27, %s489_s27 }
 0x12b   : > { %p2758_p4 = scmp.lt.s32.totalorder %s2756_s9, %s2749_s14 }
 0x12c   : > { %p2752_p10 = pnand %p2750_p9, %p4012_p8 }
 0x12d   : > { %p2759_p7 = por %p2758_p4, %p2757_p13 }
 0x12e   : > { %p2753_p3 = pneg %p2752_p10 }
 0x130   : > { %p2760_p11 = pnand %p2759_p7, %p2753_p3 }
 0x132   : > { %2763 = shalt.err (!%p2760_p11)
}
 0x133   : > { %p4013_p6 = scmp.ne.s32.totalorder %s3995_s1, 0  ;;  %s4014_s6 = sld [smem:[#allocation50_spill]] }
 0x135   : > { %2315 = dma.hbm_to_vmem [thread:$0]  (!%p4013_p6), %s4011_s4, 16, %s489_s27, [#allocation11]  }
 0x139   : > { %s2764_s17 = scalar_lea.hbm %s4014_s6, 16 }
 0x13a   : > { %p2765_p2 = scmp.ne.s32.totalorder %s4014_s6, %s2764_s17  ;;  %p2771_p11 = scmp.lt.u32.totalorder %s2764_s17, %s4014_s6 }
 0x13c   : > { %p2767_p5 = pnand %p2765_p2, %p4012_p8 }
 0x13e   : > { %p2768_p1 = pneg %p2767_p5 }
 0x140   : > { %p2773_p0 = pnand %p2771_p11, %p2768_p1 }
 0x142   : > { %2776 = shalt.err (!%p2773_p0)
}
 0x143   : > { %s2777_s27 = scalar_lea.vmem %s3521_s13, 16  ;;  %s2784_s9 = scalar_lea.vmem %s3521_s13, 32 }
 0x144   : > { %p2778_p9 = scmp.ne.s32.totalorder %s3521_s13, %s2777_s27  ;;  %p2785_p13 = scmp.lt.s32.totalorder %s3521_s13, %s3521_s13 }
 0x145   : > { %p2786_p4 = scmp.lt.s32.totalorder %s2784_s9, %s2777_s27 }
 0x146   : > { %p2780_p10 = pnand %p2778_p9, %p4012_p8 }
 0x147   : > { %p2787_p7 = por %p2786_p4, %p2785_p13 }
 0x148   : > { %p2781_p3 = pneg %p2780_p10 }
 0x14a   : > { %p2788_p2 = pnand %p2787_p7, %p2781_p3 }
 0x14c   : > { %2791 = shalt.err (!%p2788_p2)
}
 0x14d   : > { %2321 = dma.hbm_to_vmem [thread:$0]  (!%p4013_p6), %s4014_s6, 16, %s3521_s13, [#allocation14]  }
 0x14e   : > { %s3120_s18 = smov [#allocation18]   ;;  %s3121_s17 = smov [#allocation21]  }
 0x14f   : > { %s536_s12 = sshll.u32 %s3120_s18, 4  ;;  %s558_s23 = sshll.u32 %s3121_s17, 4  ;;  %s537_s12 = int_to_ptr.vmem [resolvable:$true] %s536_s12  ;;  %s3565_s23 = int_to_ptr.vmem [resolvable:$true] %s558_s23 }
 0x150   : > { %s4015_s14 = sld [smem:[#allocation52_spill]] }
 0x156   : > { %s2792_s27 = scalar_lea.hbm %s4015_s14, 16 }
 0x157   : > { %p2793_p5 = scmp.ne.s32.totalorder %s4015_s14, %s2792_s27  ;;  %p2799_p0 = scmp.lt.u32.totalorder %s2792_s27, %s4015_s14 }
 0x159   : > { %p2795_p1 = pnand %p2793_p5, %p4012_p8 }
 0x15b   : > { %p2796_p11 = pneg %p2795_p1 }
 0x15d   : > { %p2801_p9 = pnand %p2799_p0, %p2796_p11 }
 0x15f   : > { %2804 = shalt.err (!%p2801_p9)
}
 0x160   : > { %s2805_s10 = scalar_lea.vmem %s537_s12, 16  ;;  %s2812_s18 = scalar_lea.vmem %s537_s12, 32 }
 0x161   : > { %p2806_p10 = scmp.ne.s32.totalorder %s537_s12, %s2805_s10  ;;  %p2813_p4 = scmp.lt.s32.totalorder %s537_s12, %s537_s12 }
 0x162   : > { %p2814_p7 = scmp.lt.s32.totalorder %s2812_s18, %s2805_s10 }
 0x163   : > { %p2808_p3 = pnand %p2806_p10, %p4012_p8 }
 0x164   : > { %p2815_p2 = por %p2814_p7, %p2813_p4 }
 0x165   : > { %p2809_p13 = pneg %p2808_p3 }
 0x167   : > { %p2816_p12 = pnand %p2815_p2, %p2809_p13 }
 0x169   : > { %2819 = shalt.err (!%p2816_p12)
}
 0x16a   : > { %2327 = dma.hbm_to_vmem [thread:$0]  (!%p4013_p6), %s4015_s14, 16, %s537_s12, [#allocation17]  }
 0x16b   : > { %s4016_s27 = sld [smem:[#allocation54_spill]] }
 0x171   : > { %s4017_s9 = smov %s4016_s27  ;;  %s2820_s15 = scalar_lea.hbm %s4016_s27, 16 }
 0x172   : > { %p2821_p5 = scmp.ne.s32.totalorder %s4017_s9, %s2820_s15  ;;  %p2827_p12 = scmp.lt.u32.totalorder %s2820_s15, %s4017_s9 }
 0x174   : > { %p2823_p1 = pnand %p2821_p5, %p4012_p8 }
 0x176   : > { %p2824_p11 = pneg %p2823_p1 }
 0x178   : > { %p2829_p0 = pnand %p2827_p12, %p2824_p11 }
 0x17a   : > { %2832 = shalt.err (!%p2829_p0)
}
 0x17b   : > { %s2833_s12 = scalar_lea.vmem %s3565_s23, 16  ;;  %s2840_s6 = scalar_lea.vmem %s3565_s23, 32 }
 0x17c   : > { %p2834_p9 = scmp.ne.s32.totalorder %s3565_s23, %s2833_s12  ;;  %p2841_p13 = scmp.lt.s32.totalorder %s3565_s23, %s3565_s23 }
 0x17d   : > { %p2842_p4 = scmp.lt.s32.totalorder %s2840_s6, %s2833_s12 }
 0x17e   : > { %p2836_p10 = pnand %p2834_p9, %p4012_p8 }
 0x17f   : > { %p2843_p7 = por %p2842_p4, %p2841_p13 }
 0x180   : > { %p2837_p3 = pneg %p2836_p10 }
 0x182   : > { %p2844_p2 = pnand %p2843_p7, %p2837_p3 }
 0x184   : > { %2847 = shalt.err (!%p2844_p2)
}
 0x185   : > { %2333 = dma.hbm_to_vmem [thread:$0]  (!%p4013_p6), %s4017_s9, 16, %s3565_s23, [#allocation20]  }
 0x186   : > { %s3122_s30 = smov [#allocation24]   ;;  %s3123_s27 = smov [#allocation27]  }
 0x187   : > { %s582_s5 = sshll.u32 %s3122_s30, 4  ;;  %s606_s15 = sshll.u32 %s3123_s27, 4  ;;  %s583_s5 = int_to_ptr.vmem [resolvable:$true] %s582_s5  ;;  %s3609_s15 = int_to_ptr.vmem [resolvable:$true] %s606_s15 }
 0x188   : > { %s4018_s18 = sld [smem:[#allocation56_spill]] }
 0x18e   : > { %s2848_s12 = scalar_lea.hbm %s4018_s18, 16 }
 0x18f   : > { %p2849_p5 = scmp.ne.s32.totalorder %s4018_s18, %s2848_s12  ;;  %p2855_p12 = scmp.lt.u32.totalorder %s2848_s12, %s4018_s18 }
 0x191   : > { %p2851_p1 = pnand %p2849_p5, %p4012_p8 }
 0x193   : > { %p2852_p11 = pneg %p2851_p1 }
 0x195   : > { %p2857_p0 = pnand %p2855_p12, %p2852_p11 }
 0x197   : > { %2860 = shalt.err (!%p2857_p0)
}
 0x198   : > { %s2861_s17 = scalar_lea.vmem %s583_s5, 16  ;;  %s2868_s30 = scalar_lea.vmem %s583_s5, 32 }
 0x199   : > { %p2862_p9 = scmp.ne.s32.totalorder %s583_s5, %s2861_s17  ;;  %p2869_p13 = scmp.lt.s32.totalorder %s583_s5, %s583_s5 }
 0x19a   : > { %p2870_p4 = scmp.lt.s32.totalorder %s2868_s30, %s2861_s17 }
 0x19b   : > { %p2864_p10 = pnand %p2862_p9, %p4012_p8 }
 0x19c   : > { %p2871_p7 = por %p2870_p4, %p2869_p13 }
 0x19d   : > { %p2865_p3 = pneg %p2864_p10 }
 0x19f   : > { %p2872_p2 = pnand %p2871_p7, %p2865_p3 }
 0x1a1   : > { %2875 = shalt.err (!%p2872_p2)
}
 0x1a2   : > { %2339 = dma.hbm_to_vmem [thread:$0]  (!%p4013_p6), %s4018_s18, 16, %s583_s5, [#allocation23]  }
 0x1a3   : > { %s4019_s12 = sld [smem:[#allocation58_spill]] }
 0x1a9   : > { %s2876_s6 = scalar_lea.hbm %s4019_s12, 16 }
 0x1aa   : > { %p2877_p5 = scmp.ne.s32.totalorder %s4019_s12, %s2876_s6  ;;  %p2883_p12 = scmp.lt.u32.totalorder %s2876_s6, %s4019_s12 }
 0x1ac   : > { %p2879_p1 = pnand %p2877_p5, %p4012_p8 }
 0x1ae   : > { %p2880_p11 = pneg %p2879_p1 }
 0x1b0   : > { %p2885_p0 = pnand %p2883_p12, %p2880_p11 }
 0x1b2   : > { %2888 = shalt.err (!%p2885_p0)
}
 0x1b3   : > { %s2889_s5 = scalar_lea.vmem %s3609_s15, 16  ;;  %s2896_s14 = scalar_lea.vmem %s3609_s15, 32 }
 0x1b4   : > { %p2890_p9 = scmp.ne.s32.totalorder %s3609_s15, %s2889_s5  ;;  %p2897_p13 = scmp.lt.s32.totalorder %s3609_s15, %s3609_s15 }
 0x1b5   : > { %p2898_p4 = scmp.lt.s32.totalorder %s2896_s14, %s2889_s5 }
 0x1b6   : > { %p2892_p10 = pnand %p2890_p9, %p4012_p8 }
 0x1b7   : > { %p2899_p7 = por %p2898_p4, %p2897_p13 }
 0x1b8   : > { %p2893_p3 = pneg %p2892_p10 }
 0x1ba   : > { %p2900_p2 = pnand %p2899_p7, %p2893_p3 }
 0x1bc   : > { %2903 = shalt.err (!%p2900_p2)
}
 0x1bd   : > { %2345 = dma.hbm_to_vmem [thread:$0]  (!%p4013_p6), %s4019_s12, 16, %s3609_s15, [#allocation26]  }
 0x1be   : > { %s3124_s10 = smov [#allocation30]   ;;  %s2049_s4 = sshll.u32 %s3475_s19, 3 }
 0x1bf   : > { %s628_s6 = sshll.u32 %s3124_s10, 4  ;;  %s4020_s30 = sld [smem:[#allocation60_spill]]  ;;  %s629_s6 = int_to_ptr.vmem [resolvable:$true] %s628_s6 }
 0x1c5   : > { %s2904_s5 = scalar_lea.hbm %s4020_s30, 16 }
 0x1c6   : > { %p2905_p5 = scmp.ne.s32.totalorder %s4020_s30, %s2904_s5  ;;  %p2911_p12 = scmp.lt.u32.totalorder %s2904_s5, %s4020_s30 }
 0x1c8   : > { %p2907_p1 = pnand %p2905_p5, %p4012_p8 }
 0x1ca   : > { %p2908_p11 = pneg %p2907_p1 }
 0x1cc   : > { %p2913_p0 = pnand %p2911_p12, %p2908_p11 }
 0x1ce   : > { %2916 = shalt.err (!%p2913_p0)
}
 0x1cf   : > { %s2917_s15 = scalar_lea.vmem %s629_s6, 16  ;;  %s2924_s13 = scalar_lea.vmem %s629_s6, 32 }
 0x1d0   : > { %p2918_p9 = scmp.ne.s32.totalorder %s629_s6, %s2917_s15  ;;  %p2925_p13 = scmp.lt.s32.totalorder %s629_s6, %s629_s6 }
 0x1d1   : > { %p2926_p4 = scmp.lt.s32.totalorder %s2924_s13, %s2917_s15 }
 0x1d2   : > { %p2920_p10 = pnand %p2918_p9, %p4012_p8 }
 0x1d3   : > { %p2927_p7 = por %p2926_p4, %p2925_p13 }
 0x1d4   : > { %p2921_p3 = pneg %p2920_p10 }
 0x1d6   : > { %p2928_p2 = pnand %p2927_p7, %p2921_p3 }
 0x1d8   : > { %2931 = shalt.err (!%p2928_p2)
}
 0x1d9   : > { %2351 = dma.hbm_to_vmem [thread:$0]  (!%p4013_p6), %s4020_s30, 16, %s629_s6, [#allocation29]  }
 0x1da   : > { %s2050_s18 = sshll.u32 %s3102_s28, 7  ;;  %s643_s23 = scalar_lea.vmem [#allocation4], %s2049_s4 }
 0x1db   : > { %s651_s16 = sshll.u32 %s643_s23, 4  ;;  %s4021_s14 = sld [smem:[#allocation44_spill]]  ;;  %s652_s16 = int_to_ptr.vmem [resolvable:$true] %s651_s16 }
 0x1dc   : > { %s640_s1 = scalar_lea.sflag [#allocation5], %s3475_s19  ;;  %p4022_p5 = scmp.ne.s32.totalorder %s4010_s11, 0 }
 0x1e1   : > { %s3676_s27 = scalar_lea.hbm %s4021_s14, %s2050_s18  ;;  %s2937_s4 = scalar_lea.hbm %s4021_s14, 256 }
 0x1e2   : > { %s2932_s15 = scalar_lea.hbm %s3676_s27, 128  ;;  %p2938_p6 = scmp.lt.u32.totalorder %s3676_s27, %s4021_s14 }
 0x1e3   : > { %p2933_p8 = scmp.ne.s32.totalorder %s3676_s27, %s2932_s15  ;;  %p2939_p12 = scmp.lt.u32.totalorder %s2937_s4, %s2932_s15 }
 0x1e4   : > { %p2941_p9 = scmp.lt.u32.totalorder %s2932_s15, %s3676_s27 }
 0x1e5   : > { %p2935_p1 = pnand %p2933_p8, %p4022_p5  ;;  %p2940_p0 = por %p2939_p12, %p2938_p6 }
 0x1e7   : > { %p2936_p11 = pneg %p2935_p1  ;;  %p2942_p10 = por %p2941_p9, %p2940_p0 }
 0x1e9   : > { %p2943_p3 = pnand %p2942_p10, %p2936_p11 }
 0x1eb   : > { %2946 = shalt.err (!%p2943_p3)
}
 0x1ec   : > { %s2947_s18 = scalar_lea.vmem %s652_s16, 128  ;;  %s3125_s23 = smov [#allocation4]  }
 0x1ed   : > { %p2948_p13 = scmp.ne.s32.totalorder %s652_s16, %s2947_s18  ;;  %s2952_s17 = sshll.u32 %s3125_s23, 4  ;;  %s2953_s17 = int_to_ptr.vmem [resolvable:$false] %s2952_s17 }
 0x1ee   : > { %s2954_s5 = scalar_lea.vmem %s2953_s17, 256  ;;  %p2955_p2 = scmp.lt.s32.totalorder %s652_s16, %s2953_s17 }
 0x1ef   : > { %p2950_p4 = pnand %p2948_p13, %p4022_p5  ;;  %p2956_p8 = scmp.lt.s32.totalorder %s2954_s5, %s2947_s18 }
 0x1f1   : > { %p2951_p7 = pneg %p2950_p4  ;;  %p2957_p1 = por %p2956_p8, %p2955_p2 }
 0x1f3   : > { %p2958_p6 = pnand %p2957_p1, %p2951_p7 }
 0x1f5   : > { %2961 = shalt.err (!%p2958_p6)
}
 0x1f6   : > { %p4023_p12 = scmp.ne.s32.totalorder %s4008_s21, 0  ;;  %s2053_s15 = sshll.u32 %s3102_s28, 4 }
 0x1f7   : > { %s4024_s4 = sld [smem:[#allocation46_spill]]  ;;  %s679_s10 = scalar_lea.vmem [#allocation9], %s3475_s19 }
 0x1f8   : > { %2355 = dma.hbm_to_vmem [thread:$0]  (!%p4023_p12), %s3676_s27, 128, %s652_s16, %s640_s1  }
 0x1f9   : > { %s686_s18 = sshll.u32 %s679_s10, 4  ;;  %s687_s18 = int_to_ptr.vmem [resolvable:$true] %s686_s18 }
 0x1fd   : > { %s3700_s9 = scalar_lea.hbm %s4024_s4, %s2053_s15  ;;  %s2967_s27 = scalar_lea.hbm %s4024_s4, 32 }
 0x1fe   : > { %s2962_s23 = scalar_lea.hbm %s3700_s9, 16  ;;  %p2968_p10 = scmp.lt.u32.totalorder %s3700_s9, %s4024_s4 }
 0x1ff   : > { %p2963_p11 = scmp.ne.s32.totalorder %s3700_s9, %s2962_s23  ;;  %p2969_p3 = scmp.lt.u32.totalorder %s2967_s27, %s2962_s23 }
 0x200   : > { %p2971_p4 = scmp.lt.u32.totalorder %s2962_s23, %s3700_s9 }
 0x201   : > { %p2965_p0 = pnand %p2963_p11, %p4022_p5  ;;  %p2970_p13 = por %p2969_p3, %p2968_p10 }
 0x203   : > { %p2966_p9 = pneg %p2965_p0  ;;  %p2972_p7 = por %p2971_p4, %p2970_p13 }
 0x205   : > { %p2973_p2 = pnand %p2972_p7, %p2966_p9 }
 0x207   : > { %2976 = shalt.err (!%p2973_p2)
}
 0x208   : > { %s2977_s19 = scalar_lea.vmem %s687_s18, 16  ;;  %s3126_s15 = smov [#allocation9]  }
 0x209   : > { %p2978_p8 = scmp.ne.s32.totalorder %s687_s18, %s2977_s19  ;;  %s2982_s6 = sshll.u32 %s3126_s15, 4  ;;  %s2983_s6 = int_to_ptr.vmem [resolvable:$false] %s2982_s6 }
 0x20a   : > { %s2984_s13 = scalar_lea.vmem %s2983_s6, 32  ;;  %p2985_p11 = scmp.lt.s32.totalorder %s687_s18, %s2983_s6 }
 0x20b   : > { %p2980_p1 = pnand %p2978_p8, %p4022_p5  ;;  %p2986_p0 = scmp.lt.s32.totalorder %s2984_s13, %s2977_s19 }
 0x20d   : > { %p2981_p6 = pneg %p2980_p1  ;;  %p2987_p12 = por %p2986_p0, %p2985_p11 }
 0x20f   : > { %p2988_p3 = pnand %p2987_p12, %p2981_p6 }
 0x211   : > { %2991 = shalt.err (!%p2988_p3)
}
 0x212   : > { %p4025_p10 = scmp.ne.s32.totalorder %s4008_s21, 0  ;;  %s4026_s10 = sld [smem:[#allocation43_spill]] }
 0x214   : > { %2361 = dma.hbm_to_vmem [thread:$0]  (!%p4025_p10), %s3700_s9, 16, %s687_s18, %s3491_s7  }
 0x218   : > { %p4027_p9 = scmp.ne.s32.totalorder %s4026_s10, 0 }
 0x219   : > { %s3724_s11 = sand.u32 (!%p4027_p9), 1, %s3090_s25   ;;  %p4028_p5 = scmp.ne.s32.totalorder (!%p4027_p9), %s4005_s3, 0 }
 0x21a   : > { %695 = sbr.rel (%p4027_p9) target bundleno = 3129 (0xc39), region = 88  ;;  %s2055_s23 = sshll.u32 (!%p4027_p9), %s3724_s11, 3 }
 0x21b   : > { %s698_s17 = scalar_lea.sflag (!%p4027_p9), [#allocation5], %s3724_s11  ;;  %s3730_s16 = scalar_lea.vmem (!%p4027_p9), [#allocation4], %s2055_s23 }
 0x221   : > { %3045 = dma.done.wait (%p4028_p5), %s698_s17, 128  }
 0x222   : > { %3047 = vsyncadd (%p4028_p5), %s698_s17, 4294967168  ;;  %s706_s7 = sand.u32 1, %s3261_s0   ;;  %s2056_s21 = sshll.u32 %s3724_s11, 2 }
 0x223   : > { %s707_s9 = scalar_lea.sflag [#allocation8], %s706_s7  ;;  %s710_s18 = scalar_lea.vmem [#allocation7], %s2056_s21 }
 0x224   : > { %3049 = dma.done.wait (%p4028_p5), %s707_s9, 80  }
 0x225   : > { %3051 = vsyncadd (%p4028_p5), %s707_s9, 4294967216  ;;  %s718_s27 = scalar_lea.vmem [#allocation9], %s3724_s11  ;;  %p4029_p12 = scmp.eq.s32.totalorder %s3261_s0, 0 }
 0x227   : > { %3053 = dma.done.wait (%p4029_p12), [#allocation11], 272   ;;  %p4030_p13 = pmov %p4029_p12 }
 0x228   : > { %p4031_p4 = pmov %p4029_p12 }
 0x229   : > { %3055 = vsyncadd (%p4030_p13), [#allocation11], 4294967024 }
 0x22a   : > { %3057 = dma.done.wait (%p4031_p4), [#allocation14], 272   ;;  %p4032_p7 = pmov %p4031_p4 }
 0x22b   : > { %p4033_p2 = pmov %p4031_p4 }
 0x22c   : > { %3059 = vsyncadd (%p4032_p7), [#allocation14], 4294967024 }
 0x22d   : > { %3061 = dma.done.wait (%p4033_p2), [#allocation17], 272   ;;  %p4034_p8 = pmov %p4033_p2 }
 0x22e   : > { %p4035_p1 = pmov %p4033_p2 }
 0x22f   : > { %3063 = vsyncadd (%p4034_p8), [#allocation17], 4294967024 }
 0x230   : > { %3065 = dma.done.wait (%p4035_p1), [#allocation20], 32   ;;  %p4036_p6 = pmov %p4035_p1 }
 0x231   : > { %p4037_p11 = pmov %p4035_p1 }
 0x232   : > { %3067 = vsyncadd (%p4036_p6), [#allocation20], 4294967264 }
 0x233   : > { %3069 = dma.done.wait (%p4037_p11), [#allocation23], 272   ;;  %p4038_p0 = pmov %p4035_p1 }
 0x235   : > { %3071 = vsyncadd (%p4038_p0), [#allocation23], 4294967024  ;;  %p4039_p3 = pmov %p4038_p0 }
 0x236   : > { %p4040_p10 = pmov %p4038_p0 }
 0x237   : > { %3073 = dma.done.wait (%p4039_p3), [#allocation26], 528  }
 0x238   : > { %3075 = vsyncadd (%p4040_p10), [#allocation26], 4294966768  ;;  %p4041_p9 = pmov %p4038_p0 }
 0x239   : > { %p4042_p5 = pmov %p4038_p0 }
 0x23a   : > { %3077 = dma.done.wait (%p4041_p9), [#allocation29], 32  }
 0x23b   : > { %3079 = vsyncadd (%p4042_p5), [#allocation29], 4294967264  ;;  %v3127_v0 = vmov 0.0   ;;  %vm3128_vm0 = vmmov 0   ;;  %v2472_v1 = vld [vmem:[#allocation13] sm:$0xff]   ;;  %v2473_v2 = vld [vmem:[#allocation13 + $0x8] sm:$0xff]   ;;  %v984_v36 = vlaneseq }
 0x23c   : > { %2153 = vmatprep.subr.bf16.mxu1 %v3127_v0  ;;  %2157 = vmatprep.mubr.msk.bf16.mxu1 %vm3128_vm0, %v3127_v0  ;;  %v839_v3 = vld [vmem:[%s710_s18] sm:$0xf]  ;;  %vm863_vm1 = vcmask 261120   ;;  %v2474_v4 = vld [vmem:[#allocation10] sm:$0xff]   ;;  %v2475_v5 = vld [vmem:[#allocation10 + $0x8] sm:$0xff]   ;;  %vm908_vm2 = vcmask 519168  }
 0x23d   : > { %2169 = vmatprep.subr.bf16.mxu0 %v3127_v0  ;;  %2171 = vmatprep.mubr.msk.bf16.mxu0 %vm3128_vm0, %v3127_v0  ;;  %v3783_v6 = vld [vmem:[%s3730_s16] sm:$0xff]  ;;  %v2072_v8 = vld [vmem:[#allocation15] ss:$0 sm:$0xff]  ;;  %vm990_vm3 = vcmask 64512   ;;  %s3129_s0 = smov 112   ;;  %s3130_s3 = smov 120  }
 0x23e   : > { %2154 = vmatpush3.bf16.msra.mxu1 %v2472_v1  ;;  %v911_v7 = vpack.c.bf16 %v3783_v6, %v3783_v6  ;;  %v2076_v15 = vld [vmem:[#allocation12] ss:$0 sm:$0xff]  ;;  %s3131_s1 = smov 104   ;;  %v980_v37 = vld [vmem:[%s718_s27] sm:$0x1]  ;;  %v985_v39 = vshrl.u32 %v984_v36, 7 }
 0x23f   : > { %2155 = vmatprep.subr.bf16.mxu1 %v3127_v0  ;;  %v981_v38 = vsub.f32 2.0, %v980_v37  ;;  %s3132_s5 = smov 96   ;;  %s3133_s19 = smov 80   ;;  %vm1058_vm4 = vcmask 1043456   ;;  %vm1103_vm5 = vcmask 60416   ;;  %vm1228_vm6 = vcmask 126016  }
 0x240   : > { %v986_v41 = vsub.s32 0, %v985_v39  ;;  %s3134_s15 = smov 72   ;;  %s3135_s6 = smov 88   ;;  %vm1352_vm7 = vcmask 191616   ;;  %vm1476_vm8 = vcmask 257216   ;;  %vm1688_vm9 = vcmask 523264  }
 0x241   : > { %v982_v40 = vmul.f32 1000000.0, %v981_v38  ;;  %s3136_s13 = smov 8   ;;  %s3137_s10 = smov 16  }
 0x242   : > { %2156 = vmatpush3.bf16.msra.mxu1 %v2473_v2  ;;  %s3138_s17 = smov 24   ;;  %s4043_s16 = sld [smem:[#allocation42_spill]] }
 0x243   : > { %2161 = vmatprep.subr.bf16.mxu1 %v3127_v0  ;;  %v987_v42 = vrot.slane %v982_v40, %v986_v41  ;;  %s833_s21 = scalar_lea.vmem [#allocation31], %s2055_s23  ;;  %p4045_p13 = scmp.ne.s32.totalorder %s4006_s20, 0 }
 0x244   : > { %s1778_s9 = sshll.u32 %s833_s21, 4  ;;  %s3139_s23 = smov [#allocation31]   ;;  %s3882_s9 = int_to_ptr.vmem [resolvable:$true] %s1778_s9 }
 0x245   : > { %2158 = vmatmul.mubr.msk.bf16.vlgmr.msra.gmra.mrb[0].mxu1 %vm863_vm1, %v839_v3 }
 0x246   : > { %2162 = vmatpush3.bf16.msra.mxu1 %v2474_v4  ;;  %2165 = vmatprep.mubr.msk.bf16.mxu1 %vm3128_vm0, %v3127_v0 }
 0x247   : > { %2163 = vmatprep.subr.bf16.mxu1 %v3127_v0 }
 0x248   : > { %s2114_s7 = sshll.u32 %s4043_s16, 7 }
 0x24a   : > { %2164 = vmatpush3.bf16.msra.mxu1 %v2475_v5 }
 0x24b   : > { %2175 = vmatprep.subr.bf16.mxu1 %v3127_v0 }
 0x24d   : > { %2166 = vmatmul.mubr.msk.bf16.vlgmr.msra.gmra.mrb[4].mxu1 %vm863_vm1, %v911_v7 }
 0x24e   : > { %2177 = vmatprep.mubr.msk.bf16.mxu1 %vm3128_vm0, %v3127_v0 }
 0x318   : > { %v901_v9 = vpop.f32.mrb[0].mxu1 }
 0x319   : > { %v902_v10 = vadd.f32 %v2072_v8, %v901_v9  ;;  %v2159_v11 = vpop.f32.mrb[1].mxu1 }
 0x31a   : > { %v904_v12 = vpop.f32.mrb[2].mxu1 }
 0x31b   : > { %v907_v13 = vpack.c.bf16 %v902_v10, %v902_v10  ;;  %v2160_v14 = vpop.f32.mrb[3].mxu1 }
 0x31d   : > { %909 = vst.msk [vmem:[#allocation2] sm:$0xf] %vm908_vm2, %v907_v13 }
 0x320   : > { %v973_v16 = vpop.f32.mrb[4].mxu1 }
 0x321   : > { %v2167_v17 = vpop.f32.mrb[5].mxu1  ;;  %v974_v18 = vadd.f32 %v2076_v15, %v973_v16 }
 0x322   : > { %v976_v19 = vpop.f32.mrb[6].mxu1 }
 0x323   : > { %v2168_v20 = vpop.f32.mrb[7].mxu1  ;;  %v979_v25 = vpack.c.bf16 %v974_v18, %v974_v18 }
 0x324   : > { %v3792_v21 = vld [vmem:[#allocation2] sm:$0xf] }
 0x325   : > { %v3794_v22 = vld [vmem:[#allocation2] ss:$0 sps:$4 sm:$0xff]   ;;  %v995_v23 = vsel %vm990_vm3, %v3792_v21, 0  ;;  %v2081_v10 = vcombine.low %v3792_v21, %v3792_v21 }
 0x326   : > { %v3798_v24 = vld [vmem:[#allocation2] ss:$0 sps:$4 sm:$0xff]   ;;  %2170 = vmatpush3.bf16.xpose.msra.mxu0 %v995_v23  ;;  %1236 = vrot.lane.b32.xlu1 %v3794_v22, %s3129_s0 }
 0x327   : > { %1112 = vrot.lane.b32.xlu0 %v3798_v24, %s3130_s3  ;;  %2181 = vmatprep.subr.bf16.mxu0 %v3127_v0  ;;  %v3804_v26 = vld [vmem:[#allocation2] ss:$0 sps:$4 sm:$0xff]  }
 0x32a   : > { %1231 = vrot.lane.b32.xlu1 %v979_v25, %s3129_s0  ;;  %s4044_s0 = sld [smem:[#allocation61_spill]] }
 0x32b   : > { %1107 = vrot.lane.b32.xlu0 %v979_v25, %s3130_s3 }
 0x32d   : > { %2172 = vmatmul.mubr.msk.bf16.vlgmr.msra.gmra.mrb[0].mxu0 %vm990_vm3, %v979_v25 }
 0x32e   : > { %1355 = vrot.lane.b32.xlu1 %v979_v25, %s3131_s1  ;;  %2183 = vmatprep.mubr.msk.bf16.mxu0 %vm3128_vm0, %v3127_v0 }
 0x32f   : > { %1360 = vrot.lane.b32.xlu0 %v3804_v26, %s3131_s1  ;;  %s1764_s1 = scalar_lea.sflag [#allocation6], %s3724_s11 }
 0x330   : > { %s3880_s3 = scalar_lea.hbm %s4044_s0, %s2114_s7 }
 0x398   : > { %v1237_v29 = vpop.permute.xlu1 %1236 }
 0x399   : > { %v1113_v27 = vpop.permute.xlu0 %1112  ;;  %v1242_v31 = vsel %vm990_vm3, %v1237_v29, 0 }
 0x39a   : > { %v1118_v28 = vsel %vm990_vm3, %v1113_v27, 0 }
 0x39b   : > { %2182 = vmatpush3.bf16.xpose.msra.mxu0 %v1118_v28 }
 0x39c   : > { %2193 = vmatprep.subr.bf16.mxu0 %v3127_v0  ;;  %v1232_v33 = vpop.permute.xlu1 %1231 }
 0x39d   : > { %v1108_v30 = vpop.permute.xlu0 %1107 }
 0x3a0   : > { %v1356_v35 = vpop.permute.xlu1 %1355 }
 0x3a1   : > { %v1361_v32 = vpop.permute.xlu0 %1360 }
 0x3a2   : > { %2184 = vmatmul.mubr.msk.bf16.vlgmr.msra.gmra.mrb[4].mxu0 %vm990_vm3, %v1108_v30  ;;  %v1366_v34 = vsel %vm990_vm3, %v1361_v32, 0 }
 0x3a3   : > { %2194 = vmatpush3.bf16.xpose.msra.mxu0 %v1242_v31  ;;  %2195 = vmatprep.mubr.msk.bf16.mxu0 %vm3128_vm0, %v3127_v0 }
 0x3a4   : > { %2205 = vmatprep.subr.bf16.mxu0 %v3127_v0 }
 0x3aa   : > { %2196 = vmatmul.mubr.msk.bf16.vlgmr.msra.gmra.mrb[8].mxu0 %vm990_vm3, %v1232_v33 }
 0x3ab   : > { %2206 = vmatpush3.bf16.xpose.msra.mxu0 %v1366_v34  ;;  %2207 = vmatprep.mubr.msk.bf16.mxu0 %vm3128_vm0, %v3127_v0 }
 0x3ac   : > { %2217 = vmatprep.subr.bf16.mxu0 %v3127_v0 }
 0x3b2   : > { %2208 = vmatmul.mubr.msk.bf16.vlgmr.msra.gmra.mrb[12].mxu0 %vm990_vm3, %v1356_v35 }
 0x3b3   : > { %2221 = vmatprep.mubr.msk.bf16.mxu0 %vm3128_vm0, %v3127_v0 }
 0x400   : > { %v1031_v43 = vpop.f32.mrb[0].mxu0 }
 0x401   : > { %v1037_v44 = vsub.f32 %v1031_v43, %v987_v42  ;;  %v2173_v45 = vpop.f32.mrb[1].mxu0 }
 0x402   : > { %v1034_v46 = vpop.f32.mrb[2].mxu0 }
 0x403   : > { %v2174_v47 = vpop.f32.mrb[3].mxu0  ;;  %v1038_v48 = vsel %vm990_vm3, %v1037_v44, -inf }
 0x404   : > { %1039 = vmax.xlane.f32.xlu0 %v1038_v48 }
 0x475   : > { %v1154_v49 = vpop.f32.mrb[4].mxu0 }
 0x476   : > { %v1160_v50 = vsub.f32 %v1154_v49, %v987_v42  ;;  %v2185_v51 = vpop.f32.mrb[5].mxu0 }
 0x477   : > { %v1157_v52 = vpop.f32.mrb[6].mxu0 }
 0x478   : > { %v2186_v53 = vpop.f32.mrb[7].mxu0  ;;  %v1161_v54 = vsel %vm990_vm3, %v1160_v50, -inf }
 0x479   : > { %1162 = vmax.xlane.f32.xlu1 %v1161_v54 }
 0x47d   : > { %v1278_v55 = vpop.f32.mrb[8].mxu0 }
 0x47e   : > { %v1284_v56 = vsub.f32 %v1278_v55, %v987_v42  ;;  %v2197_v57 = vpop.f32.mrb[9].mxu0 }
 0x47f   : > { %v1281_v58 = vpop.f32.mrb[10].mxu0 }
 0x480   : > { %v2198_v59 = vpop.f32.mrb[11].mxu0  ;;  %v1285_v60 = vsel %vm990_vm3, %v1284_v56, -inf }
 0x481   : > { %1286 = vmax.xlane.f32.xlu0 %v1285_v60  ;;  %v2480_v60 = vld [vmem:[#allocation16] sm:$0xff]  }
 0x482   : > { %2218 = vmatpush3.bf16.msra.mxu0 %v2480_v60 }
 0x483   : > { %2219 = vmatprep.subr.bf16.mxu0 %v3127_v0 }
 0x485   : > { %v1402_v61 = vpop.f32.mrb[12].mxu0 }
 0x486   : > { %v1408_v62 = vsub.f32 %v1402_v61, %v987_v42  ;;  %v2209_v63 = vpop.f32.mrb[13].mxu0 }
 0x487   : > { %v1405_v1 = vpop.f32.mrb[14].mxu0 }
 0x488   : > { %v2210_v2 = vpop.f32.mrb[15].mxu0  ;;  %v1409_v3 = vsel %vm990_vm3, %v1408_v62, -inf }
 0x489   : > { %1410 = vmax.xlane.f32.xlu0 %v1409_v3 }
 0x491   : > { %v1040_v4 = vpop.xlane.xlu0 %1039 }
 0x492   : > { %v1041_v5 = vsub.f32 %v1037_v44, %v1040_v4 }
 0x494   : > { %v1042_v7 = vmul.f32 1.442695, %v1041_v5 }
 0x496   : > { %2488 = vpow2.f32 %v1042_v7 }
 0x4a0   : > { %v2489_v8 = vpop.eup %2488 }
 0x4a1   : > { %v1044_v9 = vsel %vm990_vm3, %v2489_v8, 0.0 }
 0x4a2   : > { %1045 = vadd.xlane.f32.xlu1 %v1044_v9 }
 0x4b3   : > { %1053 = vrot.lane.b32.xlu1 %v2081_v10, %s3132_s5  ;;  %s2992_s5 = scalar_lea.vmem %s3882_s9, 128 }
 0x4b4   : > { %p2993_p12 = scmp.ne.s32.totalorder %s3882_s9, %s2992_s5 }
 0x4b6   : > { %p2994_p4 = pnand %p2993_p12, %p4045_p13 }
 0x4b8   : > { %p2995_p7 = pneg %p2994_p4 }
 0x506   : > { %v1163_v11 = vpop.xlane.xlu1 %1162 }
 0x507   : > { %v1164_v12 = vsub.f32 %v1160_v50, %v1163_v11 }
 0x509   : > { %v1165_v13 = vmul.f32 1.442695, %v1164_v12 }
 0x50b   : > { %2490 = vpow2.f32 %v1165_v13 }
 0x50e   : > { %v1287_v14 = vpop.xlane.xlu0 %1286 }
 0x50f   : > { %v1288_v15 = vsub.f32 %v1284_v56, %v1287_v14  ;;  %v2095_v14 = vld [vmem:[#allocation18] ss:$0 sm:$0xff] }
 0x511   : > { %v1289_v16 = vmul.f32 1.442695, %v1288_v15 }
 0x513   : > { %2492 = vpow2.f32 %v1289_v16 }
 0x515   : > { %v2491_v17 = vpop.eup %2490 }
 0x516   : > { %v1411_v18 = vpop.xlane.xlu0 %1410  ;;  %v1167_v19 = vsel %vm990_vm3, %v2491_v17, 0.0 }
 0x517   : > { %v1412_v20 = vsub.f32 %v1408_v62, %v1411_v18  ;;  %1168 = vadd.xlane.f32.xlu0 %v1167_v19  ;;  %v2481_v62 = vld [vmem:[#allocation16 + $0x8] sm:$0xff]  }
 0x518   : > { %2220 = vmatpush3.bf16.msra.mxu0 %v2481_v62 }
 0x519   : > { %v1413_v23 = vmul.f32 1.442695, %v1412_v20  ;;  %2233 = vmatprep.subr.bf16.mxu0 %v3127_v0 }
 0x51b   : > { %2494 = vpow2.f32 %v1413_v23 }
 0x51d   : > { %v2493_v25 = vpop.eup %2492 }
 0x51e   : > { %v1291_v21 = vsel %vm990_vm3, %v2493_v25, 0.0 }
 0x51f   : > { %1292 = vadd.xlane.f32.xlu1 %v1291_v21 }
 0x525   : > { %v2495_v27 = vpop.eup %2494 }
 0x526   : > { %v1415_v28 = vsel %vm990_vm3, %v2495_v27, 0.0 }
 0x527   : > { %1416 = vadd.xlane.f32.xlu0 %v1415_v28 }
 0x52f   : > { %v1046_v29 = vpop.xlane.xlu1 %1045 }
 0x530   : > { %2496 = vrcp.f32 %v1046_v29  ;;  %1297 = vrot.lane.b32.xlu1 %v3794_v22, %s3133_s19  ;;  %s2996_s19 = sshll.u32 %s3139_s23, 4  ;;  %s2997_s19 = int_to_ptr.vmem [resolvable:$false] %s2996_s19 }
 0x531   : > { %p2999_p2 = scmp.lt.s32.totalorder %s3882_s9, %s2997_s19 }
 0x533   : > { %v1054_v30 = vpop.permute.xlu1 %1053 }
 0x534   : > { %v1060_v31 = vsel %vm1058_vm4, %v1054_v30, 0  ;;  %1421 = vrot.lane.b32.xlu1 %v3804_v26, %s3134_s15  ;;  %v2482_v30 = vld [vmem:[#allocation22] sm:$0xff]   ;;  %s2998_s15 = scalar_lea.vmem %s2997_s19, 256 }
 0x535   : > { %2176 = vmatpush3.bf16.msra.mxu1 %v1060_v31  ;;  %v2483_v31 = vld [vmem:[#allocation22 + $0x8] sm:$0xff]   ;;  %p3000_p8 = scmp.lt.s32.totalorder %s2998_s15, %s2992_s5 }
 0x536   : > { %2187 = vmatprep.subr.bf16.mxu1 %v3127_v0 }
 0x537   : > { %p3001_p1 = por %p3000_p8, %p2999_p2 }
 0x539   : > { %p3002_p6 = pnand %p3001_p1, %p2995_p7 }
 0x53a   : > { %v2497_v32 = vpop.eup %2496 }
 0x53b   : > { %v1048_v33 = vmul.f32 %v2497_v32, %v2489_v8 }
 0x53d   : > { %1173 = vrot.lane.b32.xlu0 %v3798_v24, %s3135_s6  ;;  %v1049_v34 = vpack.c.bf16 %v1048_v33, %v1048_v33 }
 0x53f   : > { %2178 = vmatmul.mubr.msk.bf16.vlgmr.msra.gmra.mrb[8].mxu1 %vm990_vm3, %v1049_v34 }
 0x540   : > { %2189 = vmatprep.mubr.msk.bf16.mxu1 %vm3128_vm0, %v3127_v0 }
 0x5a4   : > { %v1169_v22 = vpop.xlane.xlu0 %1168 }
 0x5a5   : > { %2498 = vrcp.f32 %v1169_v22  ;;  %v2099_v22 = vld [vmem:[#allocation19] ss:$0 sm:$0xff] }
 0x5ac   : > { %v1293_v35 = vpop.xlane.xlu1 %1292 }
 0x5ad   : > { %2500 = vrcp.f32 %v1293_v35 }
 0x5af   : > { %v2499_v36 = vpop.eup %2498 }
 0x5b0   : > { %v1171_v37 = vmul.f32 %v2499_v36, %v2491_v17  ;;  %v1298_v40 = vpop.permute.xlu1 %1297  ;;  %v2100_v36 = vld [vmem:[#allocation21] ss:$0 sm:$0xff] }
 0x5b1   : > { %v1303_v42 = vsel %vm1058_vm4, %v1298_v40, 0  ;;  %v2485_v40 = vld [vmem:[#allocation25 + $0x8] sm:$0xff]  }
 0x5b2   : > { %v1172_v24 = vpack.c.bf16 %v1171_v37, %v1171_v37 }
 0x5b4   : > { %v1417_v26 = vpop.xlane.xlu0 %1416  ;;  %v1422_v44 = vpop.permute.xlu1 %1421 }
 0x5b5   : > { %2502 = vrcp.f32 %v1417_v26  ;;  %v1427_v47 = vsel %vm1058_vm4, %v1422_v44, 0 }
 0x5b7   : > { %v2501_v41 = vpop.eup %2500 }
 0x5b8   : > { %v1174_v38 = vpop.permute.xlu0 %1173  ;;  %v1295_v43 = vmul.f32 %v2501_v41, %v2493_v25  ;;  %v2487_v41 = vld [vmem:[#allocation25 + $0x18] sm:$0xff]  }
 0x5b9   : > { %v1179_v39 = vsel %vm1058_vm4, %v1174_v38, 0 }
 0x5ba   : > { %2188 = vmatpush3.bf16.msra.mxu1 %v1179_v39  ;;  %v1296_v45 = vpack.c.bf16 %v1295_v43, %v1295_v43  ;;  %v2484_v39 = vld [vmem:[#allocation25] sm:$0xff]  }
 0x5bb   : > { %2199 = vmatprep.subr.bf16.mxu1 %v3127_v0 }
 0x5bd   : > { %2190 = vmatmul.mubr.msk.bf16.vlgmr.msra.gmra.mrb[12].mxu1 %vm990_vm3, %v1172_v24  ;;  %v2486_v24 = vld [vmem:[#allocation25 + $0x10] sm:$0xff]  }
 0x5be   : > { %2200 = vmatpush3.bf16.msra.mxu1 %v1303_v42  ;;  %2201 = vmatprep.mubr.msk.bf16.mxu1 %vm3128_vm0, %v3127_v0  ;;  %v2101_v42 = vld [vmem:[#allocation24] ss:$0 sm:$0xff] }
 0x5bf   : > { %2211 = vmatprep.subr.bf16.mxu1 %v3127_v0  ;;  %v2503_v46 = vpop.eup %2502 }
 0x5c0   : > { %v1419_v48 = vmul.f32 %v2503_v46, %v2495_v27 }
 0x5c2   : > { %v1420_v49 = vpack.c.bf16 %v1419_v48, %v1419_v48 }
 0x5c5   : > { %2202 = vmatmul.mubr.msk.bf16.vlgmr.msra.gmra.mrb[16].mxu1 %vm990_vm3, %v1296_v45 }
 0x5c6   : > { %2212 = vmatpush3.bf16.msra.mxu1 %v1427_v47  ;;  %2213 = vmatprep.mubr.msk.bf16.mxu1 %vm3128_vm0, %v3127_v0 }
 0x5c7   : > { %2225 = vmatprep.subr.bf16.mxu1 %v3127_v0 }
 0x5cd   : > { %2214 = vmatmul.mubr.msk.bf16.vlgmr.msra.gmra.mrb[20].mxu1 %vm990_vm3, %v1420_v49 }
 0x5ce   : > { %2229 = vmatprep.mubr.msk.bf16.mxu1 %vm3128_vm0, %v3127_v0  ;;  %2226 = vmatpush3.bf16.msra.mxu1 %v2482_v30 }
 0x5cf   : > { %2227 = vmatprep.subr.bf16.mxu1 %v3127_v0 }
 0x5d2   : > { %2228 = vmatpush3.bf16.msra.mxu1 %v2483_v31 }
 0x612   : > { %v1096_v50 = vpop.f32.mrb[8].mxu1 }
 0x613   : > { %v1102_v51 = vpack.c.bf16 %v1096_v50, %v1096_v50  ;;  %v2179_v52 = vpop.f32.mrb[9].mxu1 }
 0x614   : > { %v1099_v53 = vpop.f32.mrb[10].mxu1 }
 0x615   : > { %1104 = vst.msk [vmem:[#allocation3] sm:$0xf] %vm1103_vm5, %v1102_v51  ;;  %v2180_v54 = vpop.f32.mrb[11].mxu1 }
 0x616   : > { %v2105_v54 = vld [vmem:[#allocation27] ss:$0 sm:$0xff] }
 0x690   : > { %v1215_v55 = vpop.f32.mrb[12].mxu1 }
 0x691   : > { %v2117_v56 = vpack.c.bf16 %v1215_v55, %v1215_v55  ;;  %v2191_v57 = vpop.f32.mrb[13].mxu1 }
 0x692   : > { %v1218_v58 = vpop.f32.mrb[14].mxu1 }
 0x693   : > { %1225 = vrot.lane.b32.xlu0 %v2117_v56, %s3136_s13  ;;  %v2192_v59 = vpop.f32.mrb[15].mxu1 }
 0x698   : > { %v1339_v61 = vpop.f32.mrb[16].mxu1 }
 0x699   : > { %v2118_v63 = vpack.c.bf16 %v1339_v61, %v1339_v61  ;;  %v2203_v1 = vpop.f32.mrb[17].mxu1 }
 0x69a   : > { %v1342_v2 = vpop.f32.mrb[18].mxu1 }
 0x69b   : > { %1349 = vrot.lane.b32.xlu1 %v2118_v63, %s3137_s10  ;;  %v2204_v3 = vpop.f32.mrb[19].mxu1 }
 0x6a0   : > { %v1463_v4 = vpop.f32.mrb[20].mxu1 }
 0x6a1   : > { %v2119_v5 = vpack.c.bf16 %v1463_v4, %v1463_v4  ;;  %v2215_v7 = vpop.f32.mrb[21].mxu1 }
 0x6a2   : > { %v1466_v8 = vpop.f32.mrb[22].mxu1 }
 0x6a3   : > { %1473 = vrot.lane.b32.xlu0 %v2119_v5, %s3138_s17  ;;  %v2216_v9 = vpop.f32.mrb[23].mxu1  ;;  %v2111_v8 = vld [vmem:[#allocation28] ss:$0 sm:$0xff] }
 0x705   : > { %v1226_v10 = vpop.permute.xlu0 %1225 }
 0x706   : > { %1229 = vst.msk [vmem:[#allocation3] sm:$0xf] %vm1228_vm6, %v1226_v10  ;;  %v2112_v10 = vld [vmem:[#allocation30] ss:$0 sm:$0xff] }
 0x70d   : > { %v1350_v11 = vpop.permute.xlu1 %1349 }
 0x70e   : > { %1353 = vst.msk [vmem:[#allocation3] sm:$0xf] %vm1352_vm7, %v1350_v11 }
 0x715   : > { %v1474_v12 = vpop.permute.xlu0 %1473 }
 0x716   : > { %1477 = vst.msk [vmem:[#allocation3] sm:$0xf] %vm1476_vm8, %v1474_v12 }
 0x71d   : > { %v1478_v13 = vld [vmem:[#allocation3] sm:$0xf] }
 0x71e   : > { %2222 = vmatmul.mubr.msk.bf16.vlgmr.msra.gmra.mrb[16].mxu0 %vm863_vm1, %v1478_v13 }
 0x71f   : > { %2241 = vmatprep.mubr.msk.bf16.mxu0 %vm3128_vm0, %v3127_v0  ;;  %2234 = vmatpush3.bf16.msra.mxu0 %v2484_v39 }
 0x720   : > { %2235 = vmatprep.subr.bf16.mxu0 %v3127_v0 }
 0x723   : > { %2236 = vmatpush3.bf16.msra.mxu0 %v2485_v40 }
 0x724   : > { %2237 = vmatprep.subr.bf16.mxu0 %v3127_v0 }
 0x727   : > { %2238 = vmatpush3.bf16.msra.mxu0 %v2486_v24 }
 0x728   : > { %2239 = vmatprep.subr.bf16.mxu0 %v3127_v0 }
 0x72b   : > { %2240 = vmatpush3.bf16.msra.mxu0 %v2487_v41 }
 0x7f1   : > { %v1539_v15 = vpop.f32.mrb[16].mxu0 }
 0x7f2   : > { %v1540_v16 = vadd.f32 %v2095_v14, %v1539_v15  ;;  %v2223_v17 = vpop.f32.mrb[17].mxu0 }
 0x7f3   : > { %v1542_v18 = vpop.f32.mrb[18].mxu0 }
 0x7f4   : > { %v2224_v19 = vpop.f32.mrb[19].mxu0  ;;  %v1545_v20 = vadd.f32 %v1540_v16, %v3783_v6 }
 0x7f6   : > { %v1546_v23 = vsel %vm863_vm1, %v1545_v20, 0.0 }
 0x7f7   : > { %1547 = vadd.xlane.f32.xlu1 %v1546_v23 }
 0x884   : > { %v1548_v25 = vpop.xlane.xlu1 %1547 }
 0x885   : > { %v1550_v21 = vmul.f32 0.03125, %v1548_v25 }
 0x887   : > { %v1551_v27 = vsub.f32 %v1545_v20, %v1550_v21 }
 0x889   : > { %v1552_v28 = vmul.f32 %v1551_v27, %v1551_v27 }
 0x88b   : > { %v1553_v29 = vsel %vm863_vm1, %v1552_v28, 0.0 }
 0x88c   : > { %1554 = vadd.xlane.f32.xlu0 %v1553_v29 }
 0x919   : > { %v1555_v32 = vpop.xlane.xlu0 %1554 }
 0x91a   : > { %v1556_v33 = vmul.f32 0.03125, %v1555_v32 }
 0x91c   : > { %v1557_v34 = vadd.f32 1e-12, %v1556_v33 }
 0x91e   : > { %2504 = vrsqrt.f32 %v1557_v34 }
 0x928   : > { %v2505_v6 = vpop.eup %2504 }
 0x929   : > { %v1559_v35 = vmul.f32 %v2505_v6, %v1551_v27 }
 0x92b   : > { %v1567_v26 = vmul.f32 %v2099_v22, %v1559_v35 }
 0x92d   : > { %v1575_v37 = vadd.f32 %v2100_v36, %v1567_v26 }
 0x92f   : > { %v1576_v38 = vpack.c.bf16 %v1575_v37, %v1575_v37 }
 0x931   : > { %2230 = vmatmul.mubr.msk.bf16.vlgmr.msra.gmra.mrb[24].mxu1 %vm863_vm1, %v1576_v38 }
 0xa04   : > { %v1637_v43 = vpop.f32.mrb[24].mxu1 }
 0xa05   : > { %v1638_v44 = vadd.f32 %v2101_v42, %v1637_v43  ;;  %v2231_v45 = vpop.f32.mrb[25].mxu1 }
 0xa06   : > { %v1640_v46 = vpop.f32.mrb[26].mxu1 }
 0xa07   : > { %v1644_v47 = vmul.f32 0.70710677, %v1638_v44  ;;  %v2232_v48 = vpop.f32.mrb[27].mxu1  ;;  %v1643_v50 = vmul.f32 0.5, %v1638_v44 }
 0xa09   : > { %2506 = verf.f32 %v1644_v47 }
 0xa13   : > { %v2507_v49 = vpop.eup %2506 }
 0xa14   : > { %v1646_v51 = vadd.f32 1.0, %v2507_v49 }
 0xa16   : > { %v1647_v52 = vmul.f32 %v1646_v51, %v1643_v50 }
 0xa18   : > { %v1648_v53 = vpack.c.bf16 %v1647_v52, %v1647_v52 }
 0xa1a   : > { %2242 = vmatmul.mubr.msk.bf16.vlgmr.msra.gmra.mrb[20].mxu0 %vm1688_vm9, %v1648_v53 }
 0xaed   : > { %v1726_v55 = vpop.f32.mrb[20].mxu0 }
 0xaee   : > { %v1727_v0 = vadd.f32 %v2105_v54, %v1726_v55  ;;  %v2243_v56 = vpop.f32.mrb[21].mxu0 }
 0xaef   : > { %v1729_v57 = vpop.f32.mrb[22].mxu0 }
 0xaf0   : > { %v2244_v58 = vpop.f32.mrb[23].mxu0  ;;  %v1732_v59 = vadd.f32 %v1727_v0, %v1575_v37 }
 0xaf2   : > { %v1733_v60 = vsel %vm863_vm1, %v1732_v59, 0.0 }
 0xaf3   : > { %1734 = vadd.xlane.f32.xlu0 %v1733_v60 }
 0xb80   : > { %v1735_v61 = vpop.xlane.xlu0 %1734 }
 0xb81   : > { %v1736_v62 = vmul.f32 0.03125, %v1735_v61 }
 0xb83   : > { %v1737_v63 = vsub.f32 %v1732_v59, %v1736_v62 }
 0xb85   : > { %v1738_v1 = vmul.f32 %v1737_v63, %v1737_v63 }
 0xb87   : > { %v1739_v2 = vsel %vm863_vm1, %v1738_v1, 0.0 }
 0xb88   : > { %1740 = vadd.xlane.f32.xlu1 %v1739_v2 }
 0xc15   : > { %v1741_v3 = vpop.xlane.xlu1 %1740 }
 0xc16   : > { %v1742_v4 = vmul.f32 0.03125, %v1741_v3 }
 0xc18   : > { %v1743_v5 = vadd.f32 1e-12, %v1742_v4 }
 0xc1a   : > { %2508 = vrsqrt.f32 %v1743_v5 }
 0xc24   : > { %v2509_v7 = vpop.eup %2508 }
 0xc25   : > { %v1745_v9 = vmul.f32 %v2509_v7, %v1737_v63 }
 0xc27   : > { %v1753_v11 = vmul.f32 %v2111_v8, %v1745_v9 }
 0xc29   : > { %v1761_v12 = vadd.f32 %v2112_v10, %v1753_v11 }
 0xc2b   : > { %1762 = vst.msk [vmem:[%s833_s21] sm:$0xff] %vm863_vm1, %v1761_v12 }
 0xc2c   : > { %3005 = shalt.err (!%p3002_p6)
}
 0xc2d   : > { %s3006_s11 = scalar_lea.hbm %s3880_s3, 128  ;;  %s3010_s10 = scalar_lea.hbm %s4044_s0, 256 }
 0xc2e   : > { %p3007_p11 = scmp.ne.s32.totalorder %s3880_s3, %s3006_s11  ;;  %p3011_p10 = scmp.lt.u32.totalorder %s3880_s3, %s4044_s0 }
 0xc2f   : > { %p3012_p9 = scmp.lt.u32.totalorder %s3010_s10, %s3006_s11  ;;  %p3014_p12 = scmp.lt.u32.totalorder %s3006_s11, %s3880_s3 }
 0xc30   : > { %p3008_p0 = pnand %p3007_p11, %p4045_p13 }
 0xc31   : > { %p3013_p5 = por %p3012_p9, %p3011_p10 }
 0xc32   : > { %p3009_p3 = pneg %p3008_p0 }
 0xc33   : > { %p3015_p4 = por %p3014_p12, %p3013_p5 }
 0xc35   : > { %p3016_p7 = pnand %p3015_p4, %p3009_p3 }
 0xc37   : > { %3019 = shalt.err (!%p3016_p7)
}
 0xc38   : > { %2307 = dma.vmem_to_hbm [thread:$0]  (%p4045_p13), %s3882_s9, 128, %s3880_s3, %s1764_s1  }
 0xc39 PF: > { %s1790_s7 = sand.u32 1, %s3086_s24   ;;  %p4046_p2 = scmp.ne.s32.totalorder %s4007_s2, 0 }
 0xc3a   : > { %p4047_p8 = scmp.ge.s32.totalorder %s3106_s29, 2  ;;  %s1791_s21 = scalar_lea.sflag [#allocation6], %s1790_s7 }
 0xc3c   : > { %p2363_p1 = pnand %p4047_p8, %p4046_p2 }
 0xc3e   : > { %3081 = dma.done.wait (!%p2363_p1), %s1791_s21, 128  }
 0xc3f   : > { %3083 = vsyncadd (!%p2363_p1), %s1791_s21, 4294967168  ;;  %s43_s29 = sadd.s32 1, %s3106_s29   ;;  %s4048_s24 = smov %s3090_s25 }
 0xc40   : > { %p40_p6 = scmp.ge.s32.totalorder %s43_s29, 4   ;;  %s4049_s25 = smov %s3094_s26 }
 0xc41   : > { %s4050_s26 = smov %s3468_s22  ;;  %s4051_s27 = smov %s3102_s28 }
 0xc42   : > { %s4052_s28 = smov %s4054_s8  ;;  %42 = sbr.rel (!%p40_p6) target bundleno = 34 (0x22), region = 217 }
 0xc49   :  { %1796 = vsyncpa [#allocation5], 1 }
 0xc4a   :  { %1798 = vsyncpa [#allocation5 + $0x1], 1 }
 0xc4b   :  { %1799 = vsyncpa [#allocation8], 1 }
 0xc4c   :  { %1801 = vsyncpa [#allocation8 + $0x1], 1 }
 0xc4d   :  { %1802 = vsyncpa [#allocation11], 1 }
 0xc4e   :  { %1803 = vsyncpa [#allocation14], 1 }
 0xc4f   :  { %1804 = vsyncpa [#allocation17], 1 }
 0xc50   :  { %1805 = vsyncpa [#allocation20], 1 }
 0xc51   :  { %1806 = vsyncpa [#allocation23], 1 }
 0xc52   :  { %1807 = vsyncpa [#allocation26], 1 }
 0xc53   :  { %1808 = vsyncpa [#allocation29], 1 }
 0xc54   :  { %1809 = vsyncpa [#allocation6], 1 }
 0xc55   :  { %1811 = vsyncpa [#allocation6 + $0x1], 1 }

// kernel: tpu_custom_call.1
= control target key start
LH: loop header
LB: loop body
LE: loop exit
PB: predicated region body
PF: predicated region fallthrough
CT: control target
= control target key end

     0   :  { %s3930_s0 = inlined_call_operand.hbm [shape: f32[2,8,32], index: 0, kind: input, shape index: {}]   ;;  %s3931_s1 = inlined_call_operand.hbm [shape: bf16[2,8,32], index: 1, kind: input, shape index: {}]   ;;  %s3932_s2 = inlined_call_operand.hbm [shape: f32[2,1,8], index: 2, kind: input, shape index: {}]   ;;  %s3933_s3 = inlined_call_operand.hbm [shape: bf16[32,32], index: 3, kind: input, shape index: {}]   ;;  %s3934_s4 = inlined_call_operand.hbm [shape: f32[1,32], index: 4, kind: input, shape index: {}]   ;;  %s3935_s5 = inlined_call_operand.hbm [shape: bf16[32,64], index: 5, kind: input, shape index: {}]   ;;  %s3936_s6 = inlined_call_operand.hbm [shape: f32[1,64], index: 6, kind: input, shape index: {}]   ;;  %s3937_s7 = inlined_call_operand.hbm [shape: bf16[32,32], index: 7, kind: input, shape index: {}]   ;;  %s3938_s8 = inlined_call_operand.hbm [shape: f32[1,32], index: 8, kind: input, shape index: {}]   ;;  %s3939_s9 = inlined_call_operand.hbm [shape: f32[1,32], index: 9, kind: input, shape index: {}]   ;;  %s3940_s10 = inlined_call_operand.hbm [shape: f32[1,32], index: 10, kind: input, shape index: {}]   ;;  %s3941_s11 = inlined_call_operand.hbm [shape: bf16[32,64], index: 11, kind: input, shape index: {}]   ;;  %s3942_s12 = inlined_call_operand.hbm [shape: f32[1,64], index: 12, kind: input, shape index: {}]   ;;  %s3943_s13 = inlined_call_operand.hbm [shape: bf16[64,32], index: 13, kind: input, shape index: {}]   ;;  %s3944_s14 = inlined_call_operand.hbm [shape: f32[1,32], index: 14, kind: input, shape index: {}]   ;;  %s3945_s15 = inlined_call_operand.hbm [shape: f32[1,32], index: 15, kind: input, shape index: {}]   ;;  %s3946_s16 = inlined_call_operand.hbm [shape: f32[1,32], index: 16, kind: input, shape index: {}]   ;;  %s3947_s17 = inlined_call_operand.hbm [shape: f32[2,8,32], index: 17, kind: output, shape index: {}]  }
   0x1   :  { %3974 = sst [smem:[#allocation44_spill]] %s3930_s0 }
   0x2   :  { %3975 = sst [smem:[#allocation45_spill]] %s3931_s1 }
   0x3   :  { %3976 = sst [smem:[#allocation46_spill]] %s3932_s2 }
   0x4   :  { %3977 = sst [smem:[#allocation47_spill]] %s3933_s3 }
   0x5   :  { %3978 = sst [smem:[#allocation48_spill]] %s3934_s4 }
   0x6   :  { %3979 = sst [smem:[#allocation49_spill]] %s3935_s5 }
   0x7   :  { %3980 = sst [smem:[#allocation50_spill]] %s3936_s6 }
   0x8   :  { %3981 = sst [smem:[#allocation51_spill]] %s3937_s7 }
   0x9   :  { %3982 = sst [smem:[#allocation52_spill]] %s3938_s8 }
   0xa   :  { %3983 = sst [smem:[#allocation53_spill]] %s3939_s9 }
   0xb   :  { %3984 = sst [smem:[#allocation54_spill]] %s3940_s10 }
   0xc   :  { %3985 = sst [smem:[#allocation55_spill]] %s3941_s11 }
   0xd   :  { %3986 = sst [smem:[#allocation56_spill]] %s3942_s12 }
   0xe   :  { %3987 = sst [smem:[#allocation57_spill]] %s3943_s13 }
   0xf   :  { %3988 = sst [smem:[#allocation58_spill]] %s3944_s14 }
  0x10   :  { %3989 = sst [smem:[#allocation59_spill]] %s3945_s15 }
  0x11   :  { %3990 = sst [smem:[#allocation60_spill]] %s3946_s16 }
  0x12   :  { %3991 = sst [smem:[#allocation61_spill]] %s3947_s17 }
  0x13   :  { %22 = vsyncpa [#allocation5], 0 }
  0x14   :  { %24 = vsyncpa [#allocation5 + $0x1], 0 }
  0x15   :  { %25 = vsyncpa [#allocation8], 0 }
  0x16   :  { %27 = vsyncpa [#allocation8 + $0x1], 0 }
  0x17   :  { %28 = vsyncpa [#allocation11], 0 }
  0x18   :  { %29 = vsyncpa [#allocation14], 0 }
  0x19   :  { %30 = vsyncpa [#allocation17], 0 }
  0x1a   :  { %31 = vsyncpa [#allocation20], 0 }
  0x1b   :  { %32 = vsyncpa [#allocation23], 0 }
  0x1c   :  { %33 = vsyncpa [#allocation26], 0 }
  0x1d   :  { %34 = vsyncpa [#allocation29], 0 }
  0x1e   :  { %35 = vsyncpa [#allocation6], 0 }
  0x1f   :  { %37 = vsyncpa [#allocation6 + $0x1], 0  ;;  %s3230_s24 = smov 0   ;;  %s3232_s25 = smov 0  }
  0x20   :  { %s3234_s26 = smov 0   ;;  %s3236_s27 = smov 0  }
  0x21   :  { %s3238_s28 = smov 0   ;;  %s3240_s29 = smov 0  }
  0x22 LB: > { %3992 = sst [smem:[#allocation42_spill]] %s3098_s27  ;;  %s3261_s0 = sadd.s32 4294967295, %s3106_s29   ;;  %s3106_s29 = sphi %s3240_s29, %s43_s29   ;;  %s3102_s28 = sphi %s3238_s28, %s4052_s28   ;;  %s3098_s27 = sphi %s3236_s27, %s4051_s27   ;;  %s3094_s26 = sphi %s3234_s26, %s4050_s26   ;;  %s3090_s25 = sphi %s3232_s25, %s4049_s25   ;;  %s3086_s24 = sphi %s3230_s24, %s4048_s24  }
  0x23   : > { %p2033_p0 = scmp.ge.s32.totalorder %s3106_s29, 1  ;;  %p3958_p1 = scmp.eq.s32.totalorder %s3261_s0, 0 }
  0x24   : > { %p462_p2 = scmp.lt.s32.totalorder %s3106_s29, 3  ;;  %s3108_s18 = smov [#allocation10]  }
  0x25   : > { %s474_s19 = sshll.u32 %s3108_s18, 4  ;;  %s3109_s20 = smov [#allocation13]   ;;  %s3270_s19 = int_to_ptr.vmem [resolvable:$true] %s474_s19 }
  0x26   : > { %p3266_p3 = pnand %p2033_p0, %p462_p2  ;;  %s498_s21 = sshll.u32 %s3109_s20, 4  ;;  %s3281_s21 = int_to_ptr.vmem [resolvable:$true] %s498_s21 }
  0x27   : > { %s3110_s22 = smov [#allocation16]   ;;  %s3996_s3 = sld [smem:[#allocation47_spill]] }
  0x28   : > { %s3993_s30 = scalar_select %p3266_p3, 1, 0 }
  0x29   : > { %p2309_p4 = pneg %p3266_p3  ;;  %s3283_s23 = sshll.u32 %s3110_s22, 4  ;;  %s523_s23 = int_to_ptr.vmem [resolvable:$true] %s3283_s23 }
  0x2a   : > { %3994 = sst [smem:[#allocation43_spill]] %s3993_s30 }
  0x2b   : > { %p3277_p6 = pnand %p2309_p4, %p3958_p1 }
  0x2d   : > { %s3995_s1 = scalar_select %p3277_p6, 1, 0 }
  0x2e   : > { %s2510_s27 = scalar_lea.hbm %s3996_s3, 256  ;;  %p3293_p8 = pneg %p3277_p6 }
  0x2f   : > { %p2511_p7 = scmp.ne.s32.totalorder %s3996_s3, %s2510_s27  ;;  %p2517_p11 = scmp.lt.u32.totalorder %s2510_s27, %s3996_s3 }
  0x30   : > { %s3997_s16 = scalar_select %p3293_p8, 1, 0 }
  0x31   : > { %p2513_p9 = pnand %p3293_p8, %p2511_p7 }
  0x33   : > { %p2514_p10 = pneg %p2513_p9 }
  0x35   : > { %p2519_p12 = pnand %p2517_p11, %p2514_p10 }
  0x37   : > { %2522 = shalt.err (!%p2519_p12)
}
  0x38   : > { %s2523_s2 = scalar_lea.vmem %s3270_s19, 256  ;;  %p2531_p4 = scmp.lt.s32.totalorder %s3270_s19, %s3270_s19 }
  0x39   : > { %p2524_p13 = scmp.ne.s32.totalorder %s3270_s19, %s2523_s2  ;;  %p2532_p5 = scmp.lt.s32.totalorder %s2523_s2, %s2523_s2 }
  0x3b   : > { %p2526_p0 = pnand %p2524_p13, %p3293_p8  ;;  %p2533_p7 = por %p2532_p5, %p2531_p4 }
  0x3d   : > { %p2527_p2 = pneg %p2526_p0 }
  0x3f   : > { %p2534_p9 = pnand %p2533_p7, %p2527_p2 }
  0x41   : > { %2537 = shalt.err (!%p2534_p9)
}
  0x42   : > { %s3111_s17 = smov 64   ;;  %s3112_s27 = smov 4  }
  0x43   : > { %2312 = dma.hbm_to_vmem [thread:$0]  (!%p3277_p6), %s3996_s3, 256, %s3270_s19, [#allocation11], %s3111_s17, %s3111_s17, %s3112_s27  }
  0x44   : > { %s3998_s5 = sld [smem:[#allocation49_spill]] }
  0x4a   : > { %s2538_s2 = scalar_lea.hbm %s3998_s5, 256 }
  0x4b   : > { %p2539_p5 = scmp.ne.s32.totalorder %s3998_s5, %s2538_s2  ;;  %p2545_p12 = scmp.lt.u32.totalorder %s2538_s2, %s3998_s5 }
  0x4d   : > { %p2541_p10 = pnand %p2539_p5, %p3293_p8 }
  0x4f   : > { %p2542_p11 = pneg %p2541_p10 }
  0x51   : > { %p2547_p13 = pnand %p2545_p12, %p2542_p11 }
  0x53   : > { %2550 = shalt.err (!%p2547_p13)
}
  0x54   : > { %s2551_s19 = scalar_lea.vmem %s3281_s21, 256  ;;  %p2559_p7 = scmp.lt.s32.totalorder %s3281_s21, %s3281_s21 }
  0x55   : > { %p2552_p0 = scmp.ne.s32.totalorder %s3281_s21, %s2551_s19  ;;  %p2560_p9 = scmp.lt.s32.totalorder %s2551_s19, %s2551_s19 }
  0x57   : > { %p2554_p2 = pnand %p2552_p0, %p3293_p8  ;;  %p2561_p5 = por %p2560_p9, %p2559_p7 }
  0x59   : > { %p2555_p4 = pneg %p2554_p2 }
  0x5b   : > { %p2562_p10 = pnand %p2561_p5, %p2555_p4 }
  0x5d   : > { %2565 = shalt.err (!%p2562_p10)
}
  0x5e   : > { %2318 = dma.hbm_to_vmem [thread:$0]  (!%p3277_p6), %s3998_s5, 256, %s3281_s21, [#allocation14], %s3111_s17, %s3111_s17, %s3112_s27  }
  0x5f   : > { %s3999_s7 = sld [smem:[#allocation51_spill]] }
  0x65   : > { %s2566_s30 = scalar_lea.hbm %s3999_s7, 256 }
  0x66   : > { %p2567_p11 = scmp.ne.s32.totalorder %s3999_s7, %s2566_s30  ;;  %p2573_p0 = scmp.lt.u32.totalorder %s2566_s30, %s3999_s7 }
  0x68   : > { %p2569_p12 = pnand %p2567_p11, %p3293_p8 }
  0x6a   : > { %p2570_p13 = pneg %p2569_p12 }
  0x6c   : > { %p2575_p2 = pnand %p2573_p0, %p2570_p13 }
  0x6e   : > { %2578 = shalt.err (!%p2575_p2)
}
  0x6f   : > { %s2579_s19 = scalar_lea.vmem %s523_s23, 256  ;;  %p2587_p5 = scmp.lt.s32.totalorder %s523_s23, %s523_s23 }
  0x70   : > { %p2580_p4 = scmp.ne.s32.totalorder %s523_s23, %s2579_s19  ;;  %p2588_p10 = scmp.lt.s32.totalorder %s2579_s19, %s2579_s19 }
  0x72   : > { %p2582_p7 = pnand %p2580_p4, %p3293_p8  ;;  %p2589_p1 = por %p2588_p10, %p2587_p5 }
  0x74   : > { %p2583_p9 = pneg %p2582_p7 }
  0x76   : > { %p2590_p3 = pnand %p2589_p1, %p2583_p9 }
  0x78   : > { %2593 = shalt.err (!%p2590_p3)
}
  0x79   : > { %2324 = dma.hbm_to_vmem [thread:$0]  (!%p3277_p6), %s3999_s7, 256, %s523_s23, [#allocation17], %s3111_s17, %s3111_s17, %s3112_s27  }
  0x7a   : > { %s3113_s10 = smov [#allocation19]   ;;  %s3114_s14 = smov [#allocation22]  }
  0x7b   : > { %s547_s12 = sshll.u32 %s3113_s10, 4  ;;  %s568_s30 = sshll.u32 %s3114_s14, 4  ;;  %s548_s12 = int_to_ptr.vmem [resolvable:$true] %s547_s12  ;;  %s569_s30 = int_to_ptr.vmem [resolvable:$true] %s568_s30 }
  0x7c   : > { %s4000_s9 = sld [smem:[#allocation53_spill]] }
  0x82   : > { %s2594_s22 = scalar_lea.hbm %s4000_s9, 16 }
  0x83   : > { %p2595_p1 = scmp.ne.s32.totalorder %s4000_s9, %s2594_s22  ;;  %p2601_p12 = scmp.lt.u32.totalorder %s2594_s22, %s4000_s9 }
  0x85   : > { %p2597_p3 = pnand %p2595_p1, %p3293_p8 }
  0x87   : > { %p2598_p11 = pneg %p2597_p3 }
  0x89   : > { %p2603_p13 = pnand %p2601_p12, %p2598_p11 }
  0x8b   : > { %2606 = shalt.err (!%p2603_p13)
}
  0x8c   : > { %s2607_s23 = scalar_lea.vmem %s548_s12, 16  ;;  %s2614_s8 = scalar_lea.vmem %s548_s12, 32 }
  0x8d   : > { %p2608_p0 = scmp.ne.s32.totalorder %s548_s12, %s2607_s23  ;;  %p2615_p7 = scmp.lt.s32.totalorder %s548_s12, %s548_s12 }
  0x8e   : > { %p2616_p9 = scmp.lt.s32.totalorder %s2614_s8, %s2607_s23 }
  0x8f   : > { %p2610_p2 = pnand %p2608_p0, %p3293_p8 }
  0x90   : > { %p2617_p5 = por %p2616_p9, %p2615_p7 }
  0x91   : > { %p2611_p4 = pneg %p2610_p2 }
  0x93   : > { %p2618_p10 = pnand %p2617_p5, %p2611_p4 }
  0x95   : > { %2621 = shalt.err (!%p2618_p10)
}
  0x96   : > { %2330 = dma.hbm_to_vmem [thread:$0]  (!%p3277_p6), %s4000_s9, 16, %s548_s12, [#allocation20]  }
  0x97   : > { %s4001_s11 = sld [smem:[#allocation55_spill]] }
  0x9d   : > { %s2622_s20 = scalar_lea.hbm %s4001_s11, 256 }
  0x9e   : > { %p2623_p1 = scmp.ne.s32.totalorder %s4001_s11, %s2622_s20  ;;  %p2629_p12 = scmp.lt.u32.totalorder %s2622_s20, %s4001_s11 }
  0xa0   : > { %p2625_p3 = pnand %p2623_p1, %p3293_p8 }
  0xa2   : > { %p2626_p11 = pneg %p2625_p3 }
  0xa4   : > { %p2631_p13 = pnand %p2629_p12, %p2626_p11 }
  0xa6   : > { %2634 = shalt.err (!%p2631_p13)
}
  0xa7   : > { %s2635_s23 = scalar_lea.vmem %s569_s30, 256  ;;  %p2643_p7 = scmp.lt.s32.totalorder %s569_s30, %s569_s30 }
  0xa8   : > { %p2636_p0 = scmp.ne.s32.totalorder %s569_s30, %s2635_s23  ;;  %p2644_p9 = scmp.lt.s32.totalorder %s2635_s23, %s2635_s23 }
  0xaa   : > { %p2638_p2 = pnand %p2636_p0, %p3293_p8  ;;  %p2645_p5 = por %p2644_p9, %p2643_p7 }
  0xac   : > { %p2639_p4 = pneg %p2638_p2 }
  0xae   : > { %p2646_p10 = pnand %p2645_p5, %p2639_p4 }
  0xb0   : > { %2649 = shalt.err (!%p2646_p10)
}
  0xb1   : > { %2336 = dma.hbm_to_vmem [thread:$0]  (!%p3277_p6), %s4001_s11, 256, %s569_s30, [#allocation23], %s3111_s17, %s3111_s17, %s3112_s27  }
  0xb2   : > { %s3115_s10 = smov [#allocation25]   ;;  %s3116_s3 = smov [#allocation28]  }
  0xb3   : > { %s592_s14 = sshll.u32 %s3115_s10, 4  ;;  %s617_s18 = sshll.u32 %s3116_s3, 4  ;;  %s593_s14 = int_to_ptr.vmem [resolvable:$true] %s592_s14  ;;  %s618_s18 = int_to_ptr.vmem [resolvable:$true] %s617_s18 }
  0xb4   : > { %s4002_s13 = sld [smem:[#allocation57_spill]] }
  0xba   : > { %s2650_s2 = scalar_lea.hbm %s4002_s13, 512 }
  0xbb   : > { %p2651_p1 = scmp.ne.s32.totalorder %s4002_s13, %s2650_s2  ;;  %p2657_p12 = scmp.lt.u32.totalorder %s2650_s2, %s4002_s13 }
  0xbd   : > { %p2653_p3 = pnand %p2651_p1, %p3293_p8 }
  0xbf   : > { %p2654_p11 = pneg %p2653_p3 }
  0xc1   : > { %p2659_p13 = pnand %p2657_p12, %p2654_p11 }
  0xc3   : > { %2662 = shalt.err (!%p2659_p13)
}
  0xc4   : > { %s2663_s30 = scalar_lea.vmem %s593_s14, 512  ;;  %p2671_p7 = scmp.lt.s32.totalorder %s593_s14, %s593_s14 }
  0xc5   : > { %p2664_p0 = scmp.ne.s32.totalorder %s593_s14, %s2663_s30  ;;  %p2672_p9 = scmp.lt.s32.totalorder %s2663_s30, %s2663_s30 }
  0xc7   : > { %p2666_p2 = pnand %p2664_p0, %p3293_p8  ;;  %p2673_p5 = por %p2672_p9, %p2671_p7 }
  0xc9   : > { %p2667_p4 = pneg %p2666_p2 }
  0xcb   : > { %p2674_p10 = pnand %p2673_p5, %p2667_p4 }
  0xcd   : > { %2677 = shalt.err (!%p2674_p10)
}
  0xce   : > { %2342 = dma.hbm_to_vmem [thread:$0]  (!%p3277_p6), %s4002_s13, 512, %s593_s14, [#allocation26], %s3111_s17, %s3111_s17, %s3112_s27  }
  0xcf   : > { %s4003_s15 = sld [smem:[#allocation59_spill]] }
  0xd5   : > { %s2678_s22 = scalar_lea.hbm %s4003_s15, 16 }
  0xd6   : > { %p2679_p1 = scmp.ne.s32.totalorder %s4003_s15, %s2678_s22  ;;  %p2685_p12 = scmp.lt.u32.totalorder %s2678_s22, %s4003_s15 }
  0xd8   : > { %p2681_p3 = pnand %p2679_p1, %p3293_p8 }
  0xda   : > { %p2682_p11 = pneg %p2681_p3 }
  0xdc   : > { %p2687_p13 = pnand %p2685_p12, %p2682_p11 }
  0xde   : > { %2690 = shalt.err (!%p2687_p13)
}
  0xdf   : > { %s2691_s12 = scalar_lea.vmem %s618_s18, 16  ;;  %s2698_s17 = scalar_lea.vmem %s618_s18, 32 }
  0xe0   : > { %p2692_p0 = scmp.ne.s32.totalorder %s618_s18, %s2691_s12  ;;  %p2699_p7 = scmp.lt.s32.totalorder %s618_s18, %s618_s18 }
  0xe1   : > { %p2700_p9 = scmp.lt.s32.totalorder %s2698_s17, %s2691_s12 }
  0xe2   : > { %p2694_p2 = pnand %p2692_p0, %p3293_p8 }
  0xe3   : > { %p2701_p5 = por %p2700_p9, %p2699_p7 }
  0xe4   : > { %p2695_p4 = pneg %p2694_p2 }
  0xe6   : > { %p2702_p10 = pnand %p2701_p5, %p2695_p4 }
  0xe8   : > { %2705 = shalt.err (!%p2702_p10)
}
  0xe9   : > { %2348 = dma.hbm_to_vmem [thread:$0]  (!%p3277_p6), %s4003_s15, 16, %s618_s18, [#allocation29]  }
  0xea   : > { %s2032_s30 = sadd.s32 4294967294, %s3106_s29   ;;  %s55_s8 = sadd.s32 1, %s3102_s28 }
  0xeb   : > { %s64_s10 = sadd.s32 1, %s3094_s26  ;;  %p57_p1 = scmp.ge.s32.totalorder %s55_s8, 2 }
  0xec   : > { %p71_p3 = scmp.ne.s32.totalorder %s3094_s26, %s3090_s25  ;;  %p72_p11 = scmp.eq.s32.totalorder %s3106_s29, 0 }
  0xed   : > { %p77_p12 = scmp.ne.s32.totalorder %s3090_s25, %s3086_s24  ;;  %s4054_s8 = smov (%p57_p1, %s55_s8), 0 }
  0xee   : > { %p73_p13 = por %p72_p11, %p71_p3  ;;  %p4004_p0 = scmp.eq.s32.totalorder %s3261_s0, 0 }
  0xef   : > { %s59_s18 = ssub.s32 %s3102_s28, %s4054_s8  ;;  %p449_p4 = scmp.eq.s32.totalorder %s3261_s0, 1 }
  0xf0   : > { %p3455_p2 = por %p4004_p0, %p77_p12  ;;  %p62_p7 = scmp.eq.s32.totalorder %s59_s18, 0 }
  0xf1   : > { %p455_p9 = scmp.eq.s32.totalorder %s2032_s30, 1  ;;  %p3462_p5 = por %p449_p4, %p71_p3 }
  0xf2   : > { %s4005_s3 = scalar_select %p3455_p2, 1, 0 }
  0xf3   : > { %s4006_s20 = scalar_select %p3462_p5, 1, 0 }
  0xf4   : > { %p2380_p10 = scmp.lt.s32.totalorder %s3106_s29, 2  ;;  %p3470_p1 = por %p455_p9, %p77_p12 }
  0xf5   : > { %s3468_s22 = scalar_select %p62_p7, %s3094_s26, %s64_s10  }
  0xf6   : > { %s4007_s2 = scalar_select %p3470_p1, 1, 0 }
  0xf7   : > { %s3475_s19 = sand.u32 1, %s3094_s26   ;;  %p3477_p11 = pnand %p2380_p10, %p73_p13 }
  0xf8   : > { %s658_s23 = sand.u32 1, %s3106_s29   ;;  %s2051_s12 = sshll.u32 %s3475_s19, 2 }
  0xf9   : > { %s4008_s21 = scalar_select %p3477_p11, 1, 0 }
  0xfa   : > { %s2052_s17 = sshll.u32 %s3102_s28, 6  ;;  %s662_s27 = scalar_lea.vmem [#allocation7], %s2051_s12 }
  0xfb   : > { %s669_s14 = sshll.u32 %s662_s27, 4  ;;  %s4009_s18 = sld [smem:[#allocation45_spill]]  ;;  %s3489_s14 = int_to_ptr.vmem [resolvable:$true] %s669_s14 }
  0xfc   : > { %s3491_s7 = scalar_lea.sflag [#allocation8], %s658_s23  ;;  %p3497_p12 = pneg %p3477_p11 }
  0xfe   : > { %s4010_s11 = scalar_select %p3497_p12, 1, 0 }
 0x101   : > { %s3487_s5 = scalar_lea.hbm %s4009_s18, %s2052_s17  ;;  %s2711_s27 = scalar_lea.hbm %s4009_s18, 128 }
 0x102   : > { %s2706_s9 = scalar_lea.hbm %s3487_s5, 64  ;;  %p2712_p4 = scmp.lt.u32.totalorder %s3487_s5, %s4009_s18 }
 0x103   : > { %p2707_p3 = scmp.ne.s32.totalorder %s3487_s5, %s2706_s9  ;;  %p2713_p7 = scmp.lt.u32.totalorder %s2711_s27, %s2706_s9 }
 0x104   : > { %p2715_p10 = scmp.lt.u32.totalorder %s2706_s9, %s3487_s5 }
 0x105   : > { %p2709_p13 = pnand %p3497_p12, %p2707_p3  ;;  %p2714_p9 = por %p2713_p7, %p2712_p4 }
 0x107   : > { %p2710_p0 = pneg %p2709_p13  ;;  %p2716_p1 = por %p2715_p10, %p2714_p9 }
 0x109   : > { %p2717_p5 = pnand %p2716_p1, %p2710_p0 }
 0x10b   : > { %2720 = shalt.err (!%p2717_p5)
}
 0x10c   : > { %s2721_s23 = scalar_lea.vmem %s3489_s14, 64  ;;  %s3117_s12 = smov [#allocation7]  }
 0x10d   : > { %p2722_p3 = scmp.ne.s32.totalorder %s3489_s14, %s2721_s23  ;;  %s2726_s17 = sshll.u32 %s3117_s12, 4  ;;  %s2727_s17 = int_to_ptr.vmem [resolvable:$false] %s2726_s17 }
 0x10e   : > { %s2728_s30 = scalar_lea.vmem %s2727_s17, 128  ;;  %p2729_p6 = scmp.lt.s32.totalorder %s3489_s14, %s2727_s17 }
 0x10f   : > { %p2724_p13 = pnand %p2722_p3, %p3497_p12  ;;  %p2730_p8 = scmp.lt.s32.totalorder %s2728_s30, %s2721_s23 }
 0x111   : > { %p2725_p2 = pneg %p2724_p13  ;;  %p2731_p4 = por %p2730_p8, %p2729_p6 }
 0x113   : > { %p2732_p7 = pnand %p2731_p4, %p2725_p2 }
 0x115   : > { %2735 = shalt.err (!%p2732_p7)
}
 0x116   : > { %2358 = dma.hbm_to_vmem [thread:$0]  (!%p3477_p11), %s3487_s5, 64, %s3489_s14, %s3491_s7  }
 0x117   : > { %s3118_s9 = smov [#allocation12]   ;;  %s3119_s10 = smov [#allocation15]  }
 0x118   : > { %s488_s27 = sshll.u32 %s3118_s9, 4  ;;  %s512_s13 = sshll.u32 %s3119_s10, 4  ;;  %s489_s27 = int_to_ptr.vmem [resolvable:$true] %s488_s27  ;;  %s3521_s13 = int_to_ptr.vmem [resolvable:$true] %s512_s13 }
 0x119   : > { %s4011_s4 = sld [smem:[#allocation48_spill]]  ;;  %p4012_p8 = scmp.ne.s32.totalorder %s3997_s16, 0 }
 0x11f   : > { %s2736_s23 = scalar_lea.hbm %s4011_s4, 16 }
 0x120   : > { %p2737_p6 = scmp.ne.s32.totalorder %s4011_s4, %s2736_s23  ;;  %p2743_p1 = scmp.lt.u32.totalorder %s2736_s23, %s4011_s4 }
 0x122   : > { %p2739_p2 = pnand %p2737_p6, %p4012_p8 }
 0x124   : > { %p2740_p5 = pneg %p2739_p2 }
 0x126   : > { %p2745_p0 = pnand %p2743_p1, %p2740_p5 }
 0x128   : > { %2748 = shalt.err (!%p2745_p0)
}
 0x129   : > { %s2749_s14 = scalar_lea.vmem %s489_s27, 16  ;;  %s2756_s9 = scalar_lea.vmem %s489_s27, 32 }
 0x12a   : > { %p2750_p9 = scmp.ne.s32.totalorder %s489_s27, %s2749_s14  ;;  %p2757_p13 = scmp.lt.s32.totalorder %s489_s27, %s489_s27 }
 0x12b   : > { %p2758_p4 = scmp.lt.s32.totalorder %s2756_s9, %s2749_s14 }
 0x12c   : > { %p2752_p10 = pnand %p2750_p9, %p4012_p8 }
 0x12d   : > { %p2759_p7 = por %p2758_p4, %p2757_p13 }
 0x12e   : > { %p2753_p3 = pneg %p2752_p10 }
 0x130   : > { %p2760_p11 = pnand %p2759_p7, %p2753_p3 }
 0x132   : > { %2763 = shalt.err (!%p2760_p11)
}
 0x133   : > { %p4013_p6 = scmp.ne.s32.totalorder %s3995_s1, 0  ;;  %s4014_s6 = sld [smem:[#allocation50_spill]] }
 0x135   : > { %2315 = dma.hbm_to_vmem [thread:$0]  (!%p4013_p6), %s4011_s4, 16, %s489_s27, [#allocation11]  }
 0x139   : > { %s2764_s17 = scalar_lea.hbm %s4014_s6, 16 }
 0x13a   : > { %p2765_p2 = scmp.ne.s32.totalorder %s4014_s6, %s2764_s17  ;;  %p2771_p11 = scmp.lt.u32.totalorder %s2764_s17, %s4014_s6 }
 0x13c   : > { %p2767_p5 = pnand %p2765_p2, %p4012_p8 }
 0x13e   : > { %p2768_p1 = pneg %p2767_p5 }
 0x140   : > { %p2773_p0 = pnand %p2771_p11, %p2768_p1 }
 0x142   : > { %2776 = shalt.err (!%p2773_p0)
}
 0x143   : > { %s2777_s27 = scalar_lea.vmem %s3521_s13, 16  ;;  %s2784_s9 = scalar_lea.vmem %s3521_s13, 32 }
 0x144   : > { %p2778_p9 = scmp.ne.s32.totalorder %s3521_s13, %s2777_s27  ;;  %p2785_p13 = scmp.lt.s32.totalorder %s3521_s13, %s3521_s13 }
 0x145   : > { %p2786_p4 = scmp.lt.s32.totalorder %s2784_s9, %s2777_s27 }
 0x146   : > { %p2780_p10 = pnand %p2778_p9, %p4012_p8 }
 0x147   : > { %p2787_p7 = por %p2786_p4, %p2785_p13 }
 0x148   : > { %p2781_p3 = pneg %p2780_p10 }
 0x14a   : > { %p2788_p2 = pnand %p2787_p7, %p2781_p3 }
 0x14c   : > { %2791 = shalt.err (!%p2788_p2)
}
 0x14d   : > { %2321 = dma.hbm_to_vmem [thread:$0]  (!%p4013_p6), %s4014_s6, 16, %s3521_s13, [#allocation14]  }
 0x14e   : > { %s3120_s18 = smov [#allocation18]   ;;  %s3121_s17 = smov [#allocation21]  }
 0x14f   : > { %s536_s12 = sshll.u32 %s3120_s18, 4  ;;  %s558_s23 = sshll.u32 %s3121_s17, 4  ;;  %s537_s12 = int_to_ptr.vmem [resolvable:$true] %s536_s12  ;;  %s3565_s23 = int_to_ptr.vmem [resolvable:$true] %s558_s23 }
 0x150   : > { %s4015_s14 = sld [smem:[#allocation52_spill]] }
 0x156   : > { %s2792_s27 = scalar_lea.hbm %s4015_s14, 16 }
 0x157   : > { %p2793_p5 = scmp.ne.s32.totalorder %s4015_s14, %s2792_s27  ;;  %p2799_p0 = scmp.lt.u32.totalorder %s2792_s27, %s4015_s14 }
 0x159   : > { %p2795_p1 = pnand %p2793_p5, %p4012_p8 }
 0x15b   : > { %p2796_p11 = pneg %p2795_p1 }
 0x15d   : > { %p2801_p9 = pnand %p2799_p0, %p2796_p11 }
 0x15f   : > { %2804 = shalt.err (!%p2801_p9)
}
 0x160   : > { %s2805_s10 = scalar_lea.vmem %s537_s12, 16  ;;  %s2812_s18 = scalar_lea.vmem %s537_s12, 32 }
 0x161   : > { %p2806_p10 = scmp.ne.s32.totalorder %s537_s12, %s2805_s10  ;;  %p2813_p4 = scmp.lt.s32.totalorder %s537_s12, %s537_s12 }
 0x162   : > { %p2814_p7 = scmp.lt.s32.totalorder %s2812_s18, %s2805_s10 }
 0x163   : > { %p2808_p3 = pnand %p2806_p10, %p4012_p8 }
 0x164   : > { %p2815_p2 = por %p2814_p7, %p2813_p4 }
 0x165   : > { %p2809_p13 = pneg %p2808_p3 }
 0x167   : > { %p2816_p12 = pnand %p2815_p2, %p2809_p13 }
 0x169   : > { %2819 = shalt.err (!%p2816_p12)
}
 0x16a   : > { %2327 = dma.hbm_to_vmem [thread:$0]  (!%p4013_p6), %s4015_s14, 16, %s537_s12, [#allocation17]  }
 0x16b   : > { %s4016_s27 = sld [smem:[#allocation54_spill]] }
 0x171   : > { %s4017_s9 = smov %s4016_s27  ;;  %s2820_s15 = scalar_lea.hbm %s4016_s27, 16 }
 0x172   : > { %p2821_p5 = scmp.ne.s32.totalorder %s4017_s9, %s2820_s15  ;;  %p2827_p12 = scmp.lt.u32.totalorder %s2820_s15, %s4017_s9 }
 0x174   : > { %p2823_p1 = pnand %p2821_p5, %p4012_p8 }
 0x176   : > { %p2824_p11 = pneg %p2823_p1 }
 0x178   : > { %p2829_p0 = pnand %p2827_p12, %p2824_p11 }
 0x17a   : > { %2832 = shalt.err (!%p2829_p0)
}
 0x17b   : > { %s2833_s12 = scalar_lea.vmem %s3565_s23, 16  ;;  %s2840_s6 = scalar_lea.vmem %s3565_s23, 32 }
 0x17c   : > { %p2834_p9 = scmp.ne.s32.totalorder %s3565_s23, %s2833_s12  ;;  %p2841_p13 = scmp.lt.s32.totalorder %s3565_s23, %s3565_s23 }
 0x17d   : > { %p2842_p4 = scmp.lt.s32.totalorder %s2840_s6, %s2833_s12 }
 0x17e   : > { %p2836_p10 = pnand %p2834_p9, %p4012_p8 }
 0x17f   : > { %p2843_p7 = por %p2842_p4, %p2841_p13 }
 0x180   : > { %p2837_p3 = pneg %p2836_p10 }
 0x182   : > { %p2844_p2 = pnand %p2843_p7, %p2837_p3 }
 0x184   : > { %2847 = shalt.err (!%p2844_p2)
}
 0x185   : > { %2333 = dma.hbm_to_vmem [thread:$0]  (!%p4013_p6), %s4017_s9, 16, %s3565_s23, [#allocation20]  }
 0x186   : > { %s3122_s30 = smov [#allocation24]   ;;  %s3123_s27 = smov [#allocation27]  }
 0x187   : > { %s582_s5 = sshll.u32 %s3122_s30, 4  ;;  %s606_s15 = sshll.u32 %s3123_s27, 4  ;;  %s583_s5 = int_to_ptr.vmem [resolvable:$true] %s582_s5  ;;  %s3609_s15 = int_to_ptr.vmem [resolvable:$true] %s606_s15 }
 0x188   : > { %s4018_s18 = sld [smem:[#allocation56_spill]] }
 0x18e   : > { %s2848_s12 = scalar_lea.hbm %s4018_s18, 16 }
 0x18f   : > { %p2849_p5 = scmp.ne.s32.totalorder %s4018_s18, %s2848_s12  ;;  %p2855_p12 = scmp.lt.u32.totalorder %s2848_s12, %s4018_s18 }
 0x191   : > { %p2851_p1 = pnand %p2849_p5, %p4012_p8 }
 0x193   : > { %p2852_p11 = pneg %p2851_p1 }
 0x195   : > { %p2857_p0 = pnand %p2855_p12, %p2852_p11 }
 0x197   : > { %2860 = shalt.err (!%p2857_p0)
}
 0x198   : > { %s2861_s17 = scalar_lea.vmem %s583_s5, 16  ;;  %s2868_s30 = scalar_lea.vmem %s583_s5, 32 }
 0x199   : > { %p2862_p9 = scmp.ne.s32.totalorder %s583_s5, %s2861_s17  ;;  %p2869_p13 = scmp.lt.s32.totalorder %s583_s5, %s583_s5 }
 0x19a   : > { %p2870_p4 = scmp.lt.s32.totalorder %s2868_s30, %s2861_s17 }
 0x19b   : > { %p2864_p10 = pnand %p2862_p9, %p4012_p8 }
 0x19c   : > { %p2871_p7 = por %p2870_p4, %p2869_p13 }
 0x19d   : > { %p2865_p3 = pneg %p2864_p10 }
 0x19f   : > { %p2872_p2 = pnand %p2871_p7, %p2865_p3 }
 0x1a1   : > { %2875 = shalt.err (!%p2872_p2)
}
 0x1a2   : > { %2339 = dma.hbm_to_vmem [thread:$0]  (!%p4013_p6), %s4018_s18, 16, %s583_s5, [#allocation23]  }
 0x1a3   : > { %s4019_s12 = sld [smem:[#allocation58_spill]] }
 0x1a9   : > { %s2876_s6 = scalar_lea.hbm %s4019_s12, 16 }
 0x1aa   : > { %p2877_p5 = scmp.ne.s32.totalorder %s4019_s12, %s2876_s6  ;;  %p2883_p12 = scmp.lt.u32.totalorder %s2876_s6, %s4019_s12 }
 0x1ac   : > { %p2879_p1 = pnand %p2877_p5, %p4012_p8 }
 0x1ae   : > { %p2880_p11 = pneg %p2879_p1 }
 0x1b0   : > { %p2885_p0 = pnand %p2883_p12, %p2880_p11 }
 0x1b2   : > { %2888 = shalt.err (!%p2885_p0)
}
 0x1b3   : > { %s2889_s5 = scalar_lea.vmem %s3609_s15, 16  ;;  %s2896_s14 = scalar_lea.vmem %s3609_s15, 32 }
 0x1b4   : > { %p2890_p9 = scmp.ne.s32.totalorder %s3609_s15, %s2889_s5  ;;  %p2897_p13 = scmp.lt.s32.totalorder %s3609_s15, %s3609_s15 }
 0x1b5   : > { %p2898_p4 = scmp.lt.s32.totalorder %s2896_s14, %s2889_s5 }
 0x1b6   : > { %p2892_p10 = pnand %p2890_p9, %p4012_p8 }
 0x1b7   : > { %p2899_p7 = por %p2898_p4, %p2897_p13 }
 0x1b8   : > { %p2893_p3 = pneg %p2892_p10 }
 0x1ba   : > { %p2900_p2 = pnand %p2899_p7, %p2893_p3 }
 0x1bc   : > { %2903 = shalt.err (!%p2900_p2)
}
 0x1bd   : > { %2345 = dma.hbm_to_vmem [thread:$0]  (!%p4013_p6), %s4019_s12, 16, %s3609_s15, [#allocation26]  }
 0x1be   : > { %s3124_s10 = smov [#allocation30]   ;;  %s2049_s4 = sshll.u32 %s3475_s19, 3 }
 0x1bf   : > { %s628_s6 = sshll.u32 %s3124_s10, 4  ;;  %s4020_s30 = sld [smem:[#allocation60_spill]]  ;;  %s629_s6 = int_to_ptr.vmem [resolvable:$true] %s628_s6 }
 0x1c5   : > { %s2904_s5 = scalar_lea.hbm %s4020_s30, 16 }
 0x1c6   : > { %p2905_p5 = scmp.ne.s32.totalorder %s4020_s30, %s2904_s5  ;;  %p2911_p12 = scmp.lt.u32.totalorder %s2904_s5, %s4020_s30 }
 0x1c8   : > { %p2907_p1 = pnand %p2905_p5, %p4012_p8 }
 0x1ca   : > { %p2908_p11 = pneg %p2907_p1 }
 0x1cc   : > { %p2913_p0 = pnand %p2911_p12, %p2908_p11 }
 0x1ce   : > { %2916 = shalt.err (!%p2913_p0)
}
 0x1cf   : > { %s2917_s15 = scalar_lea.vmem %s629_s6, 16  ;;  %s2924_s13 = scalar_lea.vmem %s629_s6, 32 }
 0x1d0   : > { %p2918_p9 = scmp.ne.s32.totalorder %s629_s6, %s2917_s15  ;;  %p2925_p13 = scmp.lt.s32.totalorder %s629_s6, %s629_s6 }
 0x1d1   : > { %p2926_p4 = scmp.lt.s32.totalorder %s2924_s13, %s2917_s15 }
 0x1d2   : > { %p2920_p10 = pnand %p2918_p9, %p4012_p8 }
 0x1d3   : > { %p2927_p7 = por %p2926_p4, %p2925_p13 }
 0x1d4   : > { %p2921_p3 = pneg %p2920_p10 }
 0x1d6   : > { %p2928_p2 = pnand %p2927_p7, %p2921_p3 }
 0x1d8   : > { %2931 = shalt.err (!%p2928_p2)
}
 0x1d9   : > { %2351 = dma.hbm_to_vmem [thread:$0]  (!%p4013_p6), %s4020_s30, 16, %s629_s6, [#allocation29]  }
 0x1da   : > { %s2050_s18 = sshll.u32 %s3102_s28, 7  ;;  %s643_s23 = scalar_lea.vmem [#allocation4], %s2049_s4 }
 0x1db   : > { %s651_s16 = sshll.u32 %s643_s23, 4  ;;  %s4021_s14 = sld [smem:[#allocation44_spill]]  ;;  %s652_s16 = int_to_ptr.vmem [resolvable:$true] %s651_s16 }
 0x1dc   : > { %s640_s1 = scalar_lea.sflag [#allocation5], %s3475_s19  ;;  %p4022_p5 = scmp.ne.s32.totalorder %s4010_s11, 0 }
 0x1e1   : > { %s3676_s27 = scalar_lea.hbm %s4021_s14, %s2050_s18  ;;  %s2937_s4 = scalar_lea.hbm %s4021_s14, 256 }
 0x1e2   : > { %s2932_s15 = scalar_lea.hbm %s3676_s27, 128  ;;  %p2938_p6 = scmp.lt.u32.totalorder %s3676_s27, %s4021_s14 }
 0x1e3   : > { %p2933_p8 = scmp.ne.s32.totalorder %s3676_s27, %s2932_s15  ;;  %p2939_p12 = scmp.lt.u32.totalorder %s2937_s4, %s2932_s15 }
 0x1e4   : > { %p2941_p9 = scmp.lt.u32.totalorder %s2932_s15, %s3676_s27 }
 0x1e5   : > { %p2935_p1 = pnand %p2933_p8, %p4022_p5  ;;  %p2940_p0 = por %p2939_p12, %p2938_p6 }
 0x1e7   : > { %p2936_p11 = pneg %p2935_p1  ;;  %p2942_p10 = por %p2941_p9, %p2940_p0 }
 0x1e9   : > { %p2943_p3 = pnand %p2942_p10, %p2936_p11 }
 0x1eb   : > { %2946 = shalt.err (!%p2943_p3)
}
 0x1ec   : > { %s2947_s18 = scalar_lea.vmem %s652_s16, 128  ;;  %s3125_s23 = smov [#allocation4]  }
 0x1ed   : > { %p2948_p13 = scmp.ne.s32.totalorder %s652_s16, %s2947_s18  ;;  %s2952_s17 = sshll.u32 %s3125_s23, 4  ;;  %s2953_s17 = int_to_ptr.vmem [resolvable:$false] %s2952_s17 }
 0x1ee   : > { %s2954_s5 = scalar_lea.vmem %s2953_s17, 256  ;;  %p2955_p2 = scmp.lt.s32.totalorder %s652_s16, %s2953_s17 }
 0x1ef   : > { %p2950_p4 = pnand %p2948_p13, %p4022_p5  ;;  %p2956_p8 = scmp.lt.s32.totalorder %s2954_s5, %s2947_s18 }
 0x1f1   : > { %p2951_p7 = pneg %p2950_p4  ;;  %p2957_p1 = por %p2956_p8, %p2955_p2 }
 0x1f3   : > { %p2958_p6 = pnand %p2957_p1, %p2951_p7 }
 0x1f5   : > { %2961 = shalt.err (!%p2958_p6)
}
 0x1f6   : > { %p4023_p12 = scmp.ne.s32.totalorder %s4008_s21, 0  ;;  %s2053_s15 = sshll.u32 %s3102_s28, 4 }
 0x1f7   : > { %s4024_s4 = sld [smem:[#allocation46_spill]]  ;;  %s679_s10 = scalar_lea.vmem [#allocation9], %s3475_s19 }
 0x1f8   : > { %2355 = dma.hbm_to_vmem [thread:$0]  (!%p4023_p12), %s3676_s27, 128, %s652_s16, %s640_s1  }
 0x1f9   : > { %s686_s18 = sshll.u32 %s679_s10, 4  ;;  %s687_s18 = int_to_ptr.vmem [resolvable:$true] %s686_s18 }
 0x1fd   : > { %s3700_s9 = scalar_lea.hbm %s4024_s4, %s2053_s15  ;;  %s2967_s27 = scalar_lea.hbm %s4024_s4, 32 }
 0x1fe   : > { %s2962_s23 = scalar_lea.hbm %s3700_s9, 16  ;;  %p2968_p10 = scmp.lt.u32.totalorder %s3700_s9, %s4024_s4 }
 0x1ff   : > { %p2963_p11 = scmp.ne.s32.totalorder %s3700_s9, %s2962_s23  ;;  %p2969_p3 = scmp.lt.u32.totalorder %s2967_s27, %s2962_s23 }
 0x200   : > { %p2971_p4 = scmp.lt.u32.totalorder %s2962_s23, %s3700_s9 }
 0x201   : > { %p2965_p0 = pnand %p2963_p11, %p4022_p5  ;;  %p2970_p13 = por %p2969_p3, %p2968_p10 }
 0x203   : > { %p2966_p9 = pneg %p2965_p0  ;;  %p2972_p7 = por %p2971_p4, %p2970_p13 }
 0x205   : > { %p2973_p2 = pnand %p2972_p7, %p2966_p9 }
 0x207   : > { %2976 = shalt.err (!%p2973_p2)
}
 0x208   : > { %s2977_s19 = scalar_lea.vmem %s687_s18, 16  ;;  %s3126_s15 = smov [#allocation9]  }
 0x209   : > { %p2978_p8 = scmp.ne.s32.totalorder %s687_s18, %s2977_s19  ;;  %s2982_s6 = sshll.u32 %s3126_s15, 4  ;;  %s2983_s6 = int_to_ptr.vmem [resolvable:$false] %s2982_s6 }
 0x20a   : > { %s2984_s13 = scalar_lea.vmem %s2983_s6, 32  ;;  %p2985_p11 = scmp.lt.s32.totalorder %s687_s18, %s2983_s6 }
 0x20b   : > { %p2980_p1 = pnand %p2978_p8, %p4022_p5  ;;  %p2986_p0 = scmp.lt.s32.totalorder %s2984_s13, %s2977_s19 }
 0x20d   : > { %p2981_p6 = pneg %p2980_p1  ;;  %p2987_p12 = por %p2986_p0, %p2985_p11 }
 0x20f   : > { %p2988_p3 = pnand %p2987_p12, %p2981_p6 }
 0x211   : > { %2991 = shalt.err (!%p2988_p3)
}
 0x212   : > { %p4025_p10 = scmp.ne.s32.totalorder %s4008_s21, 0  ;;  %s4026_s10 = sld [smem:[#allocation43_spill]] }
 0x214   : > { %2361 = dma.hbm_to_vmem [thread:$0]  (!%p4025_p10), %s3700_s9, 16, %s687_s18, %s3491_s7  }
 0x218   : > { %p4027_p9 = scmp.ne.s32.totalorder %s4026_s10, 0 }
 0x219   : > { %s3724_s11 = sand.u32 (!%p4027_p9), 1, %s3090_s25   ;;  %p4028_p5 = scmp.ne.s32.totalorder (!%p4027_p9), %s4005_s3, 0 }
 0x21a   : > { %695 = sbr.rel (%p4027_p9) target bundleno = 3129 (0xc39), region = 88  ;;  %s2055_s23 = sshll.u32 (!%p4027_p9), %s3724_s11, 3 }
 0x21b   : > { %s698_s17 = scalar_lea.sflag (!%p4027_p9), [#allocation5], %s3724_s11  ;;  %s3730_s16 = scalar_lea.vmem (!%p4027_p9), [#allocation4], %s2055_s23 }
 0x221   : > { %3045 = dma.done.wait (%p4028_p5), %s698_s17, 128  }
 0x222   : > { %3047 = vsyncadd (%p4028_p5), %s698_s17, 4294967168  ;;  %s706_s7 = sand.u32 1, %s3261_s0   ;;  %s2056_s21 = sshll.u32 %s3724_s11, 2 }
 0x223   : > { %s707_s9 = scalar_lea.sflag [#allocation8], %s706_s7  ;;  %s710_s18 = scalar_lea.vmem [#allocation7], %s2056_s21 }
 0x224   : > { %3049 = dma.done.wait (%p4028_p5), %s707_s9, 80  }
 0x225   : > { %3051 = vsyncadd (%p4028_p5), %s707_s9, 4294967216  ;;  %s718_s27 = scalar_lea.vmem [#allocation9], %s3724_s11  ;;  %p4029_p12 = scmp.eq.s32.totalorder %s3261_s0, 0 }
 0x227   : > { %3053 = dma.done.wait (%p4029_p12), [#allocation11], 272   ;;  %p4030_p13 = pmov %p4029_p12 }
 0x228   : > { %p4031_p4 = pmov %p4029_p12 }
 0x229   : > { %3055 = vsyncadd (%p4030_p13), [#allocation11], 4294967024 }
 0x22a   : > { %3057 = dma.done.wait (%p4031_p4), [#allocation14], 272   ;;  %p4032_p7 = pmov %p4031_p4 }
 0x22b   : > { %p4033_p2 = pmov %p4031_p4 }
 0x22c   : > { %3059 = vsyncadd (%p4032_p7), [#allocation14], 4294967024 }
 0x22d   : > { %3061 = dma.done.wait (%p4033_p2), [#allocation17], 272   ;;  %p4034_p8 = pmov %p4033_p2 }
 0x22e   : > { %p4035_p1 = pmov %p4033_p2 }
 0x22f   : > { %3063 = vsyncadd (%p4034_p8), [#allocation17], 4294967024 }
 0x230   : > { %3065 = dma.done.wait (%p4035_p1), [#allocation20], 32   ;;  %p4036_p6 = pmov %p4035_p1 }
 0x231   : > { %p4037_p11 = pmov %p4035_p1 }
 0x232   : > { %3067 = vsyncadd (%p4036_p6), [#allocation20], 4294967264 }
 0x233   : > { %3069 = dma.done.wait (%p4037_p11), [#allocation23], 272   ;;  %p4038_p0 = pmov %p4035_p1 }
 0x235   : > { %3071 = vsyncadd (%p4038_p0), [#allocation23], 4294967024  ;;  %p4039_p3 = pmov %p4038_p0 }
 0x236   : > { %p4040_p10 = pmov %p4038_p0 }
 0x237   : > { %3073 = dma.done.wait (%p4039_p3), [#allocation26], 528  }
 0x238   : > { %3075 = vsyncadd (%p4040_p10), [#allocation26], 4294966768  ;;  %p4041_p9 = pmov %p4038_p0 }
 0x239   : > { %p4042_p5 = pmov %p4038_p0 }
 0x23a   : > { %3077 = dma.done.wait (%p4041_p9), [#allocation29], 32  }
 0x23b   : > { %3079 = vsyncadd (%p4042_p5), [#allocation29], 4294967264  ;;  %v3127_v0 = vmov 0.0   ;;  %vm3128_vm0 = vmmov 0   ;;  %v2472_v1 = vld [vmem:[#allocation13] sm:$0xff]   ;;  %v2473_v2 = vld [vmem:[#allocation13 + $0x8] sm:$0xff]   ;;  %v984_v36 = vlaneseq }
 0x23c   : > { %2153 = vmatprep.subr.bf16.mxu1 %v3127_v0  ;;  %2157 = vmatprep.mubr.msk.bf16.mxu1 %vm3128_vm0, %v3127_v0  ;;  %v839_v3 = vld [vmem:[%s710_s18] sm:$0xf]  ;;  %vm863_vm1 = vcmask 261120   ;;  %v2474_v4 = vld [vmem:[#allocation10] sm:$0xff]   ;;  %v2475_v5 = vld [vmem:[#allocation10 + $0x8] sm:$0xff]   ;;  %vm908_vm2 = vcmask 519168  }
 0x23d   : > { %2169 = vmatprep.subr.bf16.mxu0 %v3127_v0  ;;  %2171 = vmatprep.mubr.msk.bf16.mxu0 %vm3128_vm0, %v3127_v0  ;;  %v3783_v6 = vld [vmem:[%s3730_s16] sm:$0xff]  ;;  %v2072_v8 = vld [vmem:[#allocation15] ss:$0 sm:$0xff]  ;;  %vm990_vm3 = vcmask 64512   ;;  %s3129_s0 = smov 112   ;;  %s3130_s3 = smov 120  }
 0x23e   : > { %2154 = vmatpush3.bf16.msra.mxu1 %v2472_v1  ;;  %v911_v7 = vpack.c.bf16 %v3783_v6, %v3783_v6  ;;  %v2076_v15 = vld [vmem:[#allocation12] ss:$0 sm:$0xff]  ;;  %s3131_s1 = smov 104   ;;  %v980_v37 = vld [vmem:[%s718_s27] sm:$0x1]  ;;  %v985_v39 = vshrl.u32 %v984_v36, 7 }
 0x23f   : > { %2155 = vmatprep.subr.bf16.mxu1 %v3127_v0  ;;  %v981_v38 = vsub.f32 2.0, %v980_v37  ;;  %s3132_s5 = smov 96   ;;  %s3133_s19 = smov 80   ;;  %vm1058_vm4 = vcmask 1043456   ;;  %vm1103_vm5 = vcmask 60416   ;;  %vm1228_vm6 = vcmask 126016  }
 0x240   : > { %v986_v41 = vsub.s32 0, %v985_v39  ;;  %s3134_s15 = smov 72   ;;  %s3135_s6 = smov 88   ;;  %vm1352_vm7 = vcmask 191616   ;;  %vm1476_vm8 = vcmask 257216   ;;  %vm1688_vm9 = vcmask 523264  }
 0x241   : > { %v982_v40 = vmul.f32 1000000.0, %v981_v38  ;;  %s3136_s13 = smov 8   ;;  %s3137_s10 = smov 16  }
 0x242   : > { %2156 = vmatpush3.bf16.msra.mxu1 %v2473_v2  ;;  %s3138_s17 = smov 24   ;;  %s4043_s16 = sld [smem:[#allocation42_spill]] }
 0x243   : > { %2161 = vmatprep.subr.bf16.mxu1 %v3127_v0  ;;  %v987_v42 = vrot.slane %v982_v40, %v986_v41  ;;  %s833_s21 = scalar_lea.vmem [#allocation31], %s2055_s23  ;;  %p4045_p13 = scmp.ne.s32.totalorder %s4006_s20, 0 }
 0x244   : > { %s1778_s9 = sshll.u32 %s833_s21, 4  ;;  %s3139_s23 = smov [#allocation31]   ;;  %s3882_s9 = int_to_ptr.vmem [resolvable:$true] %s1778_s9 }
 0x245   : > { %2158 = vmatmul.mubr.msk.bf16.vlgmr.msra.gmra.mrb[0].mxu1 %vm863_vm1, %v839_v3 }
 0x246   : > { %2162 = vmatpush3.bf16.msra.mxu1 %v2474_v4  ;;  %2165 = vmatprep.mubr.msk.bf16.mxu1 %vm3128_vm0, %v3127_v0 }
 0x247   : > { %2163 = vmatprep.subr.bf16.mxu1 %v3127_v0 }
 0x248   : > { %s2114_s7 = sshll.u32 %s4043_s16, 7 }
 0x24a   : > { %2164 = vmatpush3.bf16.msra.mxu1 %v2475_v5 }
 0x24b   : > { %2175 = vmatprep.subr.bf16.mxu1 %v3127_v0 }
 0x24d   : > { %2166 = vmatmul.mubr.msk.bf16.vlgmr.msra.gmra.mrb[4].mxu1 %vm863_vm1, %v911_v7 }
 0x24e   : > { %2177 = vmatprep.mubr.msk.bf16.mxu1 %vm3128_vm0, %v3127_v0 }
 0x318   : > { %v901_v9 = vpop.f32.mrb[0].mxu1 }
 0x319   : > { %v902_v10 = vadd.f32 %v2072_v8, %v901_v9  ;;  %v2159_v11 = vpop.f32.mrb[1].mxu1 }
 0x31a   : > { %v904_v12 = vpop.f32.mrb[2].mxu1 }
 0x31b   : > { %v907_v13 = vpack.c.bf16 %v902_v10, %v902_v10  ;;  %v2160_v14 = vpop.f32.mrb[3].mxu1 }
 0x31d   : > { %909 = vst.msk [vmem:[#allocation2] sm:$0xf] %vm908_vm2, %v907_v13 }
 0x320   : > { %v973_v16 = vpop.f32.mrb[4].mxu1 }
 0x321   : > { %v2167_v17 = vpop.f32.mrb[5].mxu1  ;;  %v974_v18 = vadd.f32 %v2076_v15, %v973_v16 }
 0x322   : > { %v976_v19 = vpop.f32.mrb[6].mxu1 }
 0x323   : > { %v2168_v20 = vpop.f32.mrb[7].mxu1  ;;  %v979_v25 = vpack.c.bf16 %v974_v18, %v974_v18 }
 0x324   : > { %v3792_v21 = vld [vmem:[#allocation2] sm:$0xf] }
 0x325   : > { %v3794_v22 = vld [vmem:[#allocation2] ss:$0 sps:$4 sm:$0xff]   ;;  %v995_v23 = vsel %vm990_vm3, %v3792_v21, 0  ;;  %v2081_v10 = vcombine.low %v3792_v21, %v3792_v21 }
 0x326   : > { %v3798_v24 = vld [vmem:[#allocation2] ss:$0 sps:$4 sm:$0xff]   ;;  %2170 = vmatpush3.bf16.xpose.msra.mxu0 %v995_v23  ;;  %1236 = vrot.lane.b32.xlu1 %v3794_v22, %s3129_s0 }
 0x327   : > { %1112 = vrot.lane.b32.xlu0 %v3798_v24, %s3130_s3  ;;  %2181 = vmatprep.subr.bf16.mxu0 %v3127_v0  ;;  %v3804_v26 = vld [vmem:[#allocation2] ss:$0 sps:$4 sm:$0xff]  }
 0x32a   : > { %1231 = vrot.lane.b32.xlu1 %v979_v25, %s3129_s0  ;;  %s4044_s0 = sld [smem:[#allocation61_spill]] }
 0x32b   : > { %1107 = vrot.lane.b32.xlu0 %v979_v25, %s3130_s3 }
 0x32d   : > { %2172 = vmatmul.mubr.msk.bf16.vlgmr.msra.gmra.mrb[0].mxu0 %vm990_vm3, %v979_v25 }
 0x32e   : > { %1355 = vrot.lane.b32.xlu1 %v979_v25, %s3131_s1  ;;  %2183 = vmatprep.mubr.msk.bf16.mxu0 %vm3128_vm0, %v3127_v0 }
 0x32f   : > { %1360 = vrot.lane.b32.xlu0 %v3804_v26, %s3131_s1  ;;  %s1764_s1 = scalar_lea.sflag [#allocation6], %s3724_s11 }
 0x330   : > { %s3880_s3 = scalar_lea.hbm %s4044_s0, %s2114_s7 }
 0x398   : > { %v1237_v29 = vpop.permute.xlu1 %1236 }
 0x399   : > { %v1113_v27 = vpop.permute.xlu0 %1112  ;;  %v1242_v31 = vsel %vm990_vm3, %v1237_v29, 0 }
 0x39a   : > { %v1118_v28 = vsel %vm990_vm3, %v1113_v27, 0 }
 0x39b   : > { %2182 = vmatpush3.bf16.xpose.msra.mxu0 %v1118_v28 }
 0x39c   : > { %2193 = vmatprep.subr.bf16.mxu0 %v3127_v0  ;;  %v1232_v33 = vpop.permute.xlu1 %1231 }
 0x39d   : > { %v1108_v30 = vpop.permute.xlu0 %1107 }
 0x3a0   : > { %v1356_v35 = vpop.permute.xlu1 %1355 }
 0x3a1   : > { %v1361_v32 = vpop.permute.xlu0 %1360 }
 0x3a2   : > { %2184 = vmatmul.mubr.msk.bf16.vlgmr.msra.gmra.mrb[4].mxu0 %vm990_vm3, %v1108_v30  ;;  %v1366_v34 = vsel %vm990_vm3, %v1361_v32, 0 }
 0x3a3   : > { %2194 = vmatpush3.bf16.xpose.msra.mxu0 %v1242_v31  ;;  %2195 = vmatprep.mubr.msk.bf16.mxu0 %vm3128_vm0, %v3127_v0 }
 0x3a4   : > { %2205 = vmatprep.subr.bf16.mxu0 %v3127_v0 }
 0x3aa   : > { %2196 = vmatmul.mubr.msk.bf16.vlgmr.msra.gmra.mrb[8].mxu0 %vm990_vm3, %v1232_v33 }
 0x3ab   : > { %2206 = vmatpush3.bf16.xpose.msra.mxu0 %v1366_v34  ;;  %2207 = vmatprep.mubr.msk.bf16.mxu0 %vm3128_vm0, %v3127_v0 }
 0x3ac   : > { %2217 = vmatprep.subr.bf16.mxu0 %v3127_v0 }
 0x3b2   : > { %2208 = vmatmul.mubr.msk.bf16.vlgmr.msra.gmra.mrb[12].mxu0 %vm990_vm3, %v1356_v35 }
 0x3b3   : > { %2221 = vmatprep.mubr.msk.bf16.mxu0 %vm3128_vm0, %v3127_v0 }
 0x400   : > { %v1031_v43 = vpop.f32.mrb[0].mxu0 }
 0x401   : > { %v1037_v44 = vsub.f32 %v1031_v43, %v987_v42  ;;  %v2173_v45 = vpop.f32.mrb[1].mxu0 }
 0x402   : > { %v1034_v46 = vpop.f32.mrb[2].mxu0 }
 0x403   : > { %v2174_v47 = vpop.f32.mrb[3].mxu0  ;;  %v1038_v48 = vsel %vm990_vm3, %v1037_v44, -inf }
 0x404   : > { %1039 = vmax.xlane.f32.xlu0 %v1038_v48 }
 0x475   : > { %v1154_v49 = vpop.f32.mrb[4].mxu0 }
 0x476   : > { %v1160_v50 = vsub.f32 %v1154_v49, %v987_v42  ;;  %v2185_v51 = vpop.f32.mrb[5].mxu0 }
 0x477   : > { %v1157_v52 = vpop.f32.mrb[6].mxu0 }
 0x478   : > { %v2186_v53 = vpop.f32.mrb[7].mxu0  ;;  %v1161_v54 = vsel %vm990_vm3, %v1160_v50, -inf }
 0x479   : > { %1162 = vmax.xlane.f32.xlu1 %v1161_v54 }
 0x47d   : > { %v1278_v55 = vpop.f32.mrb[8].mxu0 }
 0x47e   : > { %v1284_v56 = vsub.f32 %v1278_v55, %v987_v42  ;;  %v2197_v57 = vpop.f32.mrb[9].mxu0 }
 0x47f   : > { %v1281_v58 = vpop.f32.mrb[10].mxu0 }
 0x480   : > { %v2198_v59 = vpop.f32.mrb[11].mxu0  ;;  %v1285_v60 = vsel %vm990_vm3, %v1284_v56, -inf }
 0x481   : > { %1286 = vmax.xlane.f32.xlu0 %v1285_v60  ;;  %v2480_v60 = vld [vmem:[#allocation16] sm:$0xff]  }
 0x482   : > { %2218 = vmatpush3.bf16.msra.mxu0 %v2480_v60 }
 0x483   : > { %2219 = vmatprep.subr.bf16.mxu0 %v3127_v0 }
 0x485   : > { %v1402_v61 = vpop.f32.mrb[12].mxu0 }
 0x486   : > { %v1408_v62 = vsub.f32 %v1402_v61, %v987_v42  ;;  %v2209_v63 = vpop.f32.mrb[13].mxu0 }
 0x487   : > { %v1405_v1 = vpop.f32.mrb[14].mxu0 }
 0x488   : > { %v2210_v2 = vpop.f32.mrb[15].mxu0  ;;  %v1409_v3 = vsel %vm990_vm3, %v1408_v62, -inf }
 0x489   : > { %1410 = vmax.xlane.f32.xlu0 %v1409_v3 }
 0x491   : > { %v1040_v4 = vpop.xlane.xlu0 %1039 }
 0x492   : > { %v1041_v5 = vsub.f32 %v1037_v44, %v1040_v4 }
 0x494   : > { %v1042_v7 = vmul.f32 1.442695, %v1041_v5 }
 0x496   : > { %2488 = vpow2.f32 %v1042_v7 }
 0x4a0   : > { %v2489_v8 = vpop.eup %2488 }
 0x4a1   : > { %v1044_v9 = vsel %vm990_vm3, %v2489_v8, 0.0 }
 0x4a2   : > { %1045 = vadd.xlane.f32.xlu1 %v1044_v9 }
 0x4b3   : > { %1053 = vrot.lane.b32.xlu1 %v2081_v10, %s3132_s5  ;;  %s2992_s5 = scalar_lea.vmem %s3882_s9, 128 }
 0x4b4   : > { %p2993_p12 = scmp.ne.s32.totalorder %s3882_s9, %s2992_s5 }
 0x4b6   : > { %p2994_p4 = pnand %p2993_p12, %p4045_p13 }
 0x4b8   : > { %p2995_p7 = pneg %p2994_p4 }
 0x506   : > { %v1163_v11 = vpop.xlane.xlu1 %1162 }
 0x507   : > { %v1164_v12 = vsub.f32 %v1160_v50, %v1163_v11 }
 0x509   : > { %v1165_v13 = vmul.f32 1.442695, %v1164_v12 }
 0x50b   : > { %2490 = vpow2.f32 %v1165_v13 }
 0x50e   : > { %v1287_v14 = vpop.xlane.xlu0 %1286 }
 0x50f   : > { %v1288_v15 = vsub.f32 %v1284_v56, %v1287_v14  ;;  %v2095_v14 = vld [vmem:[#allocation18] ss:$0 sm:$0xff] }
 0x511   : > { %v1289_v16 = vmul.f32 1.442695, %v1288_v15 }
 0x513   : > { %2492 = vpow2.f32 %v1289_v16 }
 0x515   : > { %v2491_v17 = vpop.eup %2490 }
 0x516   : > { %v1411_v18 = vpop.xlane.xlu0 %1410  ;;  %v1167_v19 = vsel %vm990_vm3, %v2491_v17, 0.0 }
 0x517   : > { %v1412_v20 = vsub.f32 %v1408_v62, %v1411_v18  ;;  %1168 = vadd.xlane.f32.xlu0 %v1167_v19  ;;  %v2481_v62 = vld [vmem:[#allocation16 + $0x8] sm:$0xff]  }
 0x518   : > { %2220 = vmatpush3.bf16.msra.mxu0 %v2481_v62 }
 0x519   : > { %v1413_v23 = vmul.f32 1.442695, %v1412_v20  ;;  %2233 = vmatprep.subr.bf16.mxu0 %v3127_v0 }
 0x51b   : > { %2494 = vpow2.f32 %v1413_v23 }
 0x51d   : > { %v2493_v25 = vpop.eup %2492 }
 0x51e   : > { %v1291_v21 = vsel %vm990_vm3, %v2493_v25, 0.0 }
 0x51f   : > { %1292 = vadd.xlane.f32.xlu1 %v1291_v21 }
 0x525   : > { %v2495_v27 = vpop.eup %2494 }
 0x526   : > { %v1415_v28 = vsel %vm990_vm3, %v2495_v27, 0.0 }
 0x527   : > { %1416 = vadd.xlane.f32.xlu0 %v1415_v28 }
 0x52f   : > { %v1046_v29 = vpop.xlane.xlu1 %1045 }
 0x530   : > { %2496 = vrcp.f32 %v1046_v29  ;;  %1297 = vrot.lane.b32.xlu1 %v3794_v22, %s3133_s19  ;;  %s2996_s19 = sshll.u32 %s3139_s23, 4  ;;  %s2997_s19 = int_to_ptr.vmem [resolvable:$false] %s2996_s19 }
 0x531   : > { %p2999_p2 = scmp.lt.s32.totalorder %s3882_s9, %s2997_s19 }
 0x533   : > { %v1054_v30 = vpop.permute.xlu1 %1053 }
 0x534   : > { %v1060_v31 = vsel %vm1058_vm4, %v1054_v30, 0  ;;  %1421 = vrot.lane.b32.xlu1 %v3804_v26, %s3134_s15  ;;  %v2482_v30 = vld [vmem:[#allocation22] sm:$0xff]   ;;  %s2998_s15 = scalar_lea.vmem %s2997_s19, 256 }
 0x535   : > { %2176 = vmatpush3.bf16.msra.mxu1 %v1060_v31  ;;  %v2483_v31 = vld [vmem:[#allocation22 + $0x8] sm:$0xff]   ;;  %p3000_p8 = scmp.lt.s32.totalorder %s2998_s15, %s2992_s5 }
 0x536   : > { %2187 = vmatprep.subr.bf16.mxu1 %v3127_v0 }
 0x537   : > { %p3001_p1 = por %p3000_p8, %p2999_p2 }
 0x539   : > { %p3002_p6 = pnand %p3001_p1, %p2995_p7 }
 0x53a   : > { %v2497_v32 = vpop.eup %2496 }
 0x53b   : > { %v1048_v33 = vmul.f32 %v2497_v32, %v2489_v8 }
 0x53d   : > { %1173 = vrot.lane.b32.xlu0 %v3798_v24, %s3135_s6  ;;  %v1049_v34 = vpack.c.bf16 %v1048_v33, %v1048_v33 }
 0x53f   : > { %2178 = vmatmul.mubr.msk.bf16.vlgmr.msra.gmra.mrb[8].mxu1 %vm990_vm3, %v1049_v34 }
 0x540   : > { %2189 = vmatprep.mubr.msk.bf16.mxu1 %vm3128_vm0, %v3127_v0 }
 0x5a4   : > { %v1169_v22 = vpop.xlane.xlu0 %1168 }
 0x5a5   : > { %2498 = vrcp.f32 %v1169_v22  ;;  %v2099_v22 = vld [vmem:[#allocation19] ss:$0 sm:$0xff] }
 0x5ac   : > { %v1293_v35 = vpop.xlane.xlu1 %1292 }
 0x5ad   : > { %2500 = vrcp.f32 %v1293_v35 }
 0x5af   : > { %v2499_v36 = vpop.eup %2498 }
 0x5b0   : > { %v1171_v37 = vmul.f32 %v2499_v36, %v2491_v17  ;;  %v1298_v40 = vpop.permute.xlu1 %1297  ;;  %v2100_v36 = vld [vmem:[#allocation21] ss:$0 sm:$0xff] }
 0x5b1   : > { %v1303_v42 = vsel %vm1058_vm4, %v1298_v40, 0  ;;  %v2485_v40 = vld [vmem:[#allocation25 + $0x8] sm:$0xff]  }
 0x5b2   : > { %v1172_v24 = vpack.c.bf16 %v1171_v37, %v1171_v37 }
 0x5b4   : > { %v1417_v26 = vpop.xlane.xlu0 %1416  ;;  %v1422_v44 = vpop.permute.xlu1 %1421 }
 0x5b5   : > { %2502 = vrcp.f32 %v1417_v26  ;;  %v1427_v47 = vsel %vm1058_vm4, %v1422_v44, 0 }
 0x5b7   : > { %v2501_v41 = vpop.eup %2500 }
 0x5b8   : > { %v1174_v38 = vpop.permute.xlu0 %1173  ;;  %v1295_v43 = vmul.f32 %v2501_v41, %v2493_v25  ;;  %v2487_v41 = vld [vmem:[#allocation25 + $0x18] sm:$0xff]  }
 0x5b9   : > { %v1179_v39 = vsel %vm1058_vm4, %v1174_v38, 0 }
 0x5ba   : > { %2188 = vmatpush3.bf16.msra.mxu1 %v1179_v39  ;;  %v1296_v45 = vpack.c.bf16 %v1295_v43, %v1295_v43  ;;  %v2484_v39 = vld [vmem:[#allocation25] sm:$0xff]  }
 0x5bb   : > { %2199 = vmatprep.subr.bf16.mxu1 %v3127_v0 }
 0x5bd   : > { %2190 = vmatmul.mubr.msk.bf16.vlgmr.msra.gmra.mrb[12].mxu1 %vm990_vm3, %v1172_v24  ;;  %v2486_v24 = vld [vmem:[#allocation25 + $0x10] sm:$0xff]  }
 0x5be   : > { %2200 = vmatpush3.bf16.msra.mxu1 %v1303_v42  ;;  %2201 = vmatprep.mubr.msk.bf16.mxu1 %vm3128_vm0, %v3127_v0  ;;  %v2101_v42 = vld [vmem:[#allocation24] ss:$0 sm:$0xff] }
 0x5bf   : > { %2211 = vmatprep.subr.bf16.mxu1 %v3127_v0  ;;  %v2503_v46 = vpop.eup %2502 }
 0x5c0   : > { %v1419_v48 = vmul.f32 %v2503_v46, %v2495_v27 }
 0x5c2   : > { %v1420_v49 = vpack.c.bf16 %v1419_v48, %v1419_v48 }
 0x5c5   : > { %2202 = vmatmul.mubr.msk.bf16.vlgmr.msra.gmra.mrb[16].mxu1 %vm990_vm3, %v1296_v45 }
 0x5c6   : > { %2212 = vmatpush3.bf16.msra.mxu1 %v1427_v47  ;;  %2213 = vmatprep.mubr.msk.bf16.mxu1 %vm3128_vm0, %v3127_v0 }
 0x5c7   : > { %2225 = vmatprep.subr.bf16.mxu1 %v3127_v0 }
 0x5cd   : > { %2214 = vmatmul.mubr.msk.bf16.vlgmr.msra.gmra.mrb[20].mxu1 %vm990_vm3, %v1420_v49 }
 0x5ce   : > { %2229 = vmatprep.mubr.msk.bf16.mxu1 %vm3128_vm0, %v3127_v0  ;;  %2226 = vmatpush3.bf16.msra.mxu1 %v2482_v30 }
 0x5cf   : > { %2227 = vmatprep.subr.bf16.mxu1 %v3127_v0 }
 0x5d2   : > { %2228 = vmatpush3.bf16.msra.mxu1 %v2483_v31 }
 0x612   : > { %v1096_v50 = vpop.f32.mrb[8].mxu1 }
 0x613   : > { %v1102_v51 = vpack.c.bf16 %v1096_v50, %v1096_v50  ;;  %v2179_v52 = vpop.f32.mrb[9].mxu1 }
 0x614   : > { %v1099_v53 = vpop.f32.mrb[10].mxu1 }
 0x615   : > { %1104 = vst.msk [vmem:[#allocation3] sm:$0xf] %vm1103_vm5, %v1102_v51  ;;  %v2180_v54 = vpop.f32.mrb[11].mxu1 }
 0x616   : > { %v2105_v54 = vld [vmem:[#allocation27] ss:$0 sm:$0xff] }
 0x690   : > { %v1215_v55 = vpop.f32.mrb[12].mxu1 }
 0x691   : > { %v2117_v56 = vpack.c.bf16 %v1215_v55, %v1215_v55  ;;  %v2191_v57 = vpop.f32.mrb[13].mxu1 }
 0x692   : > { %v1218_v58 = vpop.f32.mrb[14].mxu1 }
 0x693   : > { %1225 = vrot.lane.b32.xlu0 %v2117_v56, %s3136_s13  ;;  %v2192_v59 = vpop.f32.mrb[15].mxu1 }
 0x698   : > { %v1339_v61 = vpop.f32.mrb[16].mxu1 }
 0x699   : > { %v2118_v63 = vpack.c.bf16 %v1339_v61, %v1339_v61  ;;  %v2203_v1 = vpop.f32.mrb[17].mxu1 }
 0x69a   : > { %v1342_v2 = vpop.f32.mrb[18].mxu1 }
 0x69b   : > { %1349 = vrot.lane.b32.xlu1 %v2118_v63, %s3137_s10  ;;  %v2204_v3 = vpop.f32.mrb[19].mxu1 }
 0x6a0   : > { %v1463_v4 = vpop.f32.mrb[20].mxu1 }
 0x6a1   : > { %v2119_v5 = vpack.c.bf16 %v1463_v4, %v1463_v4  ;;  %v2215_v7 = vpop.f32.mrb[21].mxu1 }
 0x6a2   : > { %v1466_v8 = vpop.f32.mrb[22].mxu1 }
 0x6a3   : > { %1473 = vrot.lane.b32.xlu0 %v2119_v5, %s3138_s17  ;;  %v2216_v9 = vpop.f32.mrb[23].mxu1  ;;  %v2111_v8 = vld [vmem:[#allocation28] ss:$0 sm:$0xff] }
 0x705   : > { %v1226_v10 = vpop.permute.xlu0 %1225 }
 0x706   : > { %1229 = vst.msk [vmem:[#allocation3] sm:$0xf] %vm1228_vm6, %v1226_v10  ;;  %v2112_v10 = vld [vmem:[#allocation30] ss:$0 sm:$0xff] }
 0x70d   : > { %v1350_v11 = vpop.permute.xlu1 %1349 }
 0x70e   : > { %1353 = vst.msk [vmem:[#allocation3] sm:$0xf] %vm1352_vm7, %v1350_v11 }
 0x715   : > { %v1474_v12 = vpop.permute.xlu0 %1473 }
 0x716   : > { %1477 = vst.msk [vmem:[#allocation3] sm:$0xf] %vm1476_vm8, %v1474_v12 }
 0x71d   : > { %v1478_v13 = vld [vmem:[#allocation3] sm:$0xf] }
 0x71e   : > { %2222 = vmatmul.mubr.msk.bf16.vlgmr.msra.gmra.mrb[16].mxu0 %vm863_vm1, %v1478_v13 }
 0x71f   : > { %2241 = vmatprep.mubr.msk.bf16.mxu0 %vm3128_vm0, %v3127_v0  ;;  %2234 = vmatpush3.bf16.msra.mxu0 %v2484_v39 }
 0x720   : > { %2235 = vmatprep.subr.bf16.mxu0 %v3127_v0 }
 0x723   : > { %2236 = vmatpush3.bf16.msra.mxu0 %v2485_v40 }
 0x724   : > { %2237 = vmatprep.subr.bf16.mxu0 %v3127_v0 }
 0x727   : > { %2238 = vmatpush3.bf16.msra.mxu0 %v2486_v24 }
 0x728   : > { %2239 = vmatprep.subr.bf16.mxu0 %v3127_v0 }
 0x72b   : > { %2240 = vmatpush3.bf16.msra.mxu0 %v2487_v41 }
 0x7f1   : > { %v1539_v15 = vpop.f32.mrb[16].mxu0 }
 0x7f2   : > { %v1540_v16 = vadd.f32 %v2095_v14, %v1539_v15  ;;  %v2223_v17 = vpop.f32.mrb[17].mxu0 }
 0x7f3   : > { %v1542_v18 = vpop.f32.mrb[18].mxu0 }
 0x7f4   : > { %v2224_v19 = vpop.f32.mrb[19].mxu0  ;;  %v1545_v20 = vadd.f32 %v1540_v16, %v3783_v6 }
 0x7f6   : > { %v1546_v23 = vsel %vm863_vm1, %v1545_v20, 0.0 }
 0x7f7   : > { %1547 = vadd.xlane.f32.xlu1 %v1546_v23 }
 0x884   : > { %v1548_v25 = vpop.xlane.xlu1 %1547 }
 0x885   : > { %v1550_v21 = vmul.f32 0.03125, %v1548_v25 }
 0x887   : > { %v1551_v27 = vsub.f32 %v1545_v20, %v1550_v21 }
 0x889   : > { %v1552_v28 = vmul.f32 %v1551_v27, %v1551_v27 }
 0x88b   : > { %v1553_v29 = vsel %vm863_vm1, %v1552_v28, 0.0 }
 0x88c   : > { %1554 = vadd.xlane.f32.xlu0 %v1553_v29 }
 0x919   : > { %v1555_v32 = vpop.xlane.xlu0 %1554 }
 0x91a   : > { %v1556_v33 = vmul.f32 0.03125, %v1555_v32 }
 0x91c   : > { %v1557_v34 = vadd.f32 1e-12, %v1556_v33 }
 0x91e   : > { %2504 = vrsqrt.f32 %v1557_v34 }
 0x928   : > { %v2505_v6 = vpop.eup %2504 }
 0x929   : > { %v1559_v35 = vmul.f32 %v2505_v6, %v1551_v27 }
 0x92b   : > { %v1567_v26 = vmul.f32 %v2099_v22, %v1559_v35 }
 0x92d   : > { %v1575_v37 = vadd.f32 %v2100_v36, %v1567_v26 }
 0x92f   : > { %v1576_v38 = vpack.c.bf16 %v1575_v37, %v1575_v37 }
 0x931   : > { %2230 = vmatmul.mubr.msk.bf16.vlgmr.msra.gmra.mrb[24].mxu1 %vm863_vm1, %v1576_v38 }
 0xa04   : > { %v1637_v43 = vpop.f32.mrb[24].mxu1 }
 0xa05   : > { %v1638_v44 = vadd.f32 %v2101_v42, %v1637_v43  ;;  %v2231_v45 = vpop.f32.mrb[25].mxu1 }
 0xa06   : > { %v1640_v46 = vpop.f32.mrb[26].mxu1 }
 0xa07   : > { %v1644_v47 = vmul.f32 0.70710677, %v1638_v44  ;;  %v2232_v48 = vpop.f32.mrb[27].mxu1  ;;  %v1643_v50 = vmul.f32 0.5, %v1638_v44 }
 0xa09   : > { %2506 = verf.f32 %v1644_v47 }
 0xa13   : > { %v2507_v49 = vpop.eup %2506 }
 0xa14   : > { %v1646_v51 = vadd.f32 1.0, %v2507_v49 }
 0xa16   : > { %v1647_v52 = vmul.f32 %v1646_v51, %v1643_v50 }
 0xa18   : > { %v1648_v53 = vpack.c.bf16 %v1647_v52, %v1647_v52 }
 0xa1a   : > { %2242 = vmatmul.mubr.msk.bf16.vlgmr.msra.gmra.mrb[20].mxu0 %vm1688_vm9, %v1648_v53 }
 0xaed   : > { %v1726_v55 = vpop.f32.mrb[20].mxu0 }
 0xaee   : > { %v1727_v0 = vadd.f32 %v2105_v54, %v1726_v55  ;;  %v2243_v56 = vpop.f32.mrb[21].mxu0 }
 0xaef   : > { %v1729_v57 = vpop.f32.mrb[22].mxu0 }
 0xaf0   : > { %v2244_v58 = vpop.f32.mrb[23].mxu0  ;;  %v1732_v59 = vadd.f32 %v1727_v0, %v1575_v37 }
 0xaf2   : > { %v1733_v60 = vsel %vm863_vm1, %v1732_v59, 0.0 }
 0xaf3   : > { %1734 = vadd.xlane.f32.xlu0 %v1733_v60 }
 0xb80   : > { %v1735_v61 = vpop.xlane.xlu0 %1734 }
 0xb81   : > { %v1736_v62 = vmul.f32 0.03125, %v1735_v61 }
 0xb83   : > { %v1737_v63 = vsub.f32 %v1732_v59, %v1736_v62 }
 0xb85   : > { %v1738_v1 = vmul.f32 %v1737_v63, %v1737_v63 }
 0xb87   : > { %v1739_v2 = vsel %vm863_vm1, %v1738_v1, 0.0 }
 0xb88   : > { %1740 = vadd.xlane.f32.xlu1 %v1739_v2 }
 0xc15   : > { %v1741_v3 = vpop.xlane.xlu1 %1740 }
 0xc16   : > { %v1742_v4 = vmul.f32 0.03125, %v1741_v3 }
 0xc18   : > { %v1743_v5 = vadd.f32 1e-12, %v1742_v4 }
 0xc1a   : > { %2508 = vrsqrt.f32 %v1743_v5 }
 0xc24   : > { %v2509_v7 = vpop.eup %2508 }
 0xc25   : > { %v1745_v9 = vmul.f32 %v2509_v7, %v1737_v63 }
 0xc27   : > { %v1753_v11 = vmul.f32 %v2111_v8, %v1745_v9 }
 0xc29   : > { %v1761_v12 = vadd.f32 %v2112_v10, %v1753_v11 }
 0xc2b   : > { %1762 = vst.msk [vmem:[%s833_s21] sm:$0xff] %vm863_vm1, %v1761_v12 }
 0xc2c   : > { %3005 = shalt.err (!%p3002_p6)
}
 0xc2d   : > { %s3006_s11 = scalar_lea.hbm %s3880_s3, 128  ;;  %s3010_s10 = scalar_lea.hbm %s4044_s0, 256 }
 0xc2e   : > { %p3007_p11 = scmp.ne.s32.totalorder %s3880_s3, %s3006_s11  ;;  %p3011_p10 = scmp.lt.u32.totalorder %s3880_s3, %s4044_s0 }
 0xc2f   : > { %p3012_p9 = scmp.lt.u32.totalorder %s3010_s10, %s3006_s11  ;;  %p3014_p12 = scmp.lt.u32.totalorder %s3006_s11, %s3880_s3 }
 0xc30   : > { %p3008_p0 = pnand %p3007_p11, %p4045_p13 }
 0xc31   : > { %p3013_p5 = por %p3012_p9, %p3011_p10 }
 0xc32   : > { %p3009_p3 = pneg %p3008_p0 }
 0xc33   : > { %p3015_p4 = por %p3014_p12, %p3013_p5 }
 0xc35   : > { %p3016_p7 = pnand %p3015_p4, %p3009_p3 }
 0xc37   : > { %3019 = shalt.err (!%p3016_p7)
}
 0xc38   : > { %2307 = dma.vmem_to_hbm [thread:$0]  (%p4045_p13), %s3882_s9, 128, %s3880_s3, %s1764_s1  }
 0xc39 PF: > { %s1790_s7 = sand.u32 1, %s3086_s24   ;;  %p4046_p2 = scmp.ne.s32.totalorder %s4007_s2, 0 }
 0xc3a   : > { %p4047_p8 = scmp.ge.s32.totalorder %s3106_s29, 2  ;;  %s1791_s21 = scalar_lea.sflag [#allocation6], %s1790_s7 }
 0xc3c   : > { %p2363_p1 = pnand %p4047_p8, %p4046_p2 }
 0xc3e   : > { %3081 = dma.done.wait (!%p2363_p1), %s1791_s21, 128  }
 0xc3f   : > { %3083 = vsyncadd (!%p2363_p1), %s1791_s21, 4294967168  ;;  %s43_s29 = sadd.s32 1, %s3106_s29   ;;  %s4048_s24 = smov %s3090_s25 }
 0xc40   : > { %p40_p6 = scmp.ge.s32.totalorder %s43_s29, 4   ;;  %s4049_s25 = smov %s3094_s26 }
 0xc41   : > { %s4050_s26 = smov %s3468_s22  ;;  %s4051_s27 = smov %s3102_s28 }
 0xc42   : > { %s4052_s28 = smov %s4054_s8  ;;  %42 = sbr.rel (!%p40_p6) target bundleno = 34 (0x22), region = 217 }
 0xc49   :  { %1796 = vsyncpa [#allocation5], 1 }
 0xc4a   :  { %1798 = vsyncpa [#allocation5 + $0x1], 1 }
 0xc4b   :  { %1799 = vsyncpa [#allocation8], 1 }
 0xc4c   :  { %1801 = vsyncpa [#allocation8 + $0x1], 1 }
 0xc4d   :  { %1802 = vsyncpa [#allocation11], 1 }
 0xc4e   :  { %1803 = vsyncpa [#allocation14], 1 }
 0xc4f   :  { %1804 = vsyncpa [#allocation17], 1 }
 0xc50   :  { %1805 = vsyncpa [#allocation20], 1 }
 0xc51   :  { %1806 = vsyncpa [#allocation23], 1 }
 0xc52   :  { %1807 = vsyncpa [#allocation26], 1 }
 0xc53   :  { %1808 = vsyncpa [#allocation29], 1 }
 0xc54   :  { %1809 = vsyncpa [#allocation6], 1 }
 0xc55   :  { %1811 = vsyncpa [#allocation6 + $0x1], 1 }

</bundles_post_ra>
